<compile_context>
chip_gen: v5e
topology: v5e:2x2
jax: 0.10.0
libtpu: 0.0.40
codegen_flags: <defaults>
</compile_context>

<pallas_src>
import functools

import jax
import jax.numpy as jnp
from jax.experimental import pallas as pl
from jax.experimental.pallas import tpu as pltpu


def pointnet_kernel(x_ref, w0_ref, w1_ref, w2_ref, w3_ref, w4_ref, b_ref,
                    o_ref, *, bias_offsets, bias_widths, emb_dims, out_chunk):
    """Five fused (S|T) 1x1-conv + ReLU + max-fusion layers on one point tile.

    Writes the tile already transposed to (emb, tn) so the wrapper needs no
    XLA relayout afterwards.
    """
    w_refs = (w0_ref, w1_ref, w2_ref, w3_ref)
    h = x_ref[0]                                     # (tn, 6), bf16

    # Layers 0..3: one MXU matmul covering both branches (bf16 in, f32 acc),
    # f32 bias/ReLU/max, then bf16 inter-layer activation (halves vreg/VMEM).
    for l in range(4):
        off, width = bias_offsets[l], bias_widths[l]
        y = jnp.dot(h, w_refs[l][...], preferred_element_type=jnp.float32)
        y = jnp.maximum(y + b_ref[:, off:off + width], 0.0)
        cout = width // 2
        # TODO(synk): fusion() is not defined in modelFusion/Pointnet.py (only
        # imported). A symmetric element-wise max is used as a stand-in, so the
        # S/T activations coincide and one fused tensor is carried forward.
        h = jnp.maximum(y[:, :cout], y[:, cout:]).astype(jnp.bfloat16)

    # Layer 4: chunked along output columns so the (tn, 2*emb) f32 intermediate
    # never materializes. Each fused chunk is transposed on the XLU and stored
    # straight into the (1, emb, tn) output block (bf16).
    off4 = bias_offsets[4]
    for c in range(0, emb_dims, out_chunk):
        ys = jnp.dot(h, w4_ref[:, c:c + out_chunk],
                     preferred_element_type=jnp.float32)
        yt = jnp.dot(h, w4_ref[:, emb_dims + c:emb_dims + c + out_chunk],
                     preferred_element_type=jnp.float32)
        ys = jnp.maximum(ys + b_ref[:, off4 + c:off4 + c + out_chunk], 0.0)
        yt = jnp.maximum(
            yt + b_ref[:, off4 + emb_dims + c:off4 + emb_dims + c + out_chunk],
            0.0)
        fused = jnp.maximum(ys, yt)                  # (tn, out_chunk), f32
        o_ref[0, c:c + out_chunk, :] = fused.T.astype(o_ref.dtype)


def init_params(key, emb_dims=1024):
    """Deterministic Conv1d-style init: U(-1/sqrt(C_in), 1/sqrt(C_in))."""
    chans = [3, 64, 64, 64, 128, emb_dims]
    params = []
    for l in range(5):
        cin, cout = chans[l], chans[l + 1]
        bound = 1.0 / (cin ** 0.5)
        key, k1, k2, k3, k4 = jax.random.split(key, 5)
        ws = jax.random.uniform(k1, (cin, cout), jnp.float32, -bound, bound)
        bs = jax.random.uniform(k2, (1, cout), jnp.float32, -bound, bound)
        wt = jax.random.uniform(k3, (cin, cout), jnp.float32, -bound, bound)
        bt = jax.random.uniform(k4, (1, cout), jnp.float32, -bound, bound)
        params.append((ws, bs, wt, bt))
    return params


def _pack_params(params):
    """Pack per-branch Conv1d params into fused bf16 weights + one f32 bias row."""
    ws0, bs0, wt0, bt0 = params[0]
    cin0, cout0 = ws0.shape
    # Layer 0: branch inputs differ -> block-diagonal weight over [xs | xt].
    w0 = jnp.zeros((2 * cin0, 2 * cout0), jnp.float32)
    w0 = w0.at[:cin0, :cout0].set(ws0)
    w0 = w0.at[cin0:, cout0:].set(wt0)
    weights = [w0.astype(jnp.bfloat16)]
    biases = [jnp.concatenate([bs0, bt0], axis=-1)]
    # Layers 1..4: branch inputs are equal (post-fusion) -> concat along cout.
    for (ws, bs, wt, bt) in params[1:]:
        weights.append(jnp.concatenate([ws, wt], axis=-1).astype(jnp.bfloat16))
        biases.append(jnp.concatenate([bs, bt], axis=-1))
    bias_all = jnp.concatenate(biases, axis=-1).astype(jnp.float32)
    widths = tuple(int(b.shape[-1]) for b in biases)   # (128,128,128,256,2*emb)
    offsets = tuple(int(sum(widths[:l])) for l in range(len(widths)))
    return weights, bias_all, offsets, widths


@functools.partial(jax.jit, static_argnames=("emb_dims", "input_shape", "tn"))
def pointnet_forward(pointS, pointT, params, *, emb_dims=1024,
                     input_shape="bnc", tn=512):
    if input_shape not in ("bcn", "bnc"):
        raise ValueError("Allowed shapes are 'bcn' and 'bnc'")
    if emb_dims % 128 != 0:
        raise ValueError("emb_dims must be a multiple of 128")
    if tn % 128 != 0:
        raise ValueError("tn must be a multiple of 128")

    if input_shape == "bnc":                 # (B, N, 3) -> keep channel-last
        xs3, xt3 = pointS, pointT
    else:                                    # (B, 3, N) -> (B, N, 3)
        xs3 = jnp.transpose(pointS, (0, 2, 1))
        xt3 = jnp.transpose(pointT, (0, 2, 1))

    B, N, C = xs3.shape
    # One channel-last input carrying both branches: (B, N, 2*C), bf16.
    x_in = jnp.concatenate([xs3, xt3], axis=-1).astype(jnp.bfloat16)

    # Pad the per-batch point count up to a multiple of the tile size.
    grid_n = pl.cdiv(N, tn)
    N_pad = grid_n * tn
    if N_pad != N:
        x_in = jnp.pad(x_in, ((0, 0), (0, N_pad - N), (0, 0)))

    weights, bias_all, offsets, widths = _pack_params(params)
    out_chunk = min(512, emb_dims)           # column chunking of layer 4

    # Point tiles move with the grid; weights/biases have constant block
    # indices, so the pipeline does not re-fetch them per step.
    in_specs = [pl.BlockSpec((1, tn, 2 * C), lambda b, i: (b, i, 0))]
    for w in weights:
        in_specs.append(pl.BlockSpec(w.shape, lambda b, i: (0, 0)))
    in_specs.append(pl.BlockSpec(bias_all.shape, lambda b, i: (0, 0)))

    out_spec = pl.BlockSpec((1, emb_dims, tn), lambda b, i: (b, 0, i))
    out_shape = jax.ShapeDtypeStruct((B, emb_dims, N_pad), jnp.bfloat16)

    kernel = functools.partial(
        pointnet_kernel, bias_offsets=offsets, bias_widths=widths,
        emb_dims=emb_dims, out_chunk=out_chunk)

    # Advisory cost estimate: helps XLA schedule the surrounding concat/pad.
    chans = [3, 64, 64, 64, 128, emb_dims]
    flops_per_pt = 4 * sum(chans[l] * chans[l + 1] for l in range(5))
    bytes_accessed = (int(x_in.size) * 2                       # bf16 input
                      + B * emb_dims * N_pad * 2               # bf16 output
                      + sum(int(w.size) * 2 for w in weights)  # bf16 weights
                      + int(bias_all.size) * 4)                # f32 bias
    cost = pl.CostEstimate(flops=B * N_pad * flops_per_pt,
                           transcendentals=0,
                           bytes_accessed=bytes_accessed)

    out = pl.pallas_call(
        kernel,
        grid_spec=pltpu.PrefetchScalarGridSpec(
            num_scalar_prefetch=0,
            grid=(B, grid_n),
            in_specs=in_specs,
            out_specs=out_spec,
        ),
        out_shape=out_shape,
        compiler_params=pltpu.CompilerParams(
            # Both axes independent -> megacore / 2-TC sharding on v7x.
            dimension_semantics=("parallel", "parallel"),
            # Above v5e's 16 MiB scoped default; well under v7x's 64 MiB
            # physical VMEM (footprint here is only a few MiB thanks to the
            # chunked last layer and bf16 activations/output).
            vmem_limit_bytes=48 * 1024 * 1024,
        ),
        cost_estimate=cost,
    )(x_in, *weights, bias_all)

    if N_pad != N:
        out = out[:, :, :N]                  # drop padded (garbage) points
    # Output is already (B, emb_dims, N), matching PyTorch's Conv1d layout;
    # under the symmetric stand-in fusion the S and T outputs are identical.
    return out, out


def reference_forward(pointS, pointT, params, input_shape="bnc"):
    """Pure-JAX f32 reference for correctness checking."""
    if input_shape == "bnc":
        xs, xt = pointS, pointT
    else:
        xs = jnp.transpose(pointS, (0, 2, 1))
        xt = jnp.transpose(pointT, (0, 2, 1))
    xs = xs.astype(jnp.float32)
    xt = xt.astype(jnp.float32)
    for (ws, bs, wt, bt) in params:
        fs = jax.nn.relu(jnp.einsum("bnc,cd->bnd", xs, ws) + bs)
        ft = jax.nn.relu(jnp.einsum("bnc,cd->bnd", xt, wt) + bt)
        fused = jnp.maximum(fs, ft)
        xs = fused
        xt = fused
    return xs.transpose(0, 2, 1), xt.transpose(0, 2, 1)


if __name__ == "__main__":
    B, N = 2, 512          # small point clouds
    EMB = 256              # small emb_dims (constructor argument of PointNet)
    TN = 256               # -> grid (2, 2): 4 tiles, keeps both v7x TCs busy

    key = jax.random.PRNGKey(0)
    kS, kT, kP = jax.random.split(key, 3)
    pointS = jax.random.normal(kS, (B, N, 3), jnp.float32)   # 'bnc' input
    pointT = jax.random.normal(kT, (B, N, 3), jnp.float32)
    params = init_params(kP, emb_dims=EMB)

    outS, outT = pointnet_forward(pointS, pointT, params,
                                  emb_dims=EMB, input_shape="bnc", tn=TN)
    outS, outT = jax.block_until_ready((outS, outT))

    refS, refT = reference_forward(pointS, pointT, params, input_shape="bnc")
    assert outS.shape == (B, EMB, N) and outT.shape == (B, EMB, N)

    # bf16 matmuls + bf16 output vs f32 reference: normalized max error.
    scale = jnp.max(jnp.abs(refS)) + 1e-6
    errS = float(jnp.max(jnp.abs(outS.astype(jnp.float32) - refS)) / scale)
    errT = float(jnp.max(jnp.abs(outT.astype(jnp.float32) - refT)) / scale)
    assert errS < 3e-2, f"S-branch mismatch: rel err {errS}"
    assert errT < 3e-2, f"T-branch mismatch: rel err {errT}"

    print("KERNEL_OK")
</pallas_src>

<mosaic_0001>
module attributes {stable_mosaic.version = 11 : i64} {
  func.func @pointnet_kernel(%arg0: i32, %arg1: i32, %arg2: memref<1x256x6xbf16, #tpu.memory_space<vmem>>, %arg3: memref<6x128xbf16, #tpu.memory_space<vmem>>, %arg4: memref<64x128xbf16, #tpu.memory_space<vmem>>, %arg5: memref<64x128xbf16, #tpu.memory_space<vmem>>, %arg6: memref<64x256xbf16, #tpu.memory_space<vmem>>, %arg7: memref<128x512xbf16, #tpu.memory_space<vmem>>, %arg8: memref<1x1152xf32, #tpu.memory_space<vmem>>, %arg9: memref<1x256x256xbf16, #tpu.memory_space<vmem>>) attributes {dimension_semantics = [#tpu.dimension_semantics<parallel>, #tpu.dimension_semantics<parallel>], iteration_bounds = array<i64: 2, 2>, scalar_prefetch = 0 : i64, scratch_operands = 0 : i64, tpu.core_type = #tpu.core_type<tc>, window_params = [{transform_indices = @transform_0, window_bounds = array<i64: 1, 256, 6>}, {pipeline_mode = #tpu.pipeline_mode<synchronous>, transform_indices = @transform_1, window_bounds = array<i64: 6, 128>}, {pipeline_mode = #tpu.pipeline_mode<synchronous>, transform_indices = @transform_2, window_bounds = array<i64: 64, 128>}, {pipeline_mode = #tpu.pipeline_mode<synchronous>, transform_indices = @transform_3, window_bounds = array<i64: 64, 128>}, {pipeline_mode = #tpu.pipeline_mode<synchronous>, transform_indices = @transform_4, window_bounds = array<i64: 64, 256>}, {pipeline_mode = #tpu.pipeline_mode<synchronous>, transform_indices = @transform_5, window_bounds = array<i64: 128, 512>}, {pipeline_mode = #tpu.pipeline_mode<synchronous>, transform_indices = @transform_6, window_bounds = array<i64: 1, 1152>}, {transform_indices = @transform_7, window_bounds = array<i64: 1, 256, 256>}]} {
    %c0 = arith.constant 0 : index
    %c0_0 = arith.constant 0 : index
    %c0_1 = arith.constant 0 : index
    %0 = vector.load %arg2[%c0, %c0_0, %c0_1] : memref<1x256x6xbf16, #tpu.memory_space<vmem>>, vector<1x256x6xbf16>
    %1 = vector.shape_cast %0 : vector<1x256x6xbf16> to vector<256x6xbf16>
    %c0_2 = arith.constant 0 : index
    %c0_3 = arith.constant 0 : index
    %2 = vector.load %arg3[%c0_2, %c0_3] : memref<6x128xbf16, #tpu.memory_space<vmem>>, vector<6x128xbf16>
    %cst = arith.constant dense<0.000000e+00> : vector<256x128xf32>
    %3 = tpu.matmul %1, %2, %cst {dimension_numbers = #tpu.dot_dimension_numbers<[1], [0], [0], [1], [0, 0, 1, 1], [], []>} : vector<256x6xbf16>, vector<6x128xbf16>, vector<256x128xf32> -> vector<256x128xf32>
    %c0_4 = arith.constant 0 : index
    %c0_5 = arith.constant 0 : index
    %4 = vector.load %arg8[%c0_4, %c0_5] : memref<1x1152xf32, #tpu.memory_space<vmem>>, vector<1x128xf32>
    %5 = vector.broadcast %4 : vector<1x128xf32> to vector<256x128xf32>
    %6 = arith.addf %3, %5 : vector<256x128xf32>
    %cst_6 = arith.constant 0.000000e+00 : f32
    %7 = vector.broadcast %cst_6 : f32 to vector<256x128xf32>
    %8 = arith.maximumf %6, %7 : vector<256x128xf32>
    %9 = vector.extract_strided_slice %8 {offsets = [0, 0], sizes = [256, 64], strides = [1, 1]} : vector<256x128xf32> to vector<256x64xf32>
    %10 = vector.extract_strided_slice %8 {offsets = [0, 64], sizes = [256, 64], strides = [1, 1]} : vector<256x128xf32> to vector<256x64xf32>
    %11 = arith.maximumf %9, %10 : vector<256x64xf32>
    %12 = arith.truncf %11 : vector<256x64xf32> to vector<256x64xbf16>
    %c0_7 = arith.constant 0 : index
    %c0_8 = arith.constant 0 : index
    %13 = vector.load %arg4[%c0_7, %c0_8] : memref<64x128xbf16, #tpu.memory_space<vmem>>, vector<64x128xbf16>
    %cst_9 = arith.constant dense<0.000000e+00> : vector<256x128xf32>
    %14 = tpu.matmul %12, %13, %cst_9 {dimension_numbers = #tpu.dot_dimension_numbers<[1], [0], [0], [1], [0, 0, 1, 1], [], []>} : vector<256x64xbf16>, vector<64x128xbf16>, vector<256x128xf32> -> vector<256x128xf32>
    %c0_10 = arith.constant 0 : index
    %c128 = arith.constant 128 : index
    %15 = vector.load %arg8[%c0_10, %c128] : memref<1x1152xf32, #tpu.memory_space<vmem>>, vector<1x128xf32>
    %16 = vector.broadcast %15 : vector<1x128xf32> to vector<256x128xf32>
    %17 = arith.addf %14, %16 : vector<256x128xf32>
    %cst_11 = arith.constant 0.000000e+00 : f32
    %18 = vector.broadcast %cst_11 : f32 to vector<256x128xf32>
    %19 = arith.maximumf %17, %18 : vector<256x128xf32>
    %20 = vector.extract_strided_slice %19 {offsets = [0, 0], sizes = [256, 64], strides = [1, 1]} : vector<256x128xf32> to vector<256x64xf32>
    %21 = vector.extract_strided_slice %19 {offsets = [0, 64], sizes = [256, 64], strides = [1, 1]} : vector<256x128xf32> to vector<256x64xf32>
    %22 = arith.maximumf %20, %21 : vector<256x64xf32>
    %23 = arith.truncf %22 : vector<256x64xf32> to vector<256x64xbf16>
    %c0_12 = arith.constant 0 : index
    %c0_13 = arith.constant 0 : index
    %24 = vector.load %arg5[%c0_12, %c0_13] : memref<64x128xbf16, #tpu.memory_space<vmem>>, vector<64x128xbf16>
    %cst_14 = arith.constant dense<0.000000e+00> : vector<256x128xf32>
    %25 = tpu.matmul %23, %24, %cst_14 {dimension_numbers = #tpu.dot_dimension_numbers<[1], [0], [0], [1], [0, 0, 1, 1], [], []>} : vector<256x64xbf16>, vector<64x128xbf16>, vector<256x128xf32> -> vector<256x128xf32>
    %c0_15 = arith.constant 0 : index
    %c256 = arith.constant 256 : index
    %26 = vector.load %arg8[%c0_15, %c256] : memref<1x1152xf32, #tpu.memory_space<vmem>>, vector<1x128xf32>
    %27 = vector.broadcast %26 : vector<1x128xf32> to vector<256x128xf32>
    %28 = arith.addf %25, %27 : vector<256x128xf32>
    %cst_16 = arith.constant 0.000000e+00 : f32
    %29 = vector.broadcast %cst_16 : f32 to vector<256x128xf32>
    %30 = arith.maximumf %28, %29 : vector<256x128xf32>
    %31 = vector.extract_strided_slice %30 {offsets = [0, 0], sizes = [256, 64], strides = [1, 1]} : vector<256x128xf32> to vector<256x64xf32>
    %32 = vector.extract_strided_slice %30 {offsets = [0, 64], sizes = [256, 64], strides = [1, 1]} : vector<256x128xf32> to vector<256x64xf32>
    %33 = arith.maximumf %31, %32 : vector<256x64xf32>
    %34 = arith.truncf %33 : vector<256x64xf32> to vector<256x64xbf16>
    %c0_17 = arith.constant 0 : index
    %c0_18 = arith.constant 0 : index
    %35 = vector.load %arg6[%c0_17, %c0_18] : memref<64x256xbf16, #tpu.memory_space<vmem>>, vector<64x256xbf16>
    %cst_19 = arith.constant dense<0.000000e+00> : vector<256x256xf32>
    %36 = tpu.matmul %34, %35, %cst_19 {dimension_numbers = #tpu.dot_dimension_numbers<[1], [0], [0], [1], [0, 0, 1, 1], [], []>} : vector<256x64xbf16>, vector<64x256xbf16>, vector<256x256xf32> -> vector<256x256xf32>
    %c0_20 = arith.constant 0 : index
    %c384 = arith.constant 384 : index
    %37 = vector.load %arg8[%c0_20, %c384] : memref<1x1152xf32, #tpu.memory_space<vmem>>, vector<1x256xf32>
    %38 = vector.broadcast %37 : vector<1x256xf32> to vector<256x256xf32>
    %39 = arith.addf %36, %38 : vector<256x256xf32>
    %cst_21 = arith.constant 0.000000e+00 : f32
    %40 = vector.broadcast %cst_21 : f32 to vector<256x256xf32>
    %41 = arith.maximumf %39, %40 : vector<256x256xf32>
    %42 = vector.extract_strided_slice %41 {offsets = [0, 0], sizes = [256, 128], strides = [1, 1]} : vector<256x256xf32> to vector<256x128xf32>
    %43 = vector.extract_strided_slice %41 {offsets = [0, 128], sizes = [256, 128], strides = [1, 1]} : vector<256x256xf32> to vector<256x128xf32>
    %44 = arith.maximumf %42, %43 : vector<256x128xf32>
    %45 = arith.truncf %44 : vector<256x128xf32> to vector<256x128xbf16>
    %c0_22 = arith.constant 0 : index
    %c0_23 = arith.constant 0 : index
    %46 = vector.load %arg7[%c0_22, %c0_23] : memref<128x512xbf16, #tpu.memory_space<vmem>>, vector<128x256xbf16>
    %cst_24 = arith.constant dense<0.000000e+00> : vector<256x256xf32>
    %47 = tpu.matmul %45, %46, %cst_24 {dimension_numbers = #tpu.dot_dimension_numbers<[1], [0], [0], [1], [0, 0, 1, 1], [], []>} : vector<256x128xbf16>, vector<128x256xbf16>, vector<256x256xf32> -> vector<256x256xf32>
    %c0_25 = arith.constant 0 : index
    %c256_26 = arith.constant 256 : index
    %48 = vector.load %arg7[%c0_25, %c256_26] : memref<128x512xbf16, #tpu.memory_space<vmem>>, vector<128x256xbf16>
    %cst_27 = arith.constant dense<0.000000e+00> : vector<256x256xf32>
    %49 = tpu.matmul %45, %48, %cst_27 {dimension_numbers = #tpu.dot_dimension_numbers<[1], [0], [0], [1], [0, 0, 1, 1], [], []>} : vector<256x128xbf16>, vector<128x256xbf16>, vector<256x256xf32> -> vector<256x256xf32>
    %c0_28 = arith.constant 0 : index
    %c640 = arith.constant 640 : index
    %50 = vector.load %arg8[%c0_28, %c640] : memref<1x1152xf32, #tpu.memory_space<vmem>>, vector<1x256xf32>
    %51 = vector.broadcast %50 : vector<1x256xf32> to vector<256x256xf32>
    %52 = arith.addf %47, %51 : vector<256x256xf32>
    %cst_29 = arith.constant 0.000000e+00 : f32
    %53 = vector.broadcast %cst_29 : f32 to vector<256x256xf32>
    %54 = arith.maximumf %52, %53 : vector<256x256xf32>
    %c0_30 = arith.constant 0 : index
    %c896 = arith.constant 896 : index
    %55 = vector.load %arg8[%c0_30, %c896] : memref<1x1152xf32, #tpu.memory_space<vmem>>, vector<1x256xf32>
    %56 = vector.broadcast %55 : vector<1x256xf32> to vector<256x256xf32>
    %57 = arith.addf %49, %56 : vector<256x256xf32>
    %cst_31 = arith.constant 0.000000e+00 : f32
    %58 = vector.broadcast %cst_31 : f32 to vector<256x256xf32>
    %59 = arith.maximumf %57, %58 : vector<256x256xf32>
    %60 = arith.maximumf %54, %59 : vector<256x256xf32>
    %61 = tpu.transpose %60, [1, 0] : vector<256x256xf32> -> vector<256x256xf32>
    %62 = arith.truncf %61 : vector<256x256xf32> to vector<256x256xbf16>
    %c0_32 = arith.constant 0 : index
    %c0_33 = arith.constant 0 : index
    %c0_34 = arith.constant 0 : index
    %63 = vector.load %arg9[%c0_32, %c0_33, %c0_34] : memref<1x256x256xbf16, #tpu.memory_space<vmem>>, vector<1x256x256xbf16>
    %64 = vector.shape_cast %63 : vector<1x256x256xbf16> to vector<256x256xbf16>
    %65 = vector.shape_cast %62 : vector<256x256xbf16> to vector<1x256x256xbf16>
    tpu.vector_store %arg9[%c0_32, %c0_33, %c0_34], %65 {strides = array<i32>} : memref<1x256x256xbf16, #tpu.memory_space<vmem>>, vector<1x256x256xbf16>,
    return
  }
  func.func @transform_0(%arg0: i32, %arg1: i32) -> (i32, i32, i32) {
    %c0_i32 = arith.constant 0 : i32
    %c0_i32_0 = arith.constant 0 : i32
    return %arg0, %arg1, %c0_i32 : i32, i32, i32
  }
  func.func @transform_1(%arg0: i32, %arg1: i32) -> (i32, i32) {
    %c0_i32 = arith.constant 0 : i32
    %c0_i32_0 = arith.constant 0 : i32
    %c0_i32_1 = arith.constant 0 : i32
    return %c0_i32, %c0_i32_0 : i32, i32
  }
  func.func @transform_2(%arg0: i32, %arg1: i32) -> (i32, i32) {
    %c0_i32 = arith.constant 0 : i32
    %c0_i32_0 = arith.constant 0 : i32
    %c0_i32_1 = arith.constant 0 : i32
    return %c0_i32, %c0_i32_0 : i32, i32
  }
  func.func @transform_3(%arg0: i32, %arg1: i32) -> (i32, i32) {
    %c0_i32 = arith.constant 0 : i32
    %c0_i32_0 = arith.constant 0 : i32
    %c0_i32_1 = arith.constant 0 : i32
    return %c0_i32, %c0_i32_0 : i32, i32
  }
  func.func @transform_4(%arg0: i32, %arg1: i32) -> (i32, i32) {
    %c0_i32 = arith.constant 0 : i32
    %c0_i32_0 = arith.constant 0 : i32
    %c0_i32_1 = arith.constant 0 : i32
    return %c0_i32, %c0_i32_0 : i32, i32
  }
  func.func @transform_5(%arg0: i32, %arg1: i32) -> (i32, i32) {
    %c0_i32 = arith.constant 0 : i32
    %c0_i32_0 = arith.constant 0 : i32
    %c0_i32_1 = arith.constant 0 : i32
    return %c0_i32, %c0_i32_0 : i32, i32
  }
  func.func @transform_6(%arg0: i32, %arg1: i32) -> (i32, i32) {
    %c0_i32 = arith.constant 0 : i32
    %c0_i32_0 = arith.constant 0 : i32
    %c0_i32_1 = arith.constant 0 : i32
    return %c0_i32, %c0_i32_0 : i32, i32
  }
  func.func @transform_7(%arg0: i32, %arg1: i32) -> (i32, i32, i32) {
    %c0_i32 = arith.constant 0 : i32
    %c0_i32_0 = arith.constant 0 : i32
    return %arg0, %c0_i32, %arg1 : i32, i32, i32
  }
}

</mosaic_0001>

<bundles_post_ra>
// kernel: pointnet_forward.1
= control target key start
LH: loop header
LB: loop body
LE: loop exit
PB: predicated region body
PF: predicated region fallthrough
CT: control target
= control target key end

     0   :  { %s4150_s24 = smov 0   ;;  %s4152_s25 = smov 0   ;;  %s5951_s0 = inlined_call_operand.vmem [shape: bf16[2,512,6], index: 0, kind: input, shape index: {}]   ;;  %s5952_s1 = inlined_call_operand.vmem [shape: bf16[6,128], index: 1, kind: input, shape index: {}]   ;;  %s5953_s2 = inlined_call_operand.vmem [shape: bf16[64,128], index: 2, kind: input, shape index: {}]   ;;  %s5954_s3 = inlined_call_operand.vmem [shape: bf16[64,128], index: 3, kind: input, shape index: {}]   ;;  %s5955_s4 = inlined_call_operand.vmem [shape: bf16[64,256], index: 4, kind: input, shape index: {}]   ;;  %s5956_s5 = inlined_call_operand.vmem [shape: bf16[128,512], index: 5, kind: input, shape index: {}]   ;;  %s5957_s6 = inlined_call_operand.vmem [shape: f32[1,1152], index: 6, kind: input, shape index: {}]   ;;  %s5958_s7 = inlined_call_operand.vmem [shape: bf16[2,256,512], index: 7, kind: output, shape index: {}]  }
   0x1   :  { %s4154_s26 = smov 0   ;;  %s4156_s27 = smov 0  }
   0x2   :  { %s4158_s28 = smov 0   ;;  %s4160_s29 = smov 0  }
   0x3   :  { %s4162_s30 = smov 0  }
   0x4 LB: > { %s26_s8 = sadd.s32 1, %s4099_s28  ;;  %s29_s9 = sadd.s32 1, %s4103_s29  ;;  %s4107_s30 = sphi %s4162_s30, %s17_s30   ;;  %s4103_s29 = sphi %s4160_s29, %s5965_s29   ;;  %s4099_s28 = sphi %s4158_s28, %s5964_s28   ;;  %s4095_s27 = sphi %s4156_s27, %s5963_s27   ;;  %s4091_s26 = sphi %s4154_s26, %s5962_s26   ;;  %s4087_s25 = sphi %s4152_s25, %s5961_s25   ;;  %s4083_s24 = sphi %s4150_s24, %s5960_s24  }
   0x5   : > { %p27_p0 = scmp.ge.s32.totalorder %s26_s8, 2  ;;  %s3111_s10 = sadd.s32 4294967295, %s4107_s30  }
   0x6   : > { %p202_p1 = scmp.ne.s32.totalorder %s4087_s25, %s4083_s24  ;;  %p203_p2 = scmp.eq.s32.totalorder %s3111_s10, 3 }
   0x7   : > { %s5967_s8 = smov (%p27_p0, %s26_s8), 0  ;;  %s5969_s9 = smov (!%p27_p0, %s29_s9), %s4103_s29 }
   0x8   : > { %s188_s11 = ssub.s32 %s4099_s28, %s5967_s8  ;;  %p31_p3 = scmp.ge.s32.totalorder %s5969_s9, 2 }
   0x9   : > { %p3115_p4 = scmp.ge.s32.totalorder %s4107_s30, 1  ;;  %p4196_p5 = por %p203_p2, %p202_p1 }
   0xa   : > { %p258_p6 = scmp.lt.s32.totalorder %s4107_s30, 5  ;;  %s5971_s9 = smov (%p31_p3, %s5969_s9), 0 }
   0xb   : > { %s187_s13 = ssub.s32 %s4103_s29, %s5971_s9  ;;  %s192_s15 = sadd.s32 1, %s4087_s25 }
   0xc   : > { %p259_p7 = pnand %p3115_p4, %p258_p6  ;;  %s189_s14 = sor.u32 %s188_s11, %s187_s13 }
   0xd   : > { %p190_p8 = scmp.eq.s32.totalorder %s189_s14, 0  ;;  %s3117_s19 = sshll.u32 (!%p259_p7), %s4091_s26, 5 }
   0xe   : > { %262 = sbr.rel (%p259_p7) target bundleno = 1705 (0x6a9), region = 48  ;;  %p294_p9 = scmp.lt.s32.totalorder (!%p259_p7), %s4095_s27, 1 }
   0xf   : > { %s4207_s16 = scalar_select %p190_p8, %s4087_s25, %s192_s15  }
  0x10   : > { %p296_p10 = scmp.lt.s32.totalorder (!%p259_p7), %s3117_s19, 63  ;;  %s4109_s17 = smov (!%p259_p7), 64  }
  0x11   : > { %s290_s11 = sand.u32 (!%p259_p7), 1, %s4083_s24  }
  0x13   : > { %v337_v0 = vld [vmem:[%s5952_s1] sm:$0x7]  ;;  %vm471_vm0 = vcmask 1042432   ;;  %s295_s20 = scalar_select %p294_p9, %s4095_s27, 1  ;;  %vm422_vm1 = vcmask 48128   ;;  %v3481_v50 = vld [vmem:[%s5953_s2 + $0x18] sm:$0xff] }
  0x14   : > { %v473_v1 = vsel %vm471_vm0, %v337_v0, 0  ;;  %s5973_s19 = smov (!%p296_p10, %s3117_s19), 63  ;;  %v4249_v17 = vld [vmem:[%s5957_s6] ss:$0 sm:$0xff]  ;;  %v3480_v60 = vld [vmem:[%s5953_s2 + $0x10] sm:$0xff]  ;;  %vm808_vm2 = vcmask 523264  }
  0x15   : > { %482 = vmatpush.bf16.msra.mxu0 %v473_v1  ;;  %3526 = vmatpush.bf16.msra.mxu1 %v473_v1  ;;  %s3118_s21 = sshll.u32 %s295_s20, 6  ;;  %s3457_s24 = sshll.u32 (%p4196_p5), %s4091_s26, 1 }
  0x16   : > { %3527 = vmatpush.bf16.msra.mxu2 %v473_v1  ;;  %3528 = vmatpush.bf16.msra.mxu3 %v473_v1  ;;  %s299_s22 = sadd.s32 %s3118_s21, %s5973_s19  ;;  %s3458_s15 = sshll.u32 (%p4196_p5), %s4095_s27, 7 }
  0x17   : > { %s3119_s23 = sshll.u32 %s299_s22, 2  ;;  %s2880_s18 = sadd.s32 (%p4196_p5), %s3458_s15, %s3457_s24 }
  0x18   : > { %s4218_s13 = scalar_lea.vmem %s5951_s0, %s3119_s23  ;;  %s3459_s19 = sshll.u32 (%p4196_p5), %s2880_s18, 2 }
  0x19   : > { %v3462_v2 = vld [vmem:[%s4218_s13] sm:$0xff]  ;;  %v3463_v4 = vld [vmem:[%s4218_s13 + $0x8] sm:$0xff]  ;;  %v3464_v7 = vld [vmem:[%s4218_s13 + $0x10] sm:$0xff]  ;;  %861 = vmatpush.bf16.msrb.mxu1 %v3481_v50  ;;  %s5866_s21 = scalar_lea.vmem (%p4196_p5), %s5958_s7, %s3459_s19 }
  0x1a   : > { %v3466_v3 = vld [vmem:[%s4218_s13 + $0x20] sm:$0xff]  ;;  %3184 = vmatmul.msk.bf16.vlgmr.msra.gmra.mxu0 %vm422_vm1, %v3462_v2  ;;  %v3467_v5 = vld [vmem:[%s4218_s13 + $0x28] sm:$0xff]  ;;  %v3468_v8 = vld [vmem:[%s4218_s13 + $0x30] sm:$0xff] }
  0x1b   : > { %3188 = vmatmul.msk.bf16.vlgmr.msra.gmra.mxu1 %vm422_vm1, %v3466_v3  ;;  %v3470_v6 = vld [vmem:[%s4218_s13 + $0x40] sm:$0xff]  ;;  %v3471_v9 = vld [vmem:[%s4218_s13 + $0x48] sm:$0xff]  ;;  %v3465_v10 = vld [vmem:[%s4218_s13 + $0x18] sm:$0xff] }
  0x1c   : > { %3192 = vmatmul.msk.bf16.vlgmr.msra.gmra.mxu2 %vm422_vm1, %v3470_v6  ;;  %v3469_v11 = vld [vmem:[%s4218_s13 + $0x38] sm:$0xff]  ;;  %v3472_v12 = vld [vmem:[%s4218_s13 + $0x50] sm:$0xff]  ;;  %v3474_v13 = vld [vmem:[%s4218_s13 + $0x60] sm:$0xff] }
  0x1d   : > { %3196 = vmatmul.msk.bf16.vlgmr.msra.gmra.mxu3 %vm422_vm1, %v3474_v13  ;;  %v3473_v14 = vld [vmem:[%s4218_s13 + $0x58] sm:$0xff]  ;;  %862 = vmatpush.bf16.msrb.mxu1 %v3480_v60  ;;  %v3479_v3 = vld [vmem:[%s5953_s2 + $0x8] sm:$0xff] }
  0x1e   : > { %v3475_v60 = vld [vmem:[%s4218_s13 + $0x68] sm:$0xff] }
  0x21   : > { %863 = vmatpush.bf16.msrb.mxu1 %v3479_v3 }
  0x2a   : > { %3185 = vmatmul.msk.bf16.gmra.mxu0 %vm422_vm1, %v3463_v4 }
  0x2b   : > { %3189 = vmatmul.msk.bf16.gmra.mxu1 %vm422_vm1, %v3467_v5 }
  0x2c   : > { %3193 = vmatmul.msk.bf16.gmra.mxu2 %vm422_vm1, %v3471_v9 }
  0x2d   : > { %3197 = vmatmul.msk.bf16.gmra.mxu3 %vm422_vm1, %v3475_v60 }
  0x3a   : > { %3186 = vmatmul.msk.bf16.gmra.mxu0 %vm422_vm1, %v3464_v7  ;;  %v3478_v7 = vld [vmem:[%s5953_s2] sm:$0xff] }
  0x3b   : > { %3190 = vmatmul.msk.bf16.gmra.mxu1 %vm422_vm1, %v3468_v8 }
  0x3c   : > { %3194 = vmatmul.msk.bf16.gmra.mxu2 %vm422_vm1, %v3472_v12  ;;  %864 = vmatpush.bf16.msrb.mxu1 %v3478_v7 }
  0x4a   : > { %3187 = vmatmul.msk.bf16.gmra.mxu0 %vm422_vm1, %v3465_v10 }
  0x4b   : > { %3191 = vmatmul.msk.bf16.gmra.mxu1 %vm422_vm1, %v3469_v11 }
  0x4c   : > { %3195 = vmatmul.msk.bf16.gmra.mxu2 %vm422_vm1, %v3473_v14 }
  0x97   : > { %v484_v15 = vpop.f32.mrf.mxu0 }
  0x98   : > { %v504_v16 = vpop.f32.mrf.mxu1  ;;  %v4255_v19 = vadd.f32 %v4249_v17, %v484_v15 }
  0x99   : > { %v4252_v18 = vadd.f32 %v4249_v17, %v504_v16 }
  0x9a   : > { %v564_v25 = vmax.f32 %v4255_v19, 0.0 }
  0x9b   : > { %v572_v22 = vmax.f32 %v4252_v18, 0.0 }
  0x9f   : > { %v486_v20 = vpop.f32.mrf.mxu0  ;;  %v524_v44 = vpop.f32.mrf.mxu2 }
  0xa0   : > { %v506_v21 = vpop.f32.mrf.mxu1  ;;  %v4259_v23 = vadd.f32 %v4249_v17, %v486_v20  ;;  %v4304_v47 = vadd.f32 %v4249_v17, %v524_v44 }
  0xa1   : > { %v4262_v24 = vadd.f32 %v4249_v17, %v506_v21 }
  0xa2   : > { %v565_v26 = vmax.f32 %v4259_v23, 0.0  ;;  %v580_v54 = vmax.f32 %v4304_v47, 0.0 }
  0xa3   : > { %v573_v27 = vmax.f32 %v4262_v24, 0.0 }
  0xa4   : > { %v3586_v28 = vpack.i.bf16 %v565_v26, %v564_v25 }
  0xa5   : > { %v3606_v29 = vpack.i.bf16 %v573_v27, %v572_v22 }
  0xa6   : > { %3587 = vrot.lane.b32.xlu0 %v3586_v28, %s4109_s17 }
  0xa7   : > { %3607 = vrot.lane.b32.xlu2 %v3606_v29, %s4109_s17  ;;  %v489_v30 = vpop.f32.mrf.mxu0  ;;  %v526_v51 = vpop.f32.mrf.mxu2 }
  0xa8   : > { %v509_v31 = vpop.f32.mrf.mxu1  ;;  %v4278_v32 = vadd.f32 %v4249_v17, %v489_v30  ;;  %v4317_v55 = vadd.f32 %v4249_v17, %v526_v51 }
  0xa9   : > { %v4281_v33 = vadd.f32 %v4249_v17, %v509_v31 }
  0xaa   : > { %v566_v36 = vmax.f32 %v4278_v32, 0.0  ;;  %v581_v61 = vmax.f32 %v4317_v55, 0.0 }
  0xab   : > { %v574_v37 = vmax.f32 %v4281_v33, 0.0 }
  0xac   : > { %v3626_v0 = vpack.i.bf16 %v581_v61, %v580_v54 }
  0xaf   : > { %v491_v34 = vpop.f32.mrf.mxu0  ;;  %v529_v4 = vpop.f32.mrf.mxu2 }
  0xb0   : > { %v511_v35 = vpop.f32.mrf.mxu1  ;;  %v4286_v38 = vadd.f32 %v4249_v17, %v491_v34  ;;  %v4355_v8 = vadd.f32 %v4249_v17, %v529_v4 }
  0xb1   : > { %v4289_v39 = vadd.f32 %v4249_v17, %v511_v35 }
  0xb2   : > { %v567_v40 = vmax.f32 %v4286_v38, 0.0  ;;  %v582_v13 = vmax.f32 %v4355_v8, 0.0 }
  0xb3   : > { %v575_v41 = vmax.f32 %v4289_v39, 0.0 }
  0xb4   : > { %v3591_v42 = vpack.i.bf16 %v567_v40, %v566_v36 }
  0xb5   : > { %v3611_v43 = vpack.i.bf16 %v575_v41, %v574_v37 }
  0xb6   : > { %3592 = vrot.lane.b32.xlu0 %v3591_v42, %s4109_s17 }
  0xb7   : > { %3612 = vrot.lane.b32.xlu2 %v3611_v43, %s4109_s17  ;;  %v494_v45 = vpop.f32.mrf.mxu0  ;;  %v531_v10 = vpop.f32.mrf.mxu2 }
  0xb8   : > { %v514_v46 = vpop.f32.mrf.mxu1  ;;  %v4307_v48 = vadd.f32 %v4249_v17, %v494_v45  ;;  %v4362_v14 = vadd.f32 %v4249_v17, %v531_v10 }
  0xb9   : > { %v4310_v49 = vadd.f32 %v4249_v17, %v514_v46 }
  0xba   : > { %v568_v56 = vmax.f32 %v4307_v48, 0.0  ;;  %v583_v20 = vmax.f32 %v4362_v14, 0.0 }
  0xbb   : > { %v576_v57 = vmax.f32 %v4310_v49, 0.0 }
  0xbc   : > { %v3631_v30 = vpack.i.bf16 %v583_v20, %v582_v13 }
  0xbf   : > { %v496_v52 = vpop.f32.mrf.mxu0  ;;  %3627 = vrot.lane.b32.xlu2 %v3626_v0, %s4109_s17  ;;  %v534_v42 = vpop.f32.mrf.mxu2 }
  0xc0   : > { %v516_v53 = vpop.f32.mrf.mxu1  ;;  %v4322_v58 = vadd.f32 %v4249_v17, %v496_v52  ;;  %v4393_v44 = vadd.f32 %v4249_v17, %v534_v42 }
  0xc1   : > { %v4325_v59 = vadd.f32 %v4249_v17, %v516_v53  ;;  %v544_v53 = vpop.f32.mrf.mxu3 }
  0xc2   : > { %v569_v62 = vmax.f32 %v4322_v58, 0.0  ;;  %v584_v46 = vmax.f32 %v4393_v44, 0.0  ;;  %v4409_v0 = vadd.f32 %v4249_v17, %v544_v53 }
  0xc3   : > { %v577_v63 = vmax.f32 %v4325_v59, 0.0 }
  0xc4   : > { %v3596_v1 = vpack.i.bf16 %v569_v62, %v568_v56 }
  0xc5   : > { %v3616_v2 = vpack.i.bf16 %v577_v63, %v576_v57 }
  0xc6   : > { %3597 = vrot.lane.b32.xlu1 %v3596_v1, %s4109_s17 }
  0xc7   : > { %3617 = vrot.lane.b32.xlu0 %v3616_v2, %s4109_s17  ;;  %v499_v5 = vpop.f32.mrf.mxu0  ;;  %v536_v45 = vpop.f32.mrf.mxu2  ;;  %v588_v2 = vmax.f32 %v4409_v0, 0.0 }
  0xc8   : > { %v519_v6 = vpop.f32.mrf.mxu1  ;;  %v4358_v9 = vadd.f32 %v4249_v17, %v499_v5  ;;  %v4398_v50 = vadd.f32 %v4249_v17, %v536_v45 }
  0xc9   : > { %v4371_v28 = vadd.f32 %v4249_v17, %v519_v6  ;;  %v546_v1 = vpop.f32.mrf.mxu3  ;;  %v3476_v6 = vld [vmem:[%s4218_s13 + $0x70] sm:$0xff] }
  0xca   : > { %v570_v15 = vmax.f32 %v4358_v9, 0.0  ;;  %v585_v51 = vmax.f32 %v4398_v50, 0.0  ;;  %v4413_v3 = vadd.f32 %v4249_v17, %v546_v1  ;;  %3198 = vmatmul.msk.bf16.gmra.mxu3 %vm422_vm1, %v3476_v6 }
  0xcb   : > { %v578_v34 = vmax.f32 %v4371_v28, 0.0  ;;  %v4485_v28 = vld [vmem:[%s5957_s6 + $0x1] ss:$0 sm:$0xff] }
  0xcc   : > { %v3636_v52 = vpack.i.bf16 %v585_v51, %v584_v46  ;;  %v589_v4 = vmax.f32 %v4413_v3, 0.0 }
  0xce   : > { %v3651_v5 = vpack.i.bf16 %v589_v4, %v588_v2 }
  0xcf   : > { %v501_v11 = vpop.f32.mrf.mxu0  ;;  %3632 = vrot.lane.b32.xlu0 %v3631_v30, %s4109_s17 }
  0xd0   : > { %v521_v12 = vpop.f32.mrf.mxu1  ;;  %v4366_v16 = vadd.f32 %v4249_v17, %v501_v11 }
  0xd1   : > { %v4374_v29 = vadd.f32 %v4249_v17, %v521_v12 }
  0xd2   : > { %v571_v21 = vmax.f32 %v4366_v16, 0.0 }
  0xd3   : > { %v579_v35 = vmax.f32 %v4374_v29, 0.0 }
  0xd4   : > { %v3601_v31 = vpack.i.bf16 %v571_v21, %v570_v15 }
  0xd5   : > { %v3621_v43 = vpack.i.bf16 %v579_v35, %v578_v34 }
  0xd6   : > { %3602 = vrot.lane.b32.xlu1 %v3601_v31, %s4109_s17  ;;  %v539_v31 = vpop.f32.mrf.mxu2 }
  0xd7   : > { %v4430_v45 = vadd.f32 %v4249_v17, %v539_v31 }
  0xd9   : > { %v586_v53 = vmax.f32 %v4430_v45, 0.0 }
  0xde   : > { %3622 = vrot.lane.b32.xlu1 %v3621_v43, %s4109_s17  ;;  %v3477_v43 = vld [vmem:[%s4218_s13 + $0x78] sm:$0xff]  ;;  %s3116_s13 = sshll.u32 %s290_s11, 8 }
  0xdf   : > { %3199 = vmatmul.msk.bf16.gmra.mxu3 %vm422_vm1, %v3477_v43  ;;  %s5823_s14 = scalar_lea.vmem [#allocation2], %s3116_s13 }
  0xe6   : > { %3637 = vrot.lane.b32.xlu1 %v3636_v52, %s4109_s17  ;;  %v541_v52 = vpop.f32.mrf.mxu2 }
  0xe7   : > { %v4435_v23 = vadd.f32 %v4249_v17, %v541_v52 }
  0xe9   : > { %v587_v19 = vmax.f32 %v4435_v23, 0.0 }
  0xee   : > { %3652 = vrot.lane.b32.xlu1 %v3651_v5, %s4109_s17 }
 0x101   : > { %v3608_v58 = vpop.permute.xlu2 %3607 }
 0x111   : > { %v3613_v16 = vpop.permute.xlu2 %3612 }
 0x118   : > { %v3588_v7 = vpop.permute.xlu0 %3587 }
 0x119   : > { %v3590_v10 = vunpack.i.h.bf16 %v3588_v7  ;;  %v3589_v11 = vunpack.i.l.bf16 %v3588_v7  ;;  %v3628_v59 = vpop.permute.xlu2 %3627 }
 0x11a   : > { %v3629_v49 = vunpack.i.l.bf16 %v3628_v59 }
 0x11b   : > { %v725_v12 = vmax.f32 %v565_v26, %v3590_v10  ;;  %v724_v30 = vmax.f32 %v564_v25, %v3589_v11  ;;  %v3641_v26 = vpack.i.bf16 %v587_v19, %v586_v53 }
 0x11d   : > { %v756_v42 = vpack.c.bf16 %v725_v12, %v724_v30  ;;  %3642 = vrot.lane.b32.xlu2 %v3641_v26, %s4109_s17 }
 0x11f   : > { %3216 = vmatmul.msk.bf16.vlgmr.msrb.gmra.mxu1 %vm808_vm2, %v756_v42 }
 0x128   : > { %v3593_v25 = vpop.permute.xlu0 %3592 }
 0x129   : > { %v3595_v60 = vunpack.i.h.bf16 %v3593_v25  ;;  %v3594_v1 = vunpack.i.l.bf16 %v3593_v25  ;;  %v3609_v25 = vunpack.i.l.bf16 %v3608_v58 }
 0x12b   : > { %v727_v5 = vmax.f32 %v567_v40, %v3595_v60  ;;  %v726_v6 = vmax.f32 %v566_v36, %v3594_v1  ;;  %v3614_v60 = vunpack.i.l.bf16 %v3613_v16 }
 0x12d   : > { %v757_v7 = vpack.c.bf16 %v727_v5, %v726_v6 }
 0x12f   : > { %3217 = vmatmul.msk.bf16.gmra.mxu1 %vm808_vm2, %v757_v7 }
 0x138   : > { %v3598_v10 = vpop.permute.xlu1 %3597 }
 0x139   : > { %v3600_v11 = vunpack.i.h.bf16 %v3598_v10  ;;  %v3599_v12 = vunpack.i.l.bf16 %v3598_v10  ;;  %v3618_v24 = vpop.permute.xlu0 %3617 }
 0x13a   : > { %v3619_v5 = vunpack.i.l.bf16 %v3618_v24 }
 0x13b   : > { %v729_v30 = vmax.f32 %v569_v62, %v3600_v11  ;;  %v728_v31 = vmax.f32 %v568_v56, %v3599_v12  ;;  %v3610_v62 = vunpack.i.h.bf16 %v3608_v58  ;;  %v732_v56 = vmax.f32 %v572_v22, %v3609_v25 }
 0x13c   : > { %v736_v22 = vmax.f32 %v576_v57, %v3619_v5  ;;  %v3630_v11 = vunpack.i.h.bf16 %v3628_v59  ;;  %v740_v12 = vmax.f32 %v580_v54, %v3629_v49 }
 0x13d   : > { %v758_v42 = vpack.c.bf16 %v729_v30, %v728_v31  ;;  %v733_v48 = vmax.f32 %v573_v27, %v3610_v62  ;;  %v3620_v27 = vunpack.i.h.bf16 %v3618_v24 }
 0x13e   : > { %v741_v57 = vmax.f32 %v581_v61, %v3630_v11 }
 0x13f   : > { %3218 = vmatmul.msk.bf16.gmra.mxu1 %vm808_vm2, %v758_v42  ;;  %v760_v26 = vpack.c.bf16 %v733_v48, %v732_v56  ;;  %v737_v18 = vmax.f32 %v577_v63, %v3620_v27  ;;  %v549_v63 = vpop.f32.mrf.mxu3 }
 0x140   : > { %v764_v31 = vpack.c.bf16 %v741_v57, %v740_v12  ;;  %v3485_v12 = vld [vmem:[%s5954_s3 + $0x18] sm:$0xff] }
 0x141   : > { %v762_v6 = vpack.c.bf16 %v737_v18, %v736_v22  ;;  %1242 = vmatpush.bf16.msrb.mxu2 %v3485_v12 }
 0x147   : > { %v551_v29 = vpop.f32.mrf.mxu3 }
 0x148   : > { %v3603_v38 = vpop.permute.xlu1 %3602 }
 0x149   : > { %v3605_v40 = vunpack.i.h.bf16 %v3603_v38  ;;  %v3604_v43 = vunpack.i.l.bf16 %v3603_v38 }
 0x14b   : > { %v731_v32 = vmax.f32 %v571_v21, %v3605_v40  ;;  %v730_v36 = vmax.f32 %v570_v15, %v3604_v43  ;;  %v3615_v21 = vunpack.i.h.bf16 %v3613_v16  ;;  %v734_v15 = vmax.f32 %v574_v37, %v3614_v60 }
 0x14d   : > { %v759_v52 = vpack.c.bf16 %v731_v32, %v730_v36  ;;  %v735_v9 = vmax.f32 %v575_v41, %v3615_v21  ;;  %v4501_v36 = vadd.f32 %v4249_v17, %v549_v63 }
 0x14f   : > { %3219 = vmatmul.msk.bf16.gmra.mxu1 %vm808_vm2, %v759_v52  ;;  %v761_v1 = vpack.c.bf16 %v735_v9, %v734_v15  ;;  %v554_v54 = vpop.f32.mrf.mxu3  ;;  %v4504_v52 = vadd.f32 %v4249_v17, %v551_v29  ;;  %v590_v14 = vmax.f32 %v4501_v36, 0.0 }
 0x150   : > { %v3623_v39 = vpop.permute.xlu1 %3622  ;;  %v4527_v15 = vadd.f32 %v4249_v17, %v554_v54 }
 0x151   : > { %v3625_v41 = vunpack.i.h.bf16 %v3623_v39  ;;  %v3624_v7 = vunpack.i.l.bf16 %v3623_v39  ;;  %v591_v8 = vmax.f32 %v4504_v52, 0.0 }
 0x153   : > { %v739_v33 = vmax.f32 %v579_v35, %v3625_v41  ;;  %v738_v37 = vmax.f32 %v578_v34, %v3624_v7  ;;  %v3633_v34 = vpop.permute.xlu0 %3632 }
 0x154   : > { %v3635_v42 = vunpack.i.h.bf16 %v3633_v34  ;;  %v3634_v61 = vunpack.i.l.bf16 %v3633_v34 }
 0x155   : > { %v763_v10 = vpack.c.bf16 %v739_v33, %v738_v37 }
 0x156   : > { %v743_v43 = vmax.f32 %v583_v20, %v3635_v42  ;;  %v742_v32 = vmax.f32 %v582_v13, %v3634_v61  ;;  %v3661_v20 = vpack.i.bf16 %v591_v8, %v590_v14 }
 0x157   : > { %v556_v13 = vpop.f32.mrf.mxu3 }
 0x158   : > { %v765_v25 = vpack.c.bf16 %v743_v43, %v742_v32  ;;  %v3638_v48 = vpop.permute.xlu1 %3637  ;;  %v4531_v24 = vadd.f32 %v4249_v17, %v556_v13 }
 0x159   : > { %v3640_v16 = vunpack.i.h.bf16 %v3638_v48  ;;  %v3639_v21 = vunpack.i.l.bf16 %v3638_v48 }
 0x15a   : > { %v593_v39 = vmax.f32 %v4531_v24, 0.0 }
 0x15b   : > { %v745_v27 = vmax.f32 %v585_v51, %v3640_v16  ;;  %v744_v5 = vmax.f32 %v584_v46, %v3639_v21  ;;  %v3483_v21 = vld [vmem:[%s5954_s3 + $0x8] sm:$0xff] }
 0x15d   : > { %v766_v7 = vpack.c.bf16 %v745_v27, %v744_v5 }
 0x15f   : > { %3220 = vmatmul.msk.bf16.gmra.mxu1 %vm808_vm2, %v760_v26 }
 0x162   : > { %v559_v22 = vpop.f32.mrf.mxu3 }
 0x163   : > { %v4558_v11 = vadd.f32 %v4249_v17, %v559_v22 }
 0x165   : > { %v594_v34 = vmax.f32 %v4558_v11, 0.0 }
 0x16a   : > { %v561_v33 = vpop.f32.mrf.mxu3 }
 0x16b   : > { %v4562_v57 = vadd.f32 %v4249_v17, %v561_v33 }
 0x16d   : > { %v595_v17 = vmax.f32 %v4562_v57, 0.0 }
 0x16f   : > { %3221 = vmatmul.msk.bf16.gmra.mxu1 %vm808_vm2, %v761_v1  ;;  %v3681_v45 = vpack.i.bf16 %v595_v17, %v594_v34 }
 0x177   : > { %v3643_v46 = vpop.permute.xlu2 %3642 }
 0x178   : > { %v3645_v37 = vunpack.i.h.bf16 %v3643_v46 }
 0x17f   : > { %3222 = vmatmul.msk.bf16.gmra.mxu1 %vm808_vm2, %v762_v6  ;;  %v592_v6 = vmax.f32 %v4527_v15, 0.0 }
 0x181   : > { %v3671_v44 = vpack.i.bf16 %v593_v39, %v592_v6 }
 0x18f   : > { %3223 = vmatmul.msk.bf16.gmra.mxu1 %vm808_vm2, %v763_v10  ;;  %v3644_v10 = vunpack.i.l.bf16 %v3643_v46  ;;  %v3482_v46 = vld [vmem:[%s5954_s3] sm:$0xff] }
 0x19c   : > { %v866_v30 = vpop.f32.mrf.mxu1 }
 0x19d   : > { %v4489_v35 = vadd.f32 %v4485_v28, %v866_v30  ;;  %v747_v30 = vmax.f32 %v587_v19, %v3645_v37 }
 0x19f   : > { %3224 = vmatmul.msk.bf16.gmra.mxu1 %vm808_vm2, %v764_v31  ;;  %v946_v38 = vmax.f32 %v4489_v35, 0.0  ;;  %v746_v31 = vmax.f32 %v586_v53, %v3644_v10  ;;  %v3653_v53 = vpop.permute.xlu1 %3652 }
 0x1a0   : > { %v3655_v61 = vunpack.i.h.bf16 %v3653_v53  ;;  %v3654_v54 = vunpack.i.l.bf16 %v3653_v53 }
 0x1a2   : > { %v748_v13 = vmax.f32 %v588_v2, %v3654_v54 }
 0x1a4   : > { %v868_v55 = vpop.f32.mrf.mxu1 }
 0x1a5   : > { %v4492_v47 = vadd.f32 %v4485_v28, %v868_v55  ;;  %v767_v55 = vpack.c.bf16 %v747_v30, %v746_v31 }
 0x1a7   : > { %v947_v40 = vmax.f32 %v4492_v47, 0.0 }
 0x1a9   : > { %v3646_v58 = vpack.i.bf16 %v947_v40, %v946_v38 }
 0x1ab   : > { %3647 = vrot.lane.b32.xlu0 %v3646_v58, %s4109_s17 }
 0x1ac   : > { %v871_v62 = vpop.f32.mrf.mxu1 }
 0x1ad   : > { %v4519_v56 = vadd.f32 %v4485_v28, %v871_v62  ;;  %v3484_v62 = vld [vmem:[%s5954_s3 + $0x10] sm:$0xff] }
 0x1ae   : > { %1243 = vmatpush.bf16.msrb.mxu2 %v3484_v62 }
 0x1af   : > { %3225 = vmatmul.msk.bf16.gmra.mxu1 %vm808_vm2, %v765_v25  ;;  %v948_v9 = vmax.f32 %v4519_v56, 0.0  ;;  %v749_v25 = vmax.f32 %v589_v4, %v3655_v61 }
 0x1b2   : > { %1244 = vmatpush.bf16.msrb.mxu2 %v3483_v21 }
 0x1b3   : > { %3662 = vrot.lane.b32.xlu0 %v3661_v20, %s4109_s17 }
 0x1b4   : > { %v873_v26 = vpop.f32.mrf.mxu1 }
 0x1b5   : > { %v4523_v60 = vadd.f32 %v4485_v28, %v873_v26  ;;  %v768_v26 = vpack.c.bf16 %v749_v25, %v748_v13 }
 0x1b6   : > { %1245 = vmatpush.bf16.msrb.mxu2 %v3482_v46 }
 0x1b7   : > { %v949_v1 = vmax.f32 %v4523_v60, 0.0 }
 0x1b9   : > { %v3656_v18 = vpack.i.bf16 %v949_v1, %v948_v9 }
 0x1bb   : > { %3657 = vrot.lane.b32.xlu2 %v3656_v18, %s4109_s17 }
 0x1bc   : > { %v876_v41 = vpop.f32.mrf.mxu1 }
 0x1bd   : > { %v4550_v50 = vadd.f32 %v4485_v28, %v876_v41 }
 0x1bf   : > { %3226 = vmatmul.msk.bf16.gmra.mxu1 %vm808_vm2, %v766_v7  ;;  %v950_v63 = vmax.f32 %v4550_v50, 0.0 }
 0x1c3   : > { %3672 = vrot.lane.b32.xlu2 %v3671_v44, %s4109_s17 }
 0x1c4   : > { %v878_v51 = vpop.f32.mrf.mxu1 }
 0x1c5   : > { %v4554_v59 = vadd.f32 %v4485_v28, %v878_v51 }
 0x1c7   : > { %v951_v49 = vmax.f32 %v4554_v59, 0.0 }
 0x1c9   : > { %v3666_v29 = vpack.i.bf16 %v951_v49, %v950_v63 }
 0x1cb   : > { %3667 = vrot.lane.b32.xlu1 %v3666_v29, %s4109_s17 }
 0x1cc   : > { %v881_v42 = vpop.f32.mrf.mxu1 }
 0x1cd   : > { %v4584_v23 = vadd.f32 %v4485_v28, %v881_v42 }
 0x1cf   : > { %3227 = vmatmul.msk.bf16.gmra.mxu1 %vm808_vm2, %v767_v55  ;;  %v952_v32 = vmax.f32 %v4584_v23, 0.0 }
 0x1d3   : > { %3682 = vrot.lane.b32.xlu1 %v3681_v45, %s4109_s17 }
 0x1d4   : > { %v883_v19 = vpop.f32.mrf.mxu1 }
 0x1d5   : > { %v4588_v43 = vadd.f32 %v4485_v28, %v883_v19 }
 0x1d7   : > { %v953_v58 = vmax.f32 %v4588_v43, 0.0 }
 0x1d9   : > { %v3676_v20 = vpack.i.bf16 %v953_v58, %v952_v32 }
 0x1db   : > { %3677 = vrot.lane.b32.xlu0 %v3676_v20, %s4109_s17 }
 0x1dc   : > { %v886_v48 = vpop.f32.mrf.mxu1 }
 0x1dd   : > { %v4606_v16 = vadd.f32 %v4485_v28, %v886_v48 }
 0x1df   : > { %3228 = vmatmul.msk.bf16.gmra.mxu1 %vm808_vm2, %v768_v26  ;;  %v954_v0 = vmax.f32 %v4606_v16, 0.0 }
 0x1e4   : > { %v888_v3 = vpop.f32.mrf.mxu1 }
 0x1e5   : > { %v4609_v4 = vadd.f32 %v4485_v28, %v888_v3 }
 0x1e7   : > { %v955_v2 = vmax.f32 %v4609_v4, 0.0 }
 0x1e9   : > { %v3686_v27 = vpack.i.bf16 %v955_v2, %v954_v0 }
 0x1eb   : > { %3687 = vrot.lane.b32.xlu2 %v3686_v27, %s4109_s17 }
 0x1ec   : > { %v891_v5 = vpop.f32.mrf.mxu1 }
 0x1ed   : > { %v4622_v18 = vadd.f32 %v4485_v28, %v891_v5 }
 0x1ef   : > { %v956_v7 = vmax.f32 %v4622_v18, 0.0 }
 0x1f4   : > { %v893_v22 = vpop.f32.mrf.mxu1 }
 0x1f5   : > { %v4625_v41 = vadd.f32 %v4485_v28, %v893_v22 }
 0x1f7   : > { %v957_v44 = vmax.f32 %v4625_v41, 0.0 }
 0x1f9   : > { %v3691_v51 = vpack.i.bf16 %v957_v44, %v956_v7 }
 0x1fb   : > { %3692 = vrot.lane.b32.xlu0 %v3691_v51, %s4109_s17 }
 0x1fc   : > { %v896_v33 = vpop.f32.mrf.mxu1 }
 0x1fd   : > { %v4638_v37 = vadd.f32 %v4485_v28, %v896_v33 }
 0x1ff   : > { %v958_v30 = vmax.f32 %v4638_v37, 0.0 }
 0x204   : > { %v898_v10 = vpop.f32.mrf.mxu1 }
 0x205   : > { %v4641_v12 = vadd.f32 %v4485_v28, %v898_v10 }
 0x207   : > { %v959_v31 = vmax.f32 %v4641_v12, 0.0 }
 0x209   : > { %v3696_v29 = vpack.i.bf16 %v959_v31, %v958_v30 }
 0x20b   : > { %3697 = vrot.lane.b32.xlu1 %v3696_v29, %s4109_s17 }
 0x20c   : > { %v901_v42 = vpop.f32.mrf.mxu1 }
 0x20d   : > { %v4651_v55 = vadd.f32 %v4485_v28, %v901_v42 }
 0x20f   : > { %v960_v19 = vmax.f32 %v4651_v55, 0.0  ;;  %v4791_v55 = vld [vmem:[%s5957_s6 + $0x2] ss:$0 sm:$0xff] }
 0x214   : > { %v903_v45 = vpop.f32.mrf.mxu1 }
 0x215   : > { %v4654_v53 = vadd.f32 %v4485_v28, %v903_v45  ;;  %v3658_v5 = vpop.permute.xlu2 %3657 }
 0x216   : > { %v3660_v29 = vunpack.i.h.bf16 %v3658_v5  ;;  %v3659_v42 = vunpack.i.l.bf16 %v3658_v5 }
 0x217   : > { %v961_v61 = vmax.f32 %v4654_v53, 0.0 }
 0x218   : > { %v1109_v52 = vmax.f32 %v949_v1, %v3660_v29  ;;  %v1108_v36 = vmax.f32 %v948_v9, %v3659_v42 }
 0x219   : > { %v3701_v54 = vpack.i.bf16 %v961_v61, %v960_v19 }
 0x21b   : > { %3702 = vrot.lane.b32.xlu2 %v3701_v54, %s4109_s17 }
 0x21c   : > { %v906_v62 = vpop.f32.mrf.mxu1 }
 0x21d   : > { %v3648_v25 = vpop.permute.xlu0 %3647  ;;  %v4668_v21 = vadd.f32 %v4485_v28, %v906_v62 }
 0x21e   : > { %v3650_v13 = vunpack.i.h.bf16 %v3648_v25  ;;  %v3649_v20 = vunpack.i.l.bf16 %v3648_v25  ;;  %v1139_v25 = vpack.c.bf16 %v1109_v52, %v1108_v36 }
 0x21f   : > { %v962_v47 = vmax.f32 %v4668_v21, 0.0 }
 0x220   : > { %v1107_v48 = vmax.f32 %v947_v40, %v3650_v13  ;;  %v1106_v26 = vmax.f32 %v946_v38, %v3649_v20 }
 0x222   : > { %v1138_v3 = vpack.c.bf16 %v1107_v48, %v1106_v26 }
 0x224   : > { %v908_v27 = vpop.f32.mrf.mxu1  ;;  %3248 = vmatmul.msk.bf16.vlgmr.msrb.gmra.mxu2 %vm808_vm2, %v1138_v3 }
 0x225   : > { %v4672_v22 = vadd.f32 %v4485_v28, %v908_v27  ;;  %v3663_v46 = vpop.permute.xlu0 %3662 }
 0x226   : > { %v3665_v51 = vunpack.i.h.bf16 %v3663_v46  ;;  %v3664_v33 = vunpack.i.l.bf16 %v3663_v46 }
 0x227   : > { %v963_v40 = vmax.f32 %v4672_v22, 0.0 }
 0x228   : > { %v751_v35 = vmax.f32 %v591_v8, %v3665_v51  ;;  %v750_v38 = vmax.f32 %v590_v14, %v3664_v33  ;;  %v3673_v14 = vpop.permute.xlu2 %3672 }
 0x229   : > { %v3706_v10 = vpack.i.bf16 %v963_v40, %v962_v47  ;;  %v3675_v8 = vunpack.i.h.bf16 %v3673_v14  ;;  %v3674_v62 = vunpack.i.l.bf16 %v3673_v14 }
 0x22a   : > { %v769_v45 = vpack.c.bf16 %v751_v35, %v750_v38 }
 0x22b   : > { %3707 = vrot.lane.b32.xlu0 %v3706_v10, %s4109_s17  ;;  %v753_v60 = vmax.f32 %v593_v39, %v3675_v8  ;;  %v752_v56 = vmax.f32 %v592_v6, %v3674_v62 }
 0x22c   : > { %v911_v54 = vpop.f32.mrf.mxu1  ;;  %3229 = vmatmul.msk.bf16.gmra.mxu1 %vm808_vm2, %v769_v45 }
 0x22d   : > { %v4691_v13 = vadd.f32 %v4485_v28, %v911_v54  ;;  %v770_v3 = vpack.c.bf16 %v753_v60, %v752_v56 }
 0x22f   : > { %v964_v9 = vmax.f32 %v4691_v13, 0.0 }
 0x234   : > { %v913_v20 = vpop.f32.mrf.mxu1  ;;  %3249 = vmatmul.msk.bf16.gmra.mxu2 %vm808_vm2, %v1139_v25 }
 0x235   : > { %v4695_v48 = vadd.f32 %v4485_v28, %v913_v20 }
 0x237   : > { %v965_v1 = vmax.f32 %v4695_v48, 0.0 }
 0x239   : > { %v3711_v26 = vpack.i.bf16 %v965_v1, %v964_v9 }
 0x23b   : > { %3712 = vrot.lane.b32.xlu1 %v3711_v26, %s4109_s17 }
 0x23c   : > { %v916_v27 = vpop.f32.mrf.mxu1  ;;  %3230 = vmatmul.msk.bf16.gmra.mxu1 %vm808_vm2, %v770_v3 }
 0x23d   : > { %v3668_v24 = vpop.permute.xlu1 %3667  ;;  %v4714_v51 = vadd.f32 %v4485_v28, %v916_v27 }
 0x23e   : > { %v3670_v39 = vunpack.i.h.bf16 %v3668_v24  ;;  %v3669_v5 = vunpack.i.l.bf16 %v3668_v24 }
 0x23f   : > { %v966_v42 = vmax.f32 %v4714_v51, 0.0 }
 0x240   : > { %v1111_v15 = vmax.f32 %v951_v49, %v3670_v39  ;;  %v1110_v6 = vmax.f32 %v950_v63, %v3669_v5 }
 0x242   : > { %v1140_v46 = vpack.c.bf16 %v1111_v15, %v1110_v6 }
 0x244   : > { %v918_v33 = vpop.f32.mrf.mxu1  ;;  %3250 = vmatmul.msk.bf16.gmra.mxu2 %vm808_vm2, %v1140_v46 }
 0x245   : > { %v4718_v35 = vadd.f32 %v4485_v28, %v918_v33  ;;  %v3683_v38 = vpop.permute.xlu1 %3682  ;;  %v3688_v25 = vpop.permute.xlu2 %3687 }
 0x246   : > { %v3685_v10 = vunpack.i.h.bf16 %v3683_v38  ;;  %v3684_v29 = vunpack.i.l.bf16 %v3683_v38  ;;  %v3690_v43 = vunpack.i.h.bf16 %v3688_v25 }
 0x247   : > { %v967_v59 = vmax.f32 %v4718_v35, 0.0 }
 0x248   : > { %v755_v50 = vmax.f32 %v595_v17, %v3685_v10  ;;  %v754_v63 = vmax.f32 %v594_v34, %v3684_v29  ;;  %v1115_v56 = vmax.f32 %v955_v2, %v3690_v43 }
 0x249   : > { %v3716_v49 = vpack.i.bf16 %v967_v59, %v966_v42 }
 0x24a   : > { %v771_v45 = vpack.c.bf16 %v755_v50, %v754_v63 }
 0x24b   : > { %3717 = vrot.lane.b32.xlu2 %v3716_v49, %s4109_s17 }
 0x24c   : > { %v921_v54 = vpop.f32.mrf.mxu1  ;;  %3231 = vmatmul.msk.bf16.gmra.mxu1 %vm808_vm2, %v771_v45 }
 0x24d   : > { %v3678_v52 = vpop.permute.xlu0 %3677  ;;  %v4737_v17 = vadd.f32 %v4485_v28, %v921_v54 }
 0x24e   : > { %v3680_v36 = vunpack.i.h.bf16 %v3678_v52  ;;  %v3679_v14 = vunpack.i.l.bf16 %v3678_v52 }
 0x24f   : > { %v968_v20 = vmax.f32 %v4737_v17, 0.0 }
 0x250   : > { %v1113_v57 = vmax.f32 %v953_v58, %v3680_v36  ;;  %v1112_v11 = vmax.f32 %v952_v32, %v3679_v14  ;;  %v3689_v32 = vunpack.i.l.bf16 %v3688_v25 }
 0x252   : > { %v1141_v34 = vpack.c.bf16 %v1113_v57, %v1112_v11  ;;  %v1114_v26 = vmax.f32 %v954_v0, %v3689_v32 }
 0x254   : > { %v923_v8 = vpop.f32.mrf.mxu1  ;;  %3251 = vmatmul.msk.bf16.gmra.mxu2 %vm808_vm2, %v1141_v34  ;;  %v1142_v3 = vpack.c.bf16 %v1115_v56, %v1114_v26 }
 0x255   : > { %v4741_v62 = vadd.f32 %v4485_v28, %v923_v8 }
 0x257   : > { %v969_v60 = vmax.f32 %v4741_v62, 0.0 }
 0x259   : > { %v3721_v23 = vpack.i.bf16 %v969_v60, %v968_v20 }
 0x25b   : > { %3722 = vrot.lane.b32.xlu0 %v3721_v23, %s4109_s17 }
 0x25c   : > { %v926_v58 = vpop.f32.mrf.mxu1 }
 0x25d   : > { %v4755_v27 = vadd.f32 %v4485_v28, %v926_v58 }
 0x25f   : > { %v970_v5 = vmax.f32 %v4755_v27, 0.0 }
 0x264   : > { %v928_v24 = vpop.f32.mrf.mxu1  ;;  %3252 = vmatmul.msk.bf16.gmra.mxu2 %vm808_vm2, %v1142_v3 }
 0x265   : > { %v4759_v39 = vadd.f32 %v4485_v28, %v928_v24 }
 0x267   : > { %v971_v15 = vmax.f32 %v4759_v39, 0.0 }
 0x269   : > { %v3731_v16 = vpack.i.bf16 %v971_v15, %v970_v5 }
 0x26b   : > { %3732 = vrot.lane.b32.xlu2 %v3731_v16, %s4109_s17 }
 0x26d   : > { %v3693_v4 = vpop.permute.xlu0 %3692 }
 0x26e   : > { %v3695_v0 = vunpack.i.h.bf16 %v3693_v4  ;;  %v3694_v2 = vunpack.i.l.bf16 %v3693_v4 }
 0x270   : > { %v1117_v6 = vmax.f32 %v957_v44, %v3695_v0  ;;  %v1116_v46 = vmax.f32 %v956_v7, %v3694_v2 }
 0x272   : > { %v1143_v33 = vpack.c.bf16 %v1117_v6, %v1116_v46 }
 0x274   : > { %3253 = vmatmul.msk.bf16.gmra.mxu2 %vm808_vm2, %v1143_v33 }
 0x275   : > { %v3703_v41 = vpop.permute.xlu2 %3702 }
 0x276   : > { %v3705_v44 = vunpack.i.h.bf16 %v3703_v41  ;;  %v3704_v45 = vunpack.i.l.bf16 %v3703_v41 }
 0x278   : > { %v1121_v18 = vmax.f32 %v961_v61, %v3705_v44  ;;  %v1120_v7 = vmax.f32 %v960_v19, %v3704_v45 }
 0x27a   : > { %v1145_v54 = vpack.c.bf16 %v1121_v18, %v1120_v7 }
 0x27d   : > { %v3698_v38 = vpop.permute.xlu1 %3697 }
 0x27e   : > { %v3700_v10 = vunpack.i.h.bf16 %v3698_v38  ;;  %v3699_v29 = vunpack.i.l.bf16 %v3698_v38 }
 0x280   : > { %v1119_v50 = vmax.f32 %v959_v31, %v3700_v10  ;;  %v1118_v63 = vmax.f32 %v958_v30, %v3699_v29 }
 0x282   : > { %v1144_v49 = vpack.c.bf16 %v1119_v50, %v1118_v63 }
 0x284   : > { %3254 = vmatmul.msk.bf16.gmra.mxu2 %vm808_vm2, %v1144_v49 }
 0x294   : > { %3255 = vmatmul.msk.bf16.gmra.mxu2 %vm808_vm2, %v1145_v54 }
 0x29d   : > { %v3708_v12 = vpop.permute.xlu0 %3707 }
 0x29e   : > { %v3710_v31 = vunpack.i.h.bf16 %v3708_v12  ;;  %v3709_v52 = vunpack.i.l.bf16 %v3708_v12 }
 0x2a0   : > { %v1123_v37 = vmax.f32 %v963_v40, %v3710_v31  ;;  %v1122_v30 = vmax.f32 %v962_v47, %v3709_v52 }
 0x2a2   : > { %v1146_v36 = vpack.c.bf16 %v1123_v37, %v1122_v30 }
 0x2a4   : > { %3256 = vmatmul.msk.bf16.gmra.mxu2 %vm808_vm2, %v1146_v36 }
 0x2a7   : > { %v1247_v53 = vpop.f32.mrf.mxu2 }
 0x2a8   : > { %v4794_v14 = vadd.f32 %v4791_v55, %v1247_v53 }
 0x2a9   : > { %v931_v61 = vpop.f32.mrf.mxu1 }
 0x2aa   : > { %v1327_v8 = vmax.f32 %v4794_v14, 0.0  ;;  %v4814_v48 = vadd.f32 %v4485_v28, %v931_v61 }
 0x2ac   : > { %v972_v3 = vmax.f32 %v4814_v48, 0.0 }
 0x2ad   : > { %v3713_v19 = vpop.permute.xlu1 %3712 }
 0x2ae   : > { %v3715_v57 = vunpack.i.h.bf16 %v3713_v19  ;;  %v3714_v22 = vunpack.i.l.bf16 %v3713_v19 }
 0x2af   : > { %v1249_v40 = vpop.f32.mrf.mxu2 }
 0x2b0   : > { %v1125_v21 = vmax.f32 %v965_v1, %v3715_v57  ;;  %v1124_v47 = vmax.f32 %v964_v9, %v3714_v22  ;;  %v4801_v11 = vadd.f32 %v4791_v55, %v1249_v40  ;;  %v3718_v9 = vpop.permute.xlu2 %3717 }
 0x2b1   : > { %v933_v34 = vpop.f32.mrf.mxu1  ;;  %v3720_v56 = vunpack.i.h.bf16 %v3718_v9  ;;  %v3719_v26 = vunpack.i.l.bf16 %v3718_v9 }
 0x2b2   : > { %v1147_v25 = vpack.c.bf16 %v1125_v21, %v1124_v47  ;;  %v1328_v23 = vmax.f32 %v4801_v11, 0.0  ;;  %v4806_v43 = vadd.f32 %v4485_v28, %v933_v34 }
 0x2b3   : > { %v1127_v16 = vmax.f32 %v967_v59, %v3720_v56  ;;  %v1126_v4 = vmax.f32 %v966_v42, %v3719_v26 }
 0x2b4   : > { %3257 = vmatmul.msk.bf16.gmra.mxu2 %vm808_vm2, %v1147_v25  ;;  %v3726_v13 = vpack.i.bf16 %v1328_v23, %v1327_v8  ;;  %v973_v32 = vmax.f32 %v4806_v43, 0.0 }
 0x2b5   : > { %v1148_v33 = vpack.c.bf16 %v1127_v16, %v1126_v4  ;;  %v3290_v4 = vld [vmem:[%s5955_s4 + $0x30] sm:$0xf] }
 0x2b6   : > { %3727 = vrot.lane.b32.xlu1 %v3726_v13, %s4109_s17  ;;  %v3741_v24 = vpack.i.bf16 %v973_v32, %v972_v3 }
 0x2b7   : > { %v1252_v1 = vpop.f32.mrf.mxu2 }
 0x2b8   : > { %v4828_v0 = vadd.f32 %v4791_v55, %v1252_v1 }
 0x2b9   : > { %v936_v58 = vpop.f32.mrf.mxu1 }
 0x2ba   : > { %v1329_v38 = vmax.f32 %v4828_v0, 0.0  ;;  %v4845_v42 = vadd.f32 %v4485_v28, %v936_v58 }
 0x2bc   : > { %v974_v63 = vmax.f32 %v4845_v42, 0.0 }
 0x2be   : > { %3742 = vrot.lane.b32.xlu1 %v3741_v24, %s4109_s17 }
 0x2bf   : > { %v1254_v2 = vpop.f32.mrf.mxu2 }
 0x2c0   : > { %v4832_v6 = vadd.f32 %v4791_v55, %v1254_v2  ;;  %v3493_v2 = vld [vmem:[%s5955_s4 + $0x34] sm:$0xf0] }
 0x2c1   : > { %v938_v46 = vpop.f32.mrf.mxu1 }
 0x2c2   : > { %v1330_v10 = vmax.f32 %v4832_v6, 0.0  ;;  %v4837_v35 = vadd.f32 %v4485_v28, %v938_v46  ;;  %v3492_v46 = vld [vmem:[%s5955_s4 + $0x34] sm:$0xf] }
 0x2c4   : > { %3258 = vmatmul.msk.bf16.gmra.mxu2 %vm808_vm2, %v1148_v33  ;;  %v3736_v51 = vpack.i.bf16 %v1330_v10, %v1329_v38  ;;  %v975_v29 = vmax.f32 %v4837_v35, 0.0 }
 0x2c6   : > { %3737 = vrot.lane.b32.xlu0 %v3736_v51, %s4109_s17  ;;  %v3751_v49 = vpack.i.bf16 %v975_v29, %v974_v63  ;;  %v3291_v51 = vor.u32 %v3493_v2, %v3290_v4 }
 0x2c7   : > { %v1257_v59 = vpop.f32.mrf.mxu2 }
 0x2c8   : > { %v4855_v44 = vadd.f32 %v4791_v55, %v1257_v59  ;;  %v3292_v59 = vld [vmem:[%s5955_s4 + $0x38] sm:$0xf0]  ;;  %1641 = vmatpush.bf16.msrb.mxu3 %v3291_v51 }
 0x2c9   : > { %v941_v50 = vpop.f32.mrf.mxu1 }
 0x2ca   : > { %v1331_v37 = vmax.f32 %v4855_v44, 0.0  ;;  %v4876_v62 = vadd.f32 %v4485_v28, %v941_v50 }
 0x2cc   : > { %v976_v22 = vmax.f32 %v4876_v62, 0.0 }
 0x2cd   : > { %v3723_v41 = vpop.permute.xlu0 %3722 }
 0x2ce   : > { %v3725_v45 = vunpack.i.h.bf16 %v3723_v41  ;;  %v3724_v18 = vunpack.i.l.bf16 %v3723_v41  ;;  %3752 = vrot.lane.b32.xlu0 %v3751_v49, %s4109_s17  ;;  %v3295_v49 = vor.u32 %v3492_v46, %v3292_v59 }
 0x2cf   : > { %v1259_v7 = vpop.f32.mrf.mxu2 }
 0x2d0   : > { %v1129_v54 = vmax.f32 %v969_v60, %v3725_v45  ;;  %v1128_v12 = vmax.f32 %v968_v20, %v3724_v18  ;;  %v4863_v31 = vadd.f32 %v4791_v55, %v1259_v7  ;;  %v3733_v20 = vpop.permute.xlu2 %3732  ;;  %1730 = vmatpush.bf16.msrb.mxu0 %v3295_v49  ;;  %v3282_v45 = vld [vmem:[%s5955_s4 + $0x20] sm:$0xf]  ;;  %v3491_v18 = vld [vmem:[%s5955_s4 + $0x24] sm:$0xf0]  ;;  %v3490_v7 = vld [vmem:[%s5955_s4 + $0x24] sm:$0xf] }
 0x2d1   : > { %v943_v52 = vpop.f32.mrf.mxu1  ;;  %v3735_v19 = vunpack.i.h.bf16 %v3733_v20  ;;  %v3734_v57 = vunpack.i.l.bf16 %v3733_v20 }
 0x2d2   : > { %v1149_v30 = vpack.c.bf16 %v1129_v54, %v1128_v12  ;;  %v1332_v36 = vmax.f32 %v4863_v31, 0.0  ;;  %v4868_v53 = vadd.f32 %v4485_v28, %v943_v52  ;;  %v3283_v52 = vor.u32 %v3491_v18, %v3282_v45 }
 0x2d3   : > { %v1131_v21 = vmax.f32 %v971_v15, %v3735_v19  ;;  %v1130_v28 = vmax.f32 %v970_v5, %v3734_v57  ;;  %v3489_v19 = vld [vmem:[%s5955_s4 + $0x14] sm:$0xf0]  ;;  %v3488_v57 = vld [vmem:[%s5955_s4 + $0x14] sm:$0xf] }
 0x2d4   : > { %3259 = vmatmul.msk.bf16.gmra.mxu2 %vm808_vm2, %v1149_v30  ;;  %v3746_v17 = vpack.i.bf16 %v1332_v36, %v1331_v37  ;;  %v977_v61 = vmax.f32 %v4868_v53, 0.0  ;;  %v3284_v30 = vld [vmem:[%s5955_s4 + $0x28] sm:$0xf0]  ;;  %1642 = vmatpush.bf16.msrb.mxu3 %v3283_v52  ;;  %v3450_v53 = vld [vmem:[%s5956_s5 + $0xe8] sm:$0xf] }
 0x2d5   : > { %v1150_v13 = vpack.c.bf16 %v1131_v21, %v1130_v28  ;;  %v3276_v21 = vld [vmem:[%s5955_s4 + $0x18] sm:$0xf0] }
 0x2d6   : > { %3747 = vrot.lane.b32.xlu2 %v3746_v17, %s4109_s17  ;;  %v3761_v40 = vpack.i.bf16 %v977_v61, %v976_v22  ;;  %v3287_v17 = vor.u32 %v3490_v7, %v3284_v30 }
 0x2d7   : > { %v1262_v60 = vpop.f32.mrf.mxu2 }
 0x2d8   : > { %v4890_v47 = vadd.f32 %v4791_v55, %v1262_v60  ;;  %1731 = vmatpush.bf16.msrb.mxu0 %v3287_v17  ;;  %v3274_v60 = vld [vmem:[%s5955_s4 + $0x10] sm:$0xf] }
 0x2da   : > { %v1333_v9 = vmax.f32 %v4890_v47, 0.0 }
 0x2de   : > { %3762 = vrot.lane.b32.xlu2 %v3761_v40, %s4109_s17  ;;  %v3275_v40 = vor.u32 %v3489_v19, %v3274_v60 }
 0x2df   : > { %v1264_v34 = vpop.f32.mrf.mxu2 }
 0x2e0   : > { %v4894_v25 = vadd.f32 %v4791_v55, %v1264_v34  ;;  %v3279_v34 = vor.u32 %v3488_v57, %v3276_v21  ;;  %1643 = vmatpush.bf16.msrb.mxu3 %v3275_v40 }
 0x2e2   : > { %v1334_v1 = vmax.f32 %v4894_v25, 0.0  ;;  %1732 = vmatpush.bf16.msrb.mxu0 %v3279_v34 }
 0x2e4   : > { %3260 = vmatmul.msk.bf16.gmra.mxu2 %vm808_vm2, %v1150_v13  ;;  %v3756_v27 = vpack.i.bf16 %v1334_v1, %v1333_v9  ;;  %v3266_v13 = vld [vmem:[%s5955_s4] sm:$0xf] }
 0x2e6   : > { %3757 = vrot.lane.b32.xlu1 %v3756_v27, %s4109_s17  ;;  %v3487_v27 = vld [vmem:[%s5955_s4 + $0x4] sm:$0xf0] }
 0x2e7   : > { %v1267_v39 = vpop.f32.mrf.mxu2 }
 0x2e8   : > { %v4905_v5 = vadd.f32 %v4791_v55, %v1267_v39  ;;  %v3486_v39 = vld [vmem:[%s5955_s4 + $0x4] sm:$0xf] }
 0x2ea   : > { %v1335_v56 = vmax.f32 %v4905_v5, 0.0  ;;  %v3442_v5 = vld [vmem:[%s5956_s5 + $0xc8] sm:$0xf] }
 0x2ef   : > { %v1269_v15 = vpop.f32.mrf.mxu2 }
 0x2f0   : > { %v4908_v58 = vadd.f32 %v4791_v55, %v1269_v15  ;;  %v3267_v15 = vor.u32 %v3487_v27, %v3266_v13 }
 0x2f2   : > { %v1336_v26 = vmax.f32 %v4908_v58, 0.0  ;;  %1644 = vmatpush.bf16.msrb.mxu3 %v3267_v15  ;;  %v3380_v58 = vld [vmem:[%s5956_s5 + $0xd0] sm:$0xf0] }
 0x2f4   : > { %v3766_v24 = vpack.i.bf16 %v1336_v26, %v1335_v56 }
 0x2f6   : > { %3767 = vrot.lane.b32.xlu0 %v3766_v24, %s4109_s17  ;;  %v3268_v24 = vld [vmem:[%s5955_s4 + $0x8] sm:$0xf0] }
 0x2f7   : > { %v1272_v16 = vpop.f32.mrf.mxu2 }
 0x2f8   : > { %v4927_v33 = vadd.f32 %v4791_v55, %v1272_v16  ;;  %v3271_v16 = vor.u32 %v3486_v39, %v3268_v24 }
 0x2fa   : > { %v1337_v54 = vmax.f32 %v4927_v33, 0.0  ;;  %1733 = vmatpush.bf16.msrb.mxu0 %v3271_v16  ;;  %v3505_v33 = vld [vmem:[%s5956_s5 + $0xac] sm:$0xf0] }
 0x2ff   : > { %v1274_v50 = vpop.f32.mrf.mxu2 }
 0x300   : > { %v4933_v41 = vadd.f32 %v4791_v55, %v1274_v50 }
 0x302   : > { %v1338_v12 = vmax.f32 %v4933_v41, 0.0  ;;  %v3370_v41 = vld [vmem:[%s5956_s5 + $0xa0] sm:$0xf] }
 0x304   : > { %v3771_v20 = vpack.i.bf16 %v1338_v12, %v1337_v54 }
 0x306   : > { %3772 = vrot.lane.b32.xlu1 %v3771_v20, %s4109_s17 }
 0x307   : > { %v1277_v28 = vpop.f32.mrf.mxu2 }
 0x308   : > { %v4979_v4 = vadd.f32 %v4791_v55, %v1277_v28 }
 0x30a   : > { %v1339_v51 = vmax.f32 %v4979_v4, 0.0 }
 0x30f   : > { %v1279_v2 = vpop.f32.mrf.mxu2 }
 0x310   : > { %v4982_v46 = vadd.f32 %v4791_v55, %v1279_v2 }
 0x312   : > { %v1340_v59 = vmax.f32 %v4982_v46, 0.0  ;;  %v3372_v46 = vld [vmem:[%s5956_s5 + $0xb0] sm:$0xf0] }
 0x314   : > { %v3776_v50 = vpack.i.bf16 %v1340_v59, %v1339_v51 }
 0x316   : > { %3777 = vrot.lane.b32.xlu2 %v3776_v50, %s4109_s17 }
 0x317   : > { %v1282_v49 = vpop.f32.mrf.mxu2 }
 0x318   : > { %v4992_v45 = vadd.f32 %v4791_v55, %v1282_v49 }
 0x31a   : > { %v1341_v52 = vmax.f32 %v4992_v45, 0.0  ;;  %v3332_v45 = vld [vmem:[%s5956_s5 + $0x10] sm:$0xf0] }
 0x31f   : > { %v1284_v18 = vpop.f32.mrf.mxu2 }
 0x320   : > { %v4995_v7 = vadd.f32 %v4791_v55, %v1284_v18 }
 0x322   : > { %v1342_v30 = vmax.f32 %v4995_v7, 0.0  ;;  %v3494_v7 = vld [vmem:[%s5956_s5 + $0x4] sm:$0xf] }
 0x324   : > { %v3781_v17 = vpack.i.bf16 %v1342_v30, %v1341_v52 }
 0x326   : > { %3782 = vrot.lane.b32.xlu0 %v3781_v17, %s4109_s17 }
 0x327   : > { %v1287_v20 = vpop.f32.mrf.mxu2 }
 0x328   : > { %v3728_v60 = vpop.permute.xlu1 %3727  ;;  %v5009_v34 = vadd.f32 %v4791_v55, %v1287_v20 }
 0x329   : > { %v3730_v19 = vunpack.i.h.bf16 %v3728_v60  ;;  %v3729_v57 = vunpack.i.l.bf16 %v3728_v60 }
 0x32a   : > { %v1343_v11 = vmax.f32 %v5009_v34, 0.0 }
 0x32b   : > { %v1488_v40 = vmax.f32 %v1328_v23, %v3730_v19  ;;  %v1487_v21 = vmax.f32 %v1327_v8, %v3729_v57 }
 0x32d   : > { %v1519_v28 = vpack.c.bf16 %v1488_v40, %v1487_v21 }
 0x32f   : > { %v1289_v13 = vpop.f32.mrf.mxu2  ;;  %3296 = vmatmul.msk.bf16.vlgmr.msrb.gmra.mxu3 %vm808_vm2, %v1519_v28  ;;  %3312 = vmatmul.msk.bf16.vlgmr.msrb.gmra.mxu0 %vm808_vm2, %v1519_v28 }
 0x330   : > { %v5014_v27 = vadd.f32 %v4791_v55, %v1289_v13  ;;  %v3743_v39 = vpop.permute.xlu1 %3742  ;;  %v3748_v60 = vpop.permute.xlu2 %3747 }
 0x331   : > { %v3745_v15 = vunpack.i.h.bf16 %v3743_v39  ;;  %v3744_v24 = vunpack.i.l.bf16 %v3743_v39  ;;  %v3750_v13 = vunpack.i.h.bf16 %v3748_v60  ;;  %v3749_v39 = vunpack.i.l.bf16 %v3748_v60 }
 0x332   : > { %v1344_v14 = vmax.f32 %v5014_v27, 0.0 }
 0x333   : > { %v1133_v8 = vmax.f32 %v973_v32, %v3745_v15  ;;  %v1132_v23 = vmax.f32 %v972_v3, %v3744_v24  ;;  %v1492_v35 = vmax.f32 %v1332_v36, %v3750_v13  ;;  %v1491_v42 = vmax.f32 %v1331_v37, %v3749_v39 }
 0x334   : > { %v3786_v16 = vpack.i.bf16 %v1344_v14, %v1343_v11 }
 0x335   : > { %v1151_v2 = vpack.c.bf16 %v1133_v8, %v1132_v23  ;;  %v1521_v23 = vpack.c.bf16 %v1492_v35, %v1491_v42 }
 0x336   : > { %3787 = vrot.lane.b32.xlu1 %v3786_v16, %s4109_s17 }
 0x337   : > { %v1292_v50 = vpop.f32.mrf.mxu2  ;;  %3261 = vmatmul.msk.bf16.gmra.mxu2 %vm808_vm2, %v1151_v2 }
 0x338   : > { %v3738_v49 = vpop.permute.xlu0 %3737  ;;  %v5033_v3 = vadd.f32 %v4791_v55, %v1292_v50 }
 0x339   : > { %v3740_v18 = vunpack.i.h.bf16 %v3738_v49  ;;  %v3739_v17 = vunpack.i.l.bf16 %v3738_v49  ;;  %v3508_v49 = vld [vmem:[%s5956_s5 + $0xe4] sm:$0xf] }
 0x33b   : > { %v1490_v43 = vmax.f32 %v1330_v10, %v3740_v18  ;;  %v1489_v48 = vmax.f32 %v1329_v38, %v3739_v17  ;;  %v1345_v10 = vmax.f32 %v5033_v3, 0.0  ;;  %v3388_v18 = vld [vmem:[%s5956_s5 + $0xf0] sm:$0xf0] }
 0x33d   : > { %v1520_v32 = vpack.c.bf16 %v1490_v43, %v1489_v48  ;;  %v3386_v48 = vld [vmem:[%s5956_s5 + $0xe0] sm:$0xf] }
 0x33f   : > { %v1294_v20 = vpop.f32.mrf.mxu2  ;;  %3297 = vmatmul.msk.bf16.gmra.mxu3 %vm808_vm2, %v1520_v32  ;;  %3313 = vmatmul.msk.bf16.gmra.mxu0 %vm808_vm2, %v1520_v32  ;;  %v3509_v32 = vld [vmem:[%s5956_s5 + $0xec] sm:$0xf0] }
 0x340   : > { %v5038_v19 = vadd.f32 %v4791_v55, %v1294_v20  ;;  %v3753_v57 = vpop.permute.xlu0 %3752  ;;  %v3524_v20 = vld [vmem:[%s5956_s5 + $0xec] sm:$0xf] }
 0x341   : > { %v3755_v40 = vunpack.i.h.bf16 %v3753_v57  ;;  %v3754_v6 = vunpack.i.l.bf16 %v3753_v57  ;;  %v3387_v57 = vor.u32 %v3509_v32, %v3386_v48  ;;  %v3444_v48 = vld [vmem:[%s5956_s5 + $0xd8] sm:$0xf0] }
 0x342   : > { %v1346_v0 = vmax.f32 %v5038_v19, 0.0 }
 0x343   : > { %v1135_v38 = vmax.f32 %v975_v29, %v3755_v40  ;;  %v1134_v21 = vmax.f32 %v974_v63, %v3754_v6  ;;  %v3763_v29 = vpop.permute.xlu2 %3762  ;;  %v3452_v40 = vld [vmem:[%s5956_s5 + $0xf8] sm:$0xf0]  ;;  %2045 = vmatpush.bf16.msra.mxu1 %v3387_v57 }
 0x344   : > { %v3791_v28 = vpack.i.bf16 %v1346_v0, %v1345_v10  ;;  %v3765_v63 = vunpack.i.h.bf16 %v3763_v29  ;;  %v3764_v8 = vunpack.i.l.bf16 %v3763_v29 }
 0x345   : > { %v1152_v15 = vpack.c.bf16 %v1135_v38, %v1134_v21  ;;  %v3455_v38 = vor.u32 %v3524_v20, %v3452_v40 }
 0x346   : > { %3792 = vrot.lane.b32.xlu2 %v3791_v28, %s4109_s17  ;;  %v1137_v31 = vmax.f32 %v977_v61, %v3765_v63  ;;  %v1136_v44 = vmax.f32 %v976_v22, %v3764_v8  ;;  %v3391_v61 = vor.u32 %v3508_v49, %v3388_v18  ;;  %v3525_v22 = vld [vmem:[%s5956_s5 + $0xf4] sm:$0xf0]  ;;  %v3506_v18 = vld [vmem:[%s5956_s5 + $0xc4] sm:$0xf] }
 0x347   : > { %v1297_v24 = vpop.f32.mrf.mxu2  ;;  %3262 = vmatmul.msk.bf16.gmra.mxu2 %vm808_vm2, %v1152_v15  ;;  %v3451_v43 = vor.u32 %v3525_v22, %v3450_v53  ;;  %2462 = vmatpush.bf16.msra.mxu0 %v3455_v38  ;;  %v3523_v53 = vld [vmem:[%s5956_s5 + $0xd4] sm:$0xf0] }
 0x348   : > { %v5057_v16 = vadd.f32 %v4791_v55, %v1297_v24  ;;  %v1153_v17 = vpack.c.bf16 %v1137_v31, %v1136_v44  ;;  %2134 = vmatpush.bf16.msra.mxu2 %v3391_v61  ;;  %v3507_v61 = vld [vmem:[%s5956_s5 + $0xcc] sm:$0xf0]  ;;  %v3443_v22 = vor.u32 %v3523_v53, %v3442_v5  ;;  %v3356_v5 = vld [vmem:[%s5956_s5 + $0x70] sm:$0xf0]  ;;  %v3346_v53 = vld [vmem:[%s5956_s5 + $0x40] sm:$0xf] }
 0x349   : > { %2373 = vmatpush.bf16.msra.mxu3 %v3451_v43  ;;  %v3522_v43 = vld [vmem:[%s5956_s5 + $0xcc] sm:$0xf] }
 0x34a   : > { %v1347_v37 = vmax.f32 %v5057_v16, 0.0 }
 0x34d   : > { %2374 = vmatpush.bf16.msra.mxu3 %v3443_v22 }
 0x34f   : > { %v1299_v2 = vpop.f32.mrf.mxu2  ;;  %3298 = vmatmul.msk.bf16.gmra.mxu3 %vm808_vm2, %v1521_v23  ;;  %3314 = vmatmul.msk.bf16.gmra.mxu0 %vm808_vm2, %v1521_v23 }
 0x350   : > { %v5062_v50 = vadd.f32 %v4791_v55, %v1299_v2 }
 0x352   : > { %v1348_v36 = vmax.f32 %v5062_v50, 0.0 }
 0x354   : > { %v3796_v62 = vpack.i.bf16 %v1348_v36, %v1347_v37 }
 0x356   : > { %3797 = vrot.lane.b32.xlu0 %v3796_v62, %s4109_s17  ;;  %v3378_v62 = vld [vmem:[%s5956_s5 + $0xc0] sm:$0xf] }
 0x357   : > { %v1302_v60 = vpop.f32.mrf.mxu2  ;;  %3263 = vmatmul.msk.bf16.gmra.mxu2 %vm808_vm2, %v1153_v17  ;;  %v3379_v17 = vor.u32 %v3507_v61, %v3378_v62  ;;  %v3499_v62 = vld [vmem:[%s5956_s5 + $0x4c] sm:$0xf0]  ;;  %v3498_v61 = vld [vmem:[%s5956_s5 + $0x44] sm:$0xf] }
 0x358   : > { %v3758_v6 = vpop.permute.xlu1 %3757  ;;  %v5105_v24 = vadd.f32 %v4791_v55, %v1302_v60  ;;  %v3447_v60 = vor.u32 %v3522_v43, %v3444_v48  ;;  %v3347_v22 = vor.u32 %v3499_v62, %v3346_v53  ;;  %v3434_v43 = vld [vmem:[%s5956_s5 + $0xa8] sm:$0xf]  ;;  %v3521_v48 = vld [vmem:[%s5956_s5 + $0xb4] sm:$0xf0] }
 0x359   : > { %v3760_v21 = vunpack.i.h.bf16 %v3758_v6  ;;  %v3759_v28 = vunpack.i.l.bf16 %v3758_v6  ;;  %2046 = vmatpush.bf16.msra.mxu1 %v3379_v17  ;;  %v3348_v17 = vld [vmem:[%s5956_s5 + $0x50] sm:$0xf0]  ;;  %v3519_v53 = vld [vmem:[%s5956_s5 + $0x94] sm:$0xf0] }
 0x35a   : > { %v1349_v29 = vmax.f32 %v5105_v24, 0.0  ;;  %2463 = vmatpush.bf16.msra.mxu0 %v3447_v60  ;;  %v3351_v60 = vor.u32 %v3498_v61, %v3348_v17  ;;  %v3428_v17 = vld [vmem:[%s5956_s5 + $0x98] sm:$0xf0] }
 0x35b   : > { %v1494_v13 = vmax.f32 %v1334_v1, %v3760_v21  ;;  %v1493_v39 = vmax.f32 %v1333_v9, %v3759_v28 }
 0x35d   : > { %v1522_v15 = vpack.c.bf16 %v1494_v13, %v1493_v39 }
 0x35f   : > { %v1304_v35 = vpop.f32.mrf.mxu2  ;;  %3299 = vmatmul.msk.bf16.gmra.mxu3 %vm808_vm2, %v1522_v15  ;;  %3315 = vmatmul.msk.bf16.gmra.mxu0 %vm808_vm2, %v1522_v15 }
 0x360   : > { %v5110_v42 = vadd.f32 %v4791_v55, %v1304_v35 }
 0x362   : > { %v1350_v25 = vmax.f32 %v5110_v42, 0.0 }
 0x364   : > { %v3801_v47 = vpack.i.bf16 %v1350_v25, %v1349_v29 }
 0x366   : > { %3802 = vrot.lane.b32.xlu1 %v3801_v47, %s4109_s17 }
 0x367   : > { %v1307_v9 = vpop.f32.mrf.mxu2 }
 0x368   : > { %v3768_v1 = vpop.permute.xlu0 %3767  ;;  %v5124_v44 = vadd.f32 %v4791_v55, %v1307_v9 }
 0x369   : > { %v3770_v63 = vunpack.i.h.bf16 %v3768_v1  ;;  %v3769_v8 = vunpack.i.l.bf16 %v3768_v1  ;;  %v3503_v1 = vld [vmem:[%s5956_s5 + $0x8c] sm:$0xf0] }
 0x36a   : > { %v1351_v32 = vmax.f32 %v5124_v44, 0.0 }
 0x36b   : > { %v1496_v23 = vmax.f32 %v1336_v26, %v3770_v63  ;;  %v1495_v2 = vmax.f32 %v1335_v56, %v3769_v8  ;;  %v3383_v26 = vor.u32 %v3506_v18, %v3380_v58  ;;  %v3502_v63 = vld [vmem:[%s5956_s5 + $0x84] sm:$0xf] }
 0x36c   : > { %v3500_v18 = vld [vmem:[%s5956_s5 + $0x64] sm:$0xf] }
 0x36d   : > { %v1523_v31 = vpack.c.bf16 %v1496_v23, %v1495_v2  ;;  %2135 = vmatpush.bf16.msra.mxu2 %v3383_v26  ;;  %v3364_v23 = vld [vmem:[%s5956_s5 + $0x90] sm:$0xf0]  ;;  %v3359_v26 = vor.u32 %v3500_v18, %v3356_v5 }
 0x36e   : > { %v3367_v2 = vor.u32 %v3502_v63, %v3364_v23 }
 0x36f   : > { %v1309_v49 = vpop.f32.mrf.mxu2  ;;  %3300 = vmatmul.msk.bf16.gmra.mxu3 %vm808_vm2, %v1523_v31  ;;  %3316 = vmatmul.msk.bf16.gmra.mxu0 %vm808_vm2, %v1523_v31  ;;  %v3354_v31 = vld [vmem:[%s5956_s5 + $0x60] sm:$0xf] }
 0x370   : > { %v5138_v56 = vadd.f32 %v4791_v55, %v1309_v49  ;;  %v3778_v39 = vpop.permute.xlu2 %3777  ;;  %v3501_v49 = vld [vmem:[%s5956_s5 + $0x6c] sm:$0xf0] }
 0x371   : > { %v3780_v15 = vunpack.i.h.bf16 %v3778_v39  ;;  %v3779_v35 = vunpack.i.l.bf16 %v3778_v39  ;;  %v3355_v58 = vor.u32 %v3501_v49, %v3354_v31  ;;  %v3338_v39 = vld [vmem:[%s5956_s5 + $0x20] sm:$0xf] }
 0x372   : > { %v1352_v20 = vmax.f32 %v5138_v56, 0.0  ;;  %v1543_v49 = vld [vmem:[%s5957_s6 + $0x3] sm:$0x3] }
 0x373   : > { %v1500_v47 = vmax.f32 %v1340_v59, %v3780_v15  ;;  %v1499_v9 = vmax.f32 %v1339_v51, %v3779_v35  ;;  %v3362_v51 = vld [vmem:[%s5956_s5 + $0x80] sm:$0xf]  ;;  %v3497_v15 = vld [vmem:[%s5956_s5 + $0x2c] sm:$0xf0]  ;;  %v3496_v35 = vld [vmem:[%s5956_s5 + $0x24] sm:$0xf] }
 0x374   : > { %v3806_v57 = vpack.i.bf16 %v1352_v20, %v1351_v32  ;;  %v3363_v8 = vor.u32 %v3503_v1, %v3362_v51 }
 0x375   : > { %v1525_v4 = vpack.c.bf16 %v1500_v47, %v1499_v9  ;;  %v3339_v47 = vor.u32 %v3497_v15, %v3338_v39  ;;  %v3340_v9 = vld [vmem:[%s5956_s5 + $0x30] sm:$0xf0] }
 0x376   : > { %3807 = vrot.lane.b32.xlu2 %v3806_v57, %s4109_s17  ;;  %v3520_v57 = vld [vmem:[%s5956_s5 + $0xac] sm:$0xf] }
 0x378   : > { %v3773_v40 = vpop.permute.xlu1 %3772 }
 0x379   : > { %v3775_v6 = vunpack.i.h.bf16 %v3773_v40  ;;  %v3774_v38 = vunpack.i.l.bf16 %v3773_v40 }
 0x37b   : > { %v1498_v21 = vmax.f32 %v1338_v12, %v3775_v6  ;;  %v1497_v28 = vmax.f32 %v1337_v54, %v3774_v38  ;;  %v3504_v54 = vld [vmem:[%s5956_s5 + $0xa4] sm:$0xf]  ;;  %v3371_v12 = vor.u32 %v3505_v33, %v3370_v41  ;;  %v3435_v6 = vor.u32 %v3521_v48, %v3434_v43  ;;  %v3436_v38 = vld [vmem:[%s5956_s5 + $0xb8] sm:$0xf0] }
 0x37c   : > { %v3375_v59 = vor.u32 %v3504_v54, %v3372_v46  ;;  %v3343_v54 = vor.u32 %v3496_v35, %v3340_v9  ;;  %v3330_v46 = vld [vmem:[%s5956_s5] sm:$0xf] }
 0x37d   : > { %v1524_v13 = vpack.c.bf16 %v1498_v21, %v1497_v28  ;;  %2047 = vmatpush.bf16.msra.mxu1 %v3371_v12  ;;  %2375 = vmatpush.bf16.msra.mxu3 %v3435_v6 }
 0x37e   : > { %2136 = vmatpush.bf16.msra.mxu2 %v3375_v59  ;;  %v3495_v59 = vld [vmem:[%s5956_s5 + $0xc] sm:$0xf0] }
 0x37f   : > { %3301 = vmatmul.msk.bf16.gmra.mxu3 %vm808_vm2, %v1524_v13  ;;  %3317 = vmatmul.msk.bf16.gmra.mxu0 %vm808_vm2, %v1524_v13  ;;  %v3439_v13 = vor.u32 %v3520_v57, %v3436_v38 }
 0x381   : > { %2048 = vmatpush.bf16.msra.mxu1 %v3363_v8  ;;  %2464 = vmatpush.bf16.msra.mxu0 %v3439_v13 }
 0x382   : > { %2137 = vmatpush.bf16.msra.mxu2 %v3367_v2 }
 0x385   : > { %2049 = vmatpush.bf16.msra.mxu1 %v3355_v58  ;;  %v5273_v58 = vperm.slane %v1543_v49, 0 }
 0x386   : > { %2138 = vmatpush.bf16.msra.mxu2 %v3359_v26  ;;  %v5275_v26 = vperm.slane %v1543_v49, 1 }
 0x389   : > { %2050 = vmatpush.bf16.msra.mxu1 %v3347_v22  ;;  %v3518_v22 = vld [vmem:[%s5956_s5 + $0x8c] sm:$0xf] }
 0x38a   : > { %2139 = vmatpush.bf16.msra.mxu2 %v3351_v60  ;;  %v3431_v57 = vor.u32 %v3518_v22, %v3428_v17 }
 0x38c   : > { %2465 = vmatpush.bf16.msra.mxu0 %v3431_v57 }
 0x38d   : > { %2051 = vmatpush.bf16.msra.mxu1 %v3339_v47 }
 0x38e   : > { %2140 = vmatpush.bf16.msra.mxu2 %v3343_v54 }
 0x38f   : > { %3302 = vmatmul.msk.bf16.gmra.mxu3 %vm808_vm2, %v1525_v4  ;;  %3318 = vmatmul.msk.bf16.gmra.mxu0 %vm808_vm2, %v1525_v4 }
 0x398   : > { %v3783_v40 = vpop.permute.xlu0 %3782 }
 0x399   : > { %v3785_v21 = vunpack.i.h.bf16 %v3783_v40  ;;  %v3784_v28 = vunpack.i.l.bf16 %v3783_v40 }
 0x39b   : > { %v1502_v41 = vmax.f32 %v1342_v30, %v3785_v21  ;;  %v1501_v33 = vmax.f32 %v1341_v52, %v3784_v28  ;;  %v3331_v30 = vor.u32 %v3495_v59, %v3330_v46  ;;  %v3335_v52 = vor.u32 %v3494_v7, %v3332_v45 }
 0x39d   : > { %v1526_v12 = vpack.c.bf16 %v1502_v41, %v1501_v33  ;;  %2052 = vmatpush.bf16.msra.mxu1 %v3331_v30  ;;  %2141 = vmatpush.bf16.msra.mxu2 %v3335_v52 }
 0x39f   : > { %3303 = vmatmul.msk.bf16.gmra.mxu3 %vm808_vm2, %v1526_v12  ;;  %3319 = vmatmul.msk.bf16.gmra.mxu0 %vm808_vm2, %v1526_v12 }
 0x3a0   : > { %v3793_v31 = vpop.permute.xlu2 %3792 }
 0x3a1   : > { %v3795_v5 = vunpack.i.h.bf16 %v3793_v31 }
 0x3a3   : > { %v1506_v62 = vmax.f32 %v1346_v0, %v3795_v5 }
 0x3a8   : > { %v3788_v4 = vpop.permute.xlu1 %3787 }
 0x3a9   : > { %v3790_v51 = vunpack.i.h.bf16 %v3788_v4  ;;  %v3789_v1 = vunpack.i.l.bf16 %v3788_v4 }
 0x3ab   : > { %v1504_v63 = vmax.f32 %v1344_v14, %v3790_v51  ;;  %v1503_v8 = vmax.f32 %v1343_v11, %v3789_v1  ;;  %v3794_v14 = vunpack.i.l.bf16 %v3793_v31  ;;  %v3426_v11 = vld [vmem:[%s5956_s5 + $0x88] sm:$0xf] }
 0x3ac   : > { %v1735_v23 = vpop.f32.mrf.mxu0  ;;  %v3427_v61 = vor.u32 %v3519_v53, %v3426_v11 }
 0x3ad   : > { %v1527_v2 = vpack.c.bf16 %v1504_v63, %v1503_v8  ;;  %v1505_v43 = vmax.f32 %v1345_v10, %v3794_v14  ;;  %v1736_v48 = vadd.f32 %v1735_v23, %v5275_v26 }
 0x3ae   : > { %2376 = vmatpush.bf16.msra.mxu3 %v3427_v61 }
 0x3af   : > { %3304 = vmatmul.msk.bf16.gmra.mxu3 %vm808_vm2, %v1527_v2  ;;  %3320 = vmatmul.msk.bf16.gmra.mxu0 %vm808_vm2, %v1527_v2  ;;  %v1528_v21 = vpack.c.bf16 %v1506_v62, %v1505_v43  ;;  %v1816_v28 = vmax.f32 %v1736_v48, 0.0  ;;  %v3418_v43 = vld [vmem:[%s5956_s5 + $0x68] sm:$0xf]  ;;  %v3517_v48 = vld [vmem:[%s5956_s5 + $0x74] sm:$0xf0] }
 0x3b2   : > { %v1646_v18 = vpop.f32.mrf.mxu3 }
 0x3b3   : > { %v1647_v34 = vadd.f32 %v1646_v18, %v5273_v58 }
 0x3b4   : > { %v1737_v27 = vpop.f32.mrf.mxu0 }
 0x3b5   : > { %v1738_v60 = vadd.f32 %v1737_v27, %v5275_v26  ;;  %v1815_v0 = vmax.f32 %v1647_v34, 0.0 }
 0x3b7   : > { %v1818_v13 = vmax.f32 %v1738_v60, 0.0  ;;  %v1879_v15 = vmax.f32 %v1815_v0, %v1816_v28  ;;  %v3420_v0 = vld [vmem:[%s5956_s5 + $0x78] sm:$0xf0] }
 0x3ba   : > { %v1312_v40 = vpop.f32.mrf.mxu2  ;;  %v1648_v19 = vpop.f32.mrf.mxu3 }
 0x3bb   : > { %v1649_v6 = vadd.f32 %v1648_v19, %v5273_v58  ;;  %v5300_v10 = vadd.f32 %v4791_v55, %v1312_v40  ;;  %v3419_v40 = vor.u32 %v3517_v48, %v3418_v43  ;;  %v3516_v19 = vld [vmem:[%s5956_s5 + $0x6c] sm:$0xf] }
 0x3bc   : > { %v1740_v38 = vpop.f32.mrf.mxu0  ;;  %v3423_v28 = vor.u32 %v3516_v19, %v3420_v0  ;;  %v3514_v0 = vld [vmem:[%s5956_s5 + $0x4c] sm:$0xf] }
 0x3bd   : > { %v1817_v39 = vmax.f32 %v1649_v6, 0.0  ;;  %v1353_v54 = vmax.f32 %v5300_v10, 0.0  ;;  %v1741_v30 = vadd.f32 %v1740_v38, %v5275_v26  ;;  %2377 = vmatpush.bf16.msra.mxu3 %v3419_v40  ;;  %v3515_v40 = vld [vmem:[%s5956_s5 + $0x54] sm:$0xf0] }
 0x3be   : > { %2466 = vmatpush.bf16.msra.mxu0 %v3423_v28 }
 0x3bf   : > { %v1880_v3 = vmax.f32 %v1817_v39, %v1818_v13  ;;  %3305 = vmatmul.msk.bf16.gmra.mxu3 %vm808_vm2, %v1528_v21  ;;  %3321 = vmatmul.msk.bf16.gmra.mxu0 %vm808_vm2, %v1528_v21  ;;  %v1820_v49 = vmax.f32 %v1741_v30, 0.0 }
 0x3c1   : > { %v5302_v35 = vpack.c.bf16 %v1880_v3, %v1879_v15 }
 0x3c2   : > { %v1314_v47 = vpop.f32.mrf.mxu2  ;;  %v1651_v9 = vpop.f32.mrf.mxu3 }
 0x3c3   : > { %v5305_v41 = vadd.f32 %v4791_v55, %v1314_v47  ;;  %2053 = vmatmul.bf16.vlgmr.msra.gmra.mxu1 %v5302_v35  ;;  %2142 = vmatmul.bf16.vlgmr.msra.gmra.mxu2 %v5302_v35  ;;  %v1652_v46 = vadd.f32 %v1651_v9, %v5273_v58 }
 0x3c4   : > { %v1742_v33 = vpop.f32.mrf.mxu0 }
 0x3c5   : > { %v1354_v12 = vmax.f32 %v5305_v41, 0.0  ;;  %v1743_v45 = vadd.f32 %v1742_v33, %v5275_v26  ;;  %v1819_v63 = vmax.f32 %v1652_v46, 0.0 }
 0x3c7   : > { %v3811_v59 = vpack.i.bf16 %v1354_v12, %v1353_v54  ;;  %v1822_v18 = vmax.f32 %v1743_v45, 0.0  ;;  %v1881_v14 = vmax.f32 %v1819_v63, %v1820_v49 }
 0x3c8   : > { %v3798_v7 = vpop.permute.xlu0 %3797 }
 0x3c9   : > { %v3800_v52 = vunpack.i.h.bf16 %v3798_v7  ;;  %v3799_v4 = vunpack.i.l.bf16 %v3798_v7  ;;  %3812 = vrot.lane.b32.xlu0 %v3811_v59, %s4109_s17 }
 0x3ca   : > { %v1317_v51 = vpop.f32.mrf.mxu2  ;;  %v1653_v1 = vpop.f32.mrf.mxu3 }
 0x3cb   : > { %v1508_v8 = vmax.f32 %v1348_v36, %v3800_v52  ;;  %v1507_v23 = vmax.f32 %v1347_v37, %v3799_v4  ;;  %v1654_v2 = vadd.f32 %v1653_v1, %v5273_v58  ;;  %v5327_v11 = vadd.f32 %v4791_v55, %v1317_v51 }
 0x3cc   : > { %v1745_v31 = vpop.f32.mrf.mxu0 }
 0x3cd   : > { %v1529_v5 = vpack.c.bf16 %v1508_v8, %v1507_v23  ;;  %v1821_v27 = vmax.f32 %v1654_v2, 0.0  ;;  %v1355_v62 = vmax.f32 %v5327_v11, 0.0  ;;  %v1746_v60 = vadd.f32 %v1745_v31, %v5275_v26 }
 0x3cf   : > { %v1882_v34 = vmax.f32 %v1821_v27, %v1822_v18  ;;  %3306 = vmatmul.msk.bf16.gmra.mxu3 %vm808_vm2, %v1529_v5  ;;  %3322 = vmatmul.msk.bf16.gmra.mxu0 %vm808_vm2, %v1529_v5  ;;  %v1824_v46 = vmax.f32 %v1746_v60, 0.0 }
 0x3d0   : > { %v3808_v4 = vpop.permute.xlu2 %3807 }
 0x3d1   : > { %v5329_v50 = vpack.c.bf16 %v1882_v34, %v1881_v14  ;;  %v3810_v63 = vunpack.i.h.bf16 %v3808_v4  ;;  %v3809_v8 = vunpack.i.l.bf16 %v3808_v4 }
 0x3d2   : > { %v1319_v16 = vpop.f32.mrf.mxu2  ;;  %v1656_v37 = vpop.f32.mrf.mxu3 }
 0x3d3   : > { %v5332_v36 = vadd.f32 %v4791_v55, %v1319_v16  ;;  %2058 = vmatmul.bf16.gmra.mxu1 %v5329_v50  ;;  %2147 = vmatmul.bf16.gmra.mxu2 %v5329_v50  ;;  %v1657_v22 = vadd.f32 %v1656_v37, %v5273_v58  ;;  %v1511_v18 = vmax.f32 %v1351_v32, %v3809_v8 }
 0x3d4   : > { %v1747_v53 = vpop.f32.mrf.mxu0 }
 0x3d5   : > { %v1356_v61 = vmax.f32 %v5332_v36, 0.0  ;;  %v1748_v6 = vadd.f32 %v1747_v53, %v5275_v26  ;;  %v1823_v15 = vmax.f32 %v1657_v22, 0.0 }
 0x3d7   : > { %v3816_v17 = vpack.i.bf16 %v1356_v61, %v1355_v62  ;;  %v1826_v59 = vmax.f32 %v1748_v6, 0.0  ;;  %v1883_v45 = vmax.f32 %v1823_v15, %v1824_v46  ;;  %v3412_v6 = vld [vmem:[%s5956_s5 + $0x58] sm:$0xf0] }
 0x3d8   : > { %v3803_v57 = vpop.permute.xlu1 %3802  ;;  %v3415_v28 = vor.u32 %v3514_v0, %v3412_v6 }
 0x3d9   : > { %v3805_v38 = vunpack.i.h.bf16 %v3803_v57  ;;  %v3804_v21 = vunpack.i.l.bf16 %v3803_v57  ;;  %3817 = vrot.lane.b32.xlu1 %v3816_v17, %s4109_s17  ;;  %v3410_v57 = vld [vmem:[%s5956_s5 + $0x48] sm:$0xf] }
 0x3da   : > { %v1322_v13 = vpop.f32.mrf.mxu2  ;;  %v1658_v39 = vpop.f32.mrf.mxu3  ;;  %v3411_v19 = vor.u32 %v3515_v40, %v3410_v57  ;;  %2467 = vmatpush.bf16.msra.mxu0 %v3415_v28 }
 0x3db   : > { %v1510_v3 = vmax.f32 %v1350_v25, %v3805_v38  ;;  %v1509_v47 = vmax.f32 %v1349_v29, %v3804_v21  ;;  %v1659_v9 = vadd.f32 %v1658_v39, %v5273_v58  ;;  %v5366_v42 = vadd.f32 %v4791_v55, %v1322_v13 }
 0x3dc   : > { %v1750_v33 = vpop.f32.mrf.mxu0  ;;  %2378 = vmatpush.bf16.msra.mxu3 %v3411_v19 }
 0x3dd   : > { %v1530_v7 = vpack.c.bf16 %v1510_v3, %v1509_v47  ;;  %v1825_v30 = vmax.f32 %v1659_v9, 0.0  ;;  %v1357_v23 = vmax.f32 %v5366_v42, 0.0  ;;  %v1751_v5 = vadd.f32 %v1750_v33, %v5275_v26 }
 0x3df   : > { %v1884_v52 = vmax.f32 %v1825_v30, %v1826_v59  ;;  %3307 = vmatmul.msk.bf16.gmra.mxu3 %vm808_vm2, %v1530_v7  ;;  %3323 = vmatmul.msk.bf16.gmra.mxu0 %vm808_vm2, %v1530_v7  ;;  %v1828_v22 = vmax.f32 %v1751_v5, 0.0 }
 0x3e1   : > { %v5368_v24 = vpack.c.bf16 %v1884_v52, %v1883_v45 }
 0x3e2   : > { %v1324_v29 = vpop.f32.mrf.mxu2  ;;  %v1661_v25 = vpop.f32.mrf.mxu3 }
 0x3e3   : > { %v5371_v51 = vadd.f32 %v4791_v55, %v1324_v29  ;;  %2063 = vmatmul.bf16.gmra.mxu1 %v5368_v24  ;;  %2152 = vmatmul.bf16.gmra.mxu2 %v5368_v24  ;;  %v1662_v31 = vadd.f32 %v1661_v25, %v5273_v58  ;;  %v1512_v55 = vmax.f32 %v1352_v20, %v3810_v63 }
 0x3e4   : > { %v1752_v1 = vpop.f32.mrf.mxu0 }
 0x3e5   : > { %v1358_v2 = vmax.f32 %v5371_v51, 0.0  ;;  %v1753_v27 = vadd.f32 %v1752_v1, %v5275_v26  ;;  %v1827_v34 = vmax.f32 %v1662_v31, 0.0  ;;  %v1531_v53 = vpack.c.bf16 %v1512_v55, %v1511_v18 }
 0x3e7   : > { %v3821_v49 = vpack.i.bf16 %v1358_v2, %v1357_v23  ;;  %v1830_v17 = vmax.f32 %v1753_v27, 0.0  ;;  %v1885_v56 = vmax.f32 %v1827_v34, %v1828_v22 }
 0x3e9   : > { %3822 = vrot.lane.b32.xlu2 %v3821_v49, %s4109_s17 }
 0x3ea   : > { %v1663_v14 = vpop.f32.mrf.mxu3 }
 0x3eb   : > { %v1664_v16 = vadd.f32 %v1663_v14, %v5273_v58 }
 0x3ec   : > { %v1755_v37 = vpop.f32.mrf.mxu0 }
 0x3ed   : > { %v1829_v43 = vmax.f32 %v1664_v16, 0.0  ;;  %v1756_v38 = vadd.f32 %v1755_v37, %v5275_v26  ;;  %v3402_v37 = vld [vmem:[%s5956_s5 + $0x28] sm:$0xf] }
 0x3ef   : > { %v1886_v20 = vmax.f32 %v1829_v43, %v1830_v17  ;;  %3308 = vmatmul.msk.bf16.gmra.mxu3 %vm808_vm2, %v1531_v53  ;;  %3324 = vmatmul.msk.bf16.gmra.mxu0 %vm808_vm2, %v1531_v53  ;;  %v1832_v47 = vmax.f32 %v1756_v38, 0.0  ;;  %v3513_v53 = vld [vmem:[%s5956_s5 + $0x34] sm:$0xf0]  ;;  %v3512_v17 = vld [vmem:[%s5956_s5 + $0x2c] sm:$0xf] }
 0x3f0   : > { %v3403_v22 = vor.u32 %v3513_v53, %v3402_v37  ;;  %v3404_v43 = vld [vmem:[%s5956_s5 + $0x38] sm:$0xf0]  ;;  %v3510_v53 = vld [vmem:[%s5956_s5 + $0xc] sm:$0xf] }
 0x3f1   : > { %v5392_v44 = vpack.c.bf16 %v1886_v20, %v1885_v56 }
 0x3f2   : > { %v1666_v32 = vpop.f32.mrf.mxu3  ;;  %2379 = vmatpush.bf16.msra.mxu3 %v3403_v22  ;;  %v3396_v22 = vld [vmem:[%s5956_s5 + $0x18] sm:$0xf0] }
 0x3f3   : > { %2068 = vmatmul.bf16.gmra.mxu1 %v5392_v44  ;;  %2157 = vmatmul.bf16.gmra.mxu2 %v5392_v44  ;;  %v1667_v60 = vadd.f32 %v1666_v32, %v5273_v58  ;;  %v3407_v32 = vor.u32 %v3512_v17, %v3404_v43 }
 0x3f4   : > { %v1757_v48 = vpop.f32.mrf.mxu0 }
 0x3f5   : > { %v1758_v21 = vadd.f32 %v1757_v48, %v5275_v26  ;;  %v1831_v39 = vmax.f32 %v1667_v60, 0.0  ;;  %2468 = vmatpush.bf16.msra.mxu0 %v3407_v32 }
 0x3f7   : > { %v1834_v9 = vmax.f32 %v1758_v21, 0.0  ;;  %v1887_v46 = vmax.f32 %v1831_v39, %v1832_v47 }
 0x3fa   : > { %v1668_v13 = vpop.f32.mrf.mxu3 }
 0x3fb   : > { %v1669_v15 = vadd.f32 %v1668_v13, %v5273_v58 }
 0x3fc   : > { %v1760_v3 = vpop.f32.mrf.mxu0 }
 0x3fd   : > { %v1833_v33 = vmax.f32 %v1669_v15, 0.0  ;;  %v1761_v4 = vadd.f32 %v1760_v3, %v5275_v26 }
 0x3ff   : > { %v1888_v59 = vmax.f32 %v1833_v33, %v1834_v9  ;;  %v1836_v31 = vmax.f32 %v1761_v4, 0.0 }
 0x401   : > { %v5412_v7 = vpack.c.bf16 %v1888_v59, %v1887_v46 }
 0x402   : > { %v1671_v30 = vpop.f32.mrf.mxu3 }
 0x403   : > { %2073 = vmatmul.bf16.gmra.mxu1 %v5412_v7  ;;  %2162 = vmatmul.bf16.gmra.mxu2 %v5412_v7  ;;  %v1672_v52 = vadd.f32 %v1671_v30, %v5273_v58 }
 0x404   : > { %v1762_v45 = vpop.f32.mrf.mxu0 }
 0x405   : > { %v1763_v29 = vadd.f32 %v1762_v45, %v5275_v26  ;;  %v1835_v1 = vmax.f32 %v1672_v52, 0.0 }
 0x407   : > { %v1838_v49 = vmax.f32 %v1763_v29, 0.0  ;;  %v1889_v18 = vmax.f32 %v1835_v1, %v1836_v31  ;;  %v3394_v31 = vld [vmem:[%s5956_s5 + $0x8] sm:$0xf] }
 0x40a   : > { %v1673_v25 = vpop.f32.mrf.mxu3 }
 0x40b   : > { %v1674_v63 = vadd.f32 %v1673_v25, %v5273_v58 }
 0x40c   : > { %v1765_v8 = vpop.f32.mrf.mxu0 }
 0x40d   : > { %v1837_v55 = vmax.f32 %v1674_v63, 0.0  ;;  %v1766_v56 = vadd.f32 %v1765_v8, %v5275_v26 }
 0x40f   : > { %v1890_v5 = vmax.f32 %v1837_v55, %v1838_v49  ;;  %v1840_v19 = vmax.f32 %v1766_v56, 0.0  ;;  %v3511_v49 = vld [vmem:[%s5956_s5 + $0x14] sm:$0xf0] }
 0x410   : > { %v3395_v55 = vor.u32 %v3511_v49, %v3394_v31 }
 0x411   : > { %v5420_v27 = vpack.c.bf16 %v1890_v5, %v1889_v18 }
 0x412   : > { %v1676_v14 = vpop.f32.mrf.mxu3  ;;  %2380 = vmatpush.bf16.msra.mxu3 %v3395_v55 }
 0x413   : > { %2078 = vmatmul.bf16.gmra.mxu1 %v5420_v27  ;;  %2167 = vmatmul.bf16.gmra.mxu2 %v5420_v27  ;;  %v1677_v16 = vadd.f32 %v1676_v14, %v5273_v58 }
 0x414   : > { %v1767_v34 = vpop.f32.mrf.mxu0 }
 0x415   : > { %v1768_v20 = vadd.f32 %v1767_v34, %v5275_v26  ;;  %v1839_v60 = vmax.f32 %v1677_v16, 0.0 }
 0x417   : > { %v1842_v0 = vmax.f32 %v1768_v20, 0.0  ;;  %v1891_v38 = vmax.f32 %v1839_v60, %v1840_v19  ;;  %v3399_v20 = vor.u32 %v3510_v53, %v3396_v22 }
 0x419   : > { %2469 = vmatpush.bf16.msra.mxu0 %v3399_v20 }
 0x41a   : > { %v1678_v48 = vpop.f32.mrf.mxu3 }
 0x41b   : > { %v1679_v57 = vadd.f32 %v1678_v48, %v5273_v58 }
 0x41c   : > { %v1770_v40 = vpop.f32.mrf.mxu0 }
 0x41d   : > { %v1841_v6 = vmax.f32 %v1679_v57, 0.0  ;;  %v1771_v3 = vadd.f32 %v1770_v40, %v5275_v26 }
 0x41f   : > { %v1892_v21 = vmax.f32 %v1841_v6, %v1842_v0  ;;  %v1844_v30 = vmax.f32 %v1771_v3, 0.0 }
 0x421   : > { %v5440_v28 = vpack.c.bf16 %v1892_v21, %v1891_v38 }
 0x422   : > { %v1681_v13 = vpop.f32.mrf.mxu3 }
 0x423   : > { %2083 = vmatmul.bf16.gmra.mxu1 %v5440_v28  ;;  %2172 = vmatmul.bf16.gmra.mxu2 %v5440_v28  ;;  %v1682_v15 = vadd.f32 %v1681_v13, %v5273_v58 }
 0x424   : > { %v1772_v39 = vpop.f32.mrf.mxu0 }
 0x425   : > { %v1773_v47 = vadd.f32 %v1772_v39, %v5275_v26  ;;  %v1843_v33 = vmax.f32 %v1682_v15, 0.0 }
 0x427   : > { %v1846_v45 = vmax.f32 %v1773_v47, 0.0  ;;  %v1893_v4 = vmax.f32 %v1843_v33, %v1844_v30 }
 0x42a   : > { %v1683_v9 = vpop.f32.mrf.mxu3 }
 0x42b   : > { %v1684_v46 = vadd.f32 %v1683_v9, %v5273_v58 }
 0x42c   : > { %v1775_v59 = vpop.f32.mrf.mxu0 }
 0x42d   : > { %v1845_v52 = vmax.f32 %v1684_v46, 0.0  ;;  %v1776_v18 = vadd.f32 %v1775_v59, %v5275_v26 }
 0x42f   : > { %v1894_v29 = vmax.f32 %v1845_v52, %v1846_v45  ;;  %v1848_v32 = vmax.f32 %v1776_v18, 0.0 }
 0x431   : > { %v5448_v25 = vpack.c.bf16 %v1894_v29, %v1893_v4 }
 0x432   : > { %v1686_v1 = vpop.f32.mrf.mxu3 }
 0x433   : > { %2088 = vmatmul.bf16.gmra.mxu1 %v5448_v25  ;;  %2177 = vmatmul.bf16.gmra.mxu2 %v5448_v25  ;;  %v1687_v8 = vadd.f32 %v1686_v1, %v5273_v58 }
 0x434   : > { %v1777_v63 = vpop.f32.mrf.mxu0 }
 0x435   : > { %v1778_v5 = vadd.f32 %v1777_v63, %v5275_v26  ;;  %v1847_v34 = vmax.f32 %v1687_v8, 0.0 }
 0x437   : > { %v1850_v48 = vmax.f32 %v1778_v5, 0.0  ;;  %v1895_v19 = vmax.f32 %v1847_v34, %v1848_v32 }
 0x43a   : > { %v1688_v14 = vpop.f32.mrf.mxu3 }
 0x43b   : > { %v1689_v16 = vadd.f32 %v1688_v14, %v5273_v58  ;;  %v3813_v37 = vpop.permute.xlu0 %3812 }
 0x43c   : > { %v3815_v17 = vunpack.i.h.bf16 %v3813_v37  ;;  %v3814_v43 = vunpack.i.l.bf16 %v3813_v37  ;;  %v1780_v56 = vpop.f32.mrf.mxu0 }
 0x43d   : > { %v1849_v60 = vmax.f32 %v1689_v16, 0.0  ;;  %v1781_v10 = vadd.f32 %v1780_v56, %v5275_v26 }
 0x43e   : > { %v1514_v57 = vmax.f32 %v1354_v12, %v3815_v17  ;;  %v1513_v40 = vmax.f32 %v1353_v54, %v3814_v43 }
 0x43f   : > { %v1896_v0 = vmax.f32 %v1849_v60, %v1850_v48  ;;  %v1852_v46 = vmax.f32 %v1781_v10, 0.0 }
 0x440   : > { %v1532_v6 = vpack.c.bf16 %v1514_v57, %v1513_v40 }
 0x441   : > { %v5472_v38 = vpack.c.bf16 %v1896_v0, %v1895_v19 }
 0x442   : > { %v1691_v21 = vpop.f32.mrf.mxu3  ;;  %3309 = vmatmul.msk.bf16.gmra.mxu3 %vm808_vm2, %v1532_v6  ;;  %3325 = vmatmul.msk.bf16.gmra.mxu0 %vm808_vm2, %v1532_v6 }
 0x443   : > { %2093 = vmatmul.bf16.gmra.mxu1 %v5472_v38  ;;  %2182 = vmatmul.bf16.gmra.mxu2 %v5472_v38  ;;  %v1692_v12 = vadd.f32 %v1691_v21, %v5273_v58  ;;  %v3823_v36 = vpop.permute.xlu2 %3822 }
 0x444   : > { %v1782_v41 = vpop.f32.mrf.mxu0  ;;  %v3825_v11 = vunpack.i.h.bf16 %v3823_v36 }
 0x445   : > { %v1783_v54 = vadd.f32 %v1782_v41, %v5275_v26  ;;  %v1851_v39 = vmax.f32 %v1692_v12, 0.0 }
 0x446   : > { %v1518_v34 = vmax.f32 %v1358_v2, %v3825_v11 }
 0x447   : > { %v1854_v59 = vmax.f32 %v1783_v54, 0.0  ;;  %v1897_v4 = vmax.f32 %v1851_v39, %v1852_v46 }
 0x44a   : > { %v1693_v13 = vpop.f32.mrf.mxu3 }
 0x44b   : > { %v1694_v15 = vadd.f32 %v1693_v13, %v5273_v58  ;;  %v3818_v3 = vpop.permute.xlu1 %3817 }
 0x44c   : > { %v3820_v47 = vunpack.i.h.bf16 %v3818_v3  ;;  %v3819_v9 = vunpack.i.l.bf16 %v3818_v3  ;;  %v1785_v33 = vpop.f32.mrf.mxu0 }
 0x44d   : > { %v1853_v30 = vmax.f32 %v1694_v15, 0.0  ;;  %v1786_v49 = vadd.f32 %v1785_v33, %v5275_v26  ;;  %v5517_v15 = vpop.f32.mrf.mxu1 }
 0x44e   : > { %v1516_v45 = vmax.f32 %v1356_v61, %v3820_v47  ;;  %v1515_v52 = vmax.f32 %v1355_v62, %v3819_v9  ;;  %v3824_v62 = vunpack.i.l.bf16 %v3823_v36  ;;  %v5521_v9 = vpop.f32.mrf.mxu2 }
 0x44f   : > { %v1898_v29 = vmax.f32 %v1853_v30, %v1854_v59  ;;  %v1856_v53 = vmax.f32 %v1786_v49, 0.0 }
 0x450   : > { %v1533_v1 = vpack.c.bf16 %v1516_v45, %v1515_v52  ;;  %v1517_v16 = vmax.f32 %v1357_v23, %v3824_v62 }
 0x451   : > { %v5486_v63 = vpack.c.bf16 %v1898_v29, %v1897_v4 }
 0x452   : > { %v1696_v8 = vpop.f32.mrf.mxu3  ;;  %3310 = vmatmul.msk.bf16.gmra.mxu3 %vm808_vm2, %v1533_v1  ;;  %3326 = vmatmul.msk.bf16.gmra.mxu0 %vm808_vm2, %v1533_v1  ;;  %v1534_v20 = vpack.c.bf16 %v1518_v34, %v1517_v16 }
 0x453   : > { %2098 = vmatmul.bf16.gmra.mxu1 %v5486_v63  ;;  %2187 = vmatmul.bf16.gmra.mxu2 %v5486_v63  ;;  %v1697_v61 = vadd.f32 %v1696_v8, %v5273_v58 }
 0x454   : > { %v1787_v31 = vpop.f32.mrf.mxu0 }
 0x455   : > { %v1788_v55 = vadd.f32 %v1787_v31, %v5275_v26  ;;  %v1855_v5 = vmax.f32 %v1697_v61, 0.0  ;;  %v5528_v1 = vpop.f32.mrf.mxu1 }
 0x456   : > { %v5531_v8 = vpop.f32.mrf.mxu2 }
 0x457   : > { %v1858_v22 = vmax.f32 %v1788_v55, 0.0  ;;  %v1899_v43 = vmax.f32 %v1855_v5, %v1856_v53 }
 0x45a   : > { %v1698_v18 = vpop.f32.mrf.mxu3 }
 0x45b   : > { %v1699_v14 = vadd.f32 %v1698_v18, %v5273_v58 }
 0x45c   : > { %v1790_v37 = vpop.f32.mrf.mxu0 }
 0x45d   : > { %v1857_v17 = vmax.f32 %v1699_v14, 0.0  ;;  %v1791_v23 = vadd.f32 %v1790_v37, %v5275_v26  ;;  %v5542_v31 = vpop.f32.mrf.mxu1 }
 0x45e   : > { %v5544_v36 = vpop.f32.mrf.mxu2 }
 0x45f   : > { %v1900_v56 = vmax.f32 %v1857_v17, %v1858_v22  ;;  %v1860_v0 = vmax.f32 %v1791_v23, 0.0 }
 0x461   : > { %v5500_v32 = vpack.c.bf16 %v1900_v56, %v1899_v43 }
 0x462   : > { %v1701_v48 = vpop.f32.mrf.mxu3  ;;  %3311 = vmatmul.msk.bf16.gmra.mxu3 %vm808_vm2, %v1534_v20  ;;  %3327 = vmatmul.msk.bf16.gmra.mxu0 %vm808_vm2, %v1534_v20 }
 0x463   : > { %2103 = vmatmul.bf16.gmra.mxu1 %v5500_v32  ;;  %2192 = vmatmul.bf16.gmra.mxu2 %v5500_v32  ;;  %v1702_v51 = vadd.f32 %v1701_v48, %v5273_v58 }
 0x464   : > { %v1792_v42 = vpop.f32.mrf.mxu0 }
 0x465   : > { %v1793_v2 = vadd.f32 %v1792_v42, %v5275_v26  ;;  %v1859_v57 = vmax.f32 %v1702_v51, 0.0  ;;  %v5549_v55 = vpop.f32.mrf.mxu1 }
 0x467   : > { %v1862_v6 = vmax.f32 %v1793_v2, 0.0  ;;  %v1901_v41 = vmax.f32 %v1859_v57, %v1860_v0 }
 0x46a   : > { %v1703_v60 = vpop.f32.mrf.mxu3 }
 0x46b   : > { %v1704_v40 = vadd.f32 %v1703_v60, %v5273_v58 }
 0x46c   : > { %v1795_v19 = vpop.f32.mrf.mxu0 }
 0x46d   : > { %v1861_v21 = vmax.f32 %v1704_v40, 0.0  ;;  %v1796_v3 = vadd.f32 %v1795_v19, %v5275_v26  ;;  %v5560_v56 = vpop.f32.mrf.mxu1 }
 0x46f   : > { %v1902_v12 = vmax.f32 %v1861_v21, %v1862_v6 }
 0x471   : > { %v5510_v10 = vpack.c.bf16 %v1902_v12, %v1901_v41 }
 0x472   : > { %v1706_v54 = vpop.f32.mrf.mxu3  ;;  %2381 = vmatmul.bf16.vlgmr.msra.gmra.mxu3 %v5302_v35  ;;  %2470 = vmatmul.bf16.vlgmr.msra.gmra.mxu0 %v5302_v35  ;;  %v1864_v35 = vmax.f32 %v1796_v3, 0.0  ;;  %v2287_v3 = vld [vmem:[%s5957_s6 + $0x7] sm:$0x3] }
 0x473   : > { %2108 = vmatmul.bf16.gmra.mxu1 %v5510_v10  ;;  %2197 = vmatmul.bf16.gmra.mxu2 %v5510_v10  ;;  %v1707_v39 = vadd.f32 %v1706_v54, %v5273_v58 }
 0x474   : > { %v1797_v13 = vpop.f32.mrf.mxu0 }
 0x475   : > { %v1798_v47 = vadd.f32 %v1797_v13, %v5275_v26  ;;  %v1863_v46 = vmax.f32 %v1707_v39, 0.0  ;;  %v5568_v0 = vpop.f32.mrf.mxu1 }
 0x477   : > { %v1866_v30 = vmax.f32 %v1798_v47, 0.0  ;;  %v1903_v52 = vmax.f32 %v1863_v46, %v1864_v35  ;;  %v1959_v47 = vld [vmem:[%s5957_s6 + $0x5] sm:$0x3] }
 0x47a   : > { %v1708_v33 = vpop.f32.mrf.mxu3 }
 0x47b   : > { %v1709_v59 = vadd.f32 %v1708_v33, %v5273_v58 }
 0x47d   : > { %v1865_v45 = vmax.f32 %v1709_v59, 0.0  ;;  %v5585_v33 = vpop.f32.mrf.mxu1 }
 0x47f   : > { %v1904_v4 = vmax.f32 %v1865_v45, %v1866_v30 }
 0x481   : > { %v5524_v29 = vpack.c.bf16 %v1904_v4, %v1903_v52  ;;  %v5592_v52 = vperm.slane %v2287_v3, 1  ;;  %v5594_v4 = vperm.slane %v1959_v47, 0 }
 0x482   : > { %2386 = vmatmul.bf16.gmra.mxu3 %v5329_v50  ;;  %2475 = vmatmul.bf16.gmra.mxu0 %v5329_v50 }
 0x483   : > { %2113 = vmatmul.bf16.gmra.mxu1 %v5524_v29  ;;  %2202 = vmatmul.bf16.gmra.mxu2 %v5524_v29 }
 0x492   : > { %2391 = vmatmul.bf16.gmra.mxu3 %v5368_v24  ;;  %2480 = vmatmul.bf16.gmra.mxu0 %v5368_v24 }
 0x4a2   : > { %2396 = vmatmul.bf16.gmra.mxu3 %v5392_v44  ;;  %2485 = vmatmul.bf16.gmra.mxu0 %v5392_v44 }
 0x4b2   : > { %2401 = vmatmul.bf16.gmra.mxu3 %v5412_v7  ;;  %2490 = vmatmul.bf16.gmra.mxu0 %v5412_v7  ;;  %v5551_v7 = vpop.f32.mrf.mxu2 }
 0x4ba   : > { %v5562_v20 = vpop.f32.mrf.mxu2 }
 0x4bf   : > { %v1800_v50 = vpop.f32.mrf.mxu0 }
 0x4c0   : > { %v1801_v62 = vadd.f32 %v1800_v50, %v5275_v26 }
 0x4c2   : > { %2406 = vmatmul.bf16.gmra.mxu3 %v5420_v27  ;;  %2495 = vmatmul.bf16.gmra.mxu0 %v5420_v27  ;;  %v1868_v14 = vmax.f32 %v1801_v62, 0.0  ;;  %v5570_v6 = vpop.f32.mrf.mxu2 }
 0x4c5   : > { %v1711_v61 = vpop.f32.mrf.mxu3 }
 0x4c6   : > { %v1712_v24 = vadd.f32 %v1711_v61, %v5273_v58  ;;  %v5596_v61 = vperm.slane %v1959_v47, 1 }
 0x4c7   : > { %v1802_v11 = vpop.f32.mrf.mxu0 }
 0x4c8   : > { %v1803_v44 = vadd.f32 %v1802_v11, %v5275_v26  ;;  %v1867_v18 = vmax.f32 %v1712_v24, 0.0 }
 0x4ca   : > { %v1870_v34 = vmax.f32 %v1803_v44, 0.0  ;;  %v1905_v37 = vmax.f32 %v1867_v18, %v1868_v14 }
 0x4cd   : > { %v1713_v49 = vpop.f32.mrf.mxu3 }
 0x4ce   : > { %v1714_v27 = vadd.f32 %v1713_v49, %v5273_v58 }
 0x4cf   : > { %v1805_v5 = vpop.f32.mrf.mxu0 }
 0x4d0   : > { %v1869_v16 = vmax.f32 %v1714_v27, 0.0  ;;  %v1806_v42 = vadd.f32 %v1805_v5, %v5275_v26  ;;  %v2144_v27 = vadd.f32 %v5521_v9, %v5596_v61 }
 0x4d2   : > { %v1906_v53 = vmax.f32 %v1869_v16, %v1870_v34  ;;  %2411 = vmatmul.bf16.gmra.mxu3 %v5440_v28  ;;  %2500 = vmatmul.bf16.gmra.mxu0 %v5440_v28  ;;  %v1872_v57 = vmax.f32 %v1806_v42, 0.0  ;;  %v5609_v34 = vpop.f32.mrf.mxu1 }
 0x4d4   : > { %v5556_v22 = vpack.c.bf16 %v1906_v53, %v1905_v37 }
 0x4d5   : > { %v1716_v17 = vpop.f32.mrf.mxu3 }
 0x4d6   : > { %2118 = vmatmul.bf16.gmra.mxu1 %v5556_v22  ;;  %2207 = vmatmul.bf16.gmra.mxu2 %v5556_v22  ;;  %v1717_v48 = vadd.f32 %v1716_v17, %v5273_v58 }
 0x4d7   : > { %v1807_v43 = vpop.f32.mrf.mxu0 }
 0x4d8   : > { %v1808_v51 = vadd.f32 %v1807_v43, %v5275_v26  ;;  %v1871_v28 = vmax.f32 %v1717_v48, 0.0 }
 0x4da   : > { %v1874_v40 = vmax.f32 %v1808_v51, 0.0  ;;  %v1907_v21 = vmax.f32 %v1871_v28, %v1872_v57  ;;  %v2057_v51 = vadd.f32 %v5528_v1, %v5594_v4  ;;  %v2060_v1 = vadd.f32 %v5542_v31, %v5594_v4 }
 0x4dd   : > { %v1718_v23 = vpop.f32.mrf.mxu3 }
 0x4de   : > { %v1719_v2 = vadd.f32 %v1718_v23, %v5273_v58  ;;  %v2146_v23 = vadd.f32 %v5531_v8, %v5596_v61  ;;  %v2149_v8 = vadd.f32 %v5544_v36, %v5596_v61  ;;  %v2062_v36 = vadd.f32 %v5549_v55, %v5594_v4 }
 0x4df   : > { %v1810_v60 = vpop.f32.mrf.mxu0 }
 0x4e0   : > { %v1873_v19 = vmax.f32 %v1719_v2, 0.0  ;;  %v1811_v46 = vadd.f32 %v1810_v60, %v5275_v26 }
 0x4e2   : > { %v1908_v41 = vmax.f32 %v1873_v19, %v1874_v40  ;;  %2416 = vmatmul.bf16.gmra.mxu3 %v5448_v25  ;;  %2505 = vmatmul.bf16.gmra.mxu0 %v5448_v25  ;;  %v5587_v25 = vpop.f32.mrf.mxu2  ;;  %v1876_v11 = vmax.f32 %v1811_v46, 0.0  ;;  %v2225_v19 = vmax.f32 %v2057_v51, 0.0 }
 0x4e4   : > { %v5574_v12 = vpack.c.bf16 %v1908_v41, %v1907_v21  ;;  %v2226_v21 = vmax.f32 %v2146_v23, 0.0 }
 0x4e5   : > { %v1721_v54 = vpop.f32.mrf.mxu3 }
 0x4e6   : > { %2123 = vmatmul.bf16.gmra.mxu1 %v5574_v12  ;;  %2212 = vmatmul.bf16.gmra.mxu2 %v5574_v12  ;;  %v1722_v39 = vadd.f32 %v1721_v54, %v5273_v58 }
 0x4e7   : > { %v1812_v13 = vpop.f32.mrf.mxu0 }
 0x4e8   : > { %v1813_v59 = vadd.f32 %v1812_v13, %v5275_v26  ;;  %v1875_v30 = vmax.f32 %v1722_v39, 0.0  ;;  %v5601_v26 = vperm.slane %v2287_v3, 0  ;;  %v5629_v3 = vpop.f32.mrf.mxu1 }
 0x4ea   : > { %v1878_v24 = vmax.f32 %v1813_v59, 0.0  ;;  %v1909_v44 = vmax.f32 %v1875_v30, %v1876_v11  ;;  %v5611_v16 = vpop.f32.mrf.mxu2  ;;  %v2228_v11 = vmax.f32 %v2149_v8, 0.0 }
 0x4ed   : > { %v1723_v35 = vpop.f32.mrf.mxu3 }
 0x4ee   : > { %v1724_v45 = vadd.f32 %v1723_v35, %v5273_v58  ;;  %v2055_v58 = vadd.f32 %v5517_v15, %v5594_v4  ;;  %v2224_v15 = vmax.f32 %v2144_v27, 0.0 }
 0x4ef   : > { %v2471_v50 = vpop.f32.mrf.mxu0 }
 0x4f0   : > { %v1877_v62 = vmax.f32 %v1724_v45, 0.0  ;;  %v2472_v18 = vadd.f32 %v2471_v50, %v5592_v52  ;;  %v2223_v17 = vmax.f32 %v2055_v58, 0.0  ;;  %v2227_v50 = vmax.f32 %v2060_v1, 0.0  ;;  %v5639_v58 = vpop.f32.mrf.mxu1 }
 0x4f2   : > { %v1910_v49 = vmax.f32 %v1877_v62, %v1878_v24  ;;  %2421 = vmatmul.bf16.gmra.mxu3 %v5472_v38  ;;  %2510 = vmatmul.bf16.gmra.mxu0 %v5472_v38  ;;  %v2552_v37 = vmax.f32 %v2472_v18, 0.0  ;;  %v5631_v46 = vpop.f32.mrf.mxu2 }
 0x4f4   : > { %v5607_v5 = vpack.c.bf16 %v1910_v49, %v1909_v44  ;;  %v2616_v48 = vmax.f32 %v2224_v15, %v2552_v37  ;;  %v2151_v44 = vadd.f32 %v5551_v7, %v5596_v61  ;;  %v2065_v7 = vadd.f32 %v5560_v56, %v5594_v4 }
 0x4f5   : > { %v2382_v14 = vpop.f32.mrf.mxu3 }
 0x4f6   : > { %v2383_v53 = vadd.f32 %v2382_v14, %v5601_v26  ;;  %2128 = vmatmul.bf16.gmra.mxu1 %v5607_v5  ;;  %2217 = vmatmul.bf16.gmra.mxu2 %v5607_v5 }
 0x4f7   : > { %v2473_v38 = vpop.f32.mrf.mxu0 }
 0x4f8   : > { %v2551_v43 = vmax.f32 %v2383_v53, 0.0  ;;  %v2474_v42 = vadd.f32 %v2473_v38, %v5592_v52  ;;  %v2229_v38 = vmax.f32 %v2062_v36, 0.0 }
 0x4fa   : > { %v2615_v9 = vmax.f32 %v2223_v17, %v2551_v43  ;;  %v2554_v60 = vmax.f32 %v2474_v42, 0.0  ;;  %v5642_v37 = vpop.f32.mrf.mxu2  ;;  %v2230_v17 = vmax.f32 %v2151_v44, 0.0 }
 0x4fc   : > { %v3826_v28 = vpack.i.bf16 %v2616_v48, %v2615_v9  ;;  %v2618_v54 = vmax.f32 %v2226_v21, %v2554_v60  ;;  %v2154_v9 = vadd.f32 %v5562_v20, %v5596_v61  ;;  %v2231_v60 = vmax.f32 %v2065_v7, 0.0 }
 0x4fd   : > { %v2384_v2 = vpop.f32.mrf.mxu3  ;;  %v2067_v20 = vadd.f32 %v5568_v0, %v5594_v4 }
 0x4fe   : > { %v2385_v57 = vadd.f32 %v2384_v2, %v5601_v26  ;;  %3827 = vxpose.xlu0.b32.start [1/16] %v3826_v28, 128 }
 0x4ff   : > { %v2476_v40 = vpop.f32.mrf.mxu0 }
 0x500   : > { %v2553_v41 = vmax.f32 %v2385_v57, 0.0  ;;  %v2477_v39 = vadd.f32 %v2476_v40, %v5592_v52  ;;  %v2232_v57 = vmax.f32 %v2154_v9, 0.0  ;;  %v5652_v40 = vpop.f32.mrf.mxu1 }
 0x502   : > { %v2617_v13 = vmax.f32 %v2225_v19, %v2553_v41  ;;  %2426 = vmatmul.bf16.gmra.mxu3 %v5486_v63  ;;  %2515 = vmatmul.bf16.gmra.mxu0 %v5486_v63  ;;  %v2556_v35 = vmax.f32 %v2477_v39, 0.0  ;;  %v5654_v21 = vpop.f32.mrf.mxu2 }
 0x504   : > { %v3828_v47 = vpack.i.bf16 %v2618_v54, %v2617_v13  ;;  %v2620_v24 = vmax.f32 %v2228_v11, %v2556_v35  ;;  %v2156_v54 = vadd.f32 %v5570_v6, %v5596_v61  ;;  %v2070_v6 = vadd.f32 %v5585_v33, %v5594_v4 }
 0x505   : > { %v2387_v59 = vpop.f32.mrf.mxu3  ;;  %v2072_v33 = vadd.f32 %v5609_v34, %v5594_v4 }
 0x506   : > { %v2388_v30 = vadd.f32 %v2387_v59, %v5601_v26  ;;  %3829 = vxpose.xlu0.b32.cont [2/16] %v3828_v47, 128  ;;  %v2233_v59 = vmax.f32 %v2067_v20, 0.0  ;;  %v2234_v35 = vmax.f32 %v2156_v54, 0.0 }
 0x507   : > { %v2478_v45 = vpop.f32.mrf.mxu0 }
 0x508   : > { %v2555_v63 = vmax.f32 %v2388_v30, 0.0  ;;  %v2479_v31 = vadd.f32 %v2478_v45, %v5592_v52  ;;  %v5662_v45 = vpop.f32.mrf.mxu1 }
 0x50a   : > { %v2619_v62 = vmax.f32 %v2227_v50, %v2555_v63  ;;  %v2558_v27 = vmax.f32 %v2479_v31, 0.0  ;;  %v5667_v0 = vpop.f32.mrf.mxu2 }
 0x50c   : > { %v3830_v49 = vpack.i.bf16 %v2620_v24, %v2619_v62  ;;  %v2622_v43 = vmax.f32 %v2230_v17, %v2558_v27  ;;  %v2159_v24 = vadd.f32 %v5587_v25, %v5596_v61  ;;  %v2161_v25 = vadd.f32 %v5611_v16, %v5596_v61 }
 0x50d   : > { %v2389_v18 = vpop.f32.mrf.mxu3  ;;  %v2075_v16 = vadd.f32 %v5629_v3, %v5594_v4 }
 0x50e   : > { %v2390_v14 = vadd.f32 %v2389_v18, %v5601_v26  ;;  %3831 = vxpose.xlu0.b32.cont [3/16] %v3830_v49, 128  ;;  %v2235_v18 = vmax.f32 %v2070_v6, 0.0  ;;  %v2236_v27 = vmax.f32 %v2159_v24, 0.0 }
 0x50f   : > { %v2481_v53 = vpop.f32.mrf.mxu0 }
 0x510   : > { %v2557_v15 = vmax.f32 %v2390_v14, 0.0  ;;  %v2482_v55 = vadd.f32 %v2481_v53, %v5592_v52  ;;  %v5679_v17 = vpop.f32.mrf.mxu1 }
 0x512   : > { %v2621_v48 = vmax.f32 %v2229_v38, %v2557_v15  ;;  %2431 = vmatmul.bf16.gmra.mxu3 %v5500_v32  ;;  %2520 = vmatmul.bf16.gmra.mxu0 %v5500_v32  ;;  %v2560_v23 = vmax.f32 %v2482_v55, 0.0 }
 0x514   : > { %v3832_v42 = vpack.i.bf16 %v2622_v43, %v2621_v48  ;;  %v2624_v32 = vmax.f32 %v2232_v57, %v2560_v23  ;;  %v5681_v43 = vpop.f32.mrf.mxu2 }
 0x515   : > { %v2392_v51 = vpop.f32.mrf.mxu3 }
 0x516   : > { %v2393_v28 = vadd.f32 %v2392_v51, %v5601_v26  ;;  %3833 = vxpose.xlu0.b32.cont [4/16] %v3832_v42, 128  ;;  %v2237_v42 = vmax.f32 %v2072_v33, 0.0  ;;  %v2238_v51 = vmax.f32 %v2161_v25, 0.0 }
 0x517   : > { %v2483_v2 = vpop.f32.mrf.mxu0 }
 0x518   : > { %v2559_v19 = vmax.f32 %v2393_v28, 0.0  ;;  %v2484_v56 = vadd.f32 %v2483_v2, %v5592_v52 }
 0x51a   : > { %v2623_v41 = vmax.f32 %v2231_v60, %v2559_v19  ;;  %v2562_v1 = vmax.f32 %v2484_v56, 0.0  ;;  %v2164_v60 = vadd.f32 %v5631_v46, %v5596_v61  ;;  %v2077_v46 = vadd.f32 %v5639_v58, %v5594_v4 }
 0x51c   : > { %v3834_v13 = vpack.i.bf16 %v2624_v32, %v2623_v41  ;;  %v2626_v50 = vmax.f32 %v2234_v35, %v2562_v1  ;;  %v5691_v32 = vpop.f32.mrf.mxu1  ;;  %v5694_v20 = vpop.f32.mrf.mxu2 }
 0x51d   : > { %v2394_v39 = vpop.f32.mrf.mxu3 }
 0x51e   : > { %v2395_v8 = vadd.f32 %v2394_v39, %v5601_v26  ;;  %3835 = vxpose.xlu0.b32.cont [5/16] %v3834_v13, 128  ;;  %v2239_v13 = vmax.f32 %v2075_v16, 0.0  ;;  %v2240_v39 = vmax.f32 %v2164_v60, 0.0 }
 0x51f   : > { %v2486_v47 = vpop.f32.mrf.mxu0 }
 0x520   : > { %v2561_v30 = vmax.f32 %v2395_v8, 0.0  ;;  %v2487_v63 = vadd.f32 %v2486_v47, %v5592_v52  ;;  %v2166_v47 = vadd.f32 %v5642_v37, %v5596_v61  ;;  %v2080_v37 = vadd.f32 %v5652_v40, %v5594_v4 }
 0x522   : > { %v2625_v11 = vmax.f32 %v2233_v59, %v2561_v30  ;;  %2436 = vmatmul.bf16.gmra.mxu3 %v5510_v10  ;;  %2525 = vmatmul.bf16.gmra.mxu0 %v5510_v10  ;;  %v2564_v36 = vmax.f32 %v2487_v63, 0.0  ;;  %v2241_v63 = vmax.f32 %v2077_v46, 0.0  ;;  %v2242_v6 = vmax.f32 %v2166_v47, 0.0 }
 0x524   : > { %v3836_v62 = vpack.i.bf16 %v2626_v50, %v2625_v11  ;;  %v2628_v53 = vmax.f32 %v2236_v27, %v2564_v36  ;;  %v5702_v24 = vpop.f32.mrf.mxu1 }
 0x525   : > { %v2397_v31 = vpop.f32.mrf.mxu3 }
 0x526   : > { %v2398_v44 = vadd.f32 %v2397_v31, %v5601_v26  ;;  %3837 = vxpose.xlu0.b32.cont [6/16] %v3836_v62, 128  ;;  %v5704_v31 = vpop.f32.mrf.mxu2 }
 0x527   : > { %v2488_v49 = vpop.f32.mrf.mxu0 }
 0x528   : > { %v2563_v14 = vmax.f32 %v2398_v44, 0.0  ;;  %v2489_v38 = vadd.f32 %v2488_v49, %v5592_v52  ;;  %v2169_v49 = vadd.f32 %v5654_v21, %v5596_v61  ;;  %v2082_v21 = vadd.f32 %v5662_v45, %v5594_v4 }
 0x529   : > { %v2085_v45 = vadd.f32 %v5679_v17, %v5594_v4 }
 0x52a   : > { %v2627_v10 = vmax.f32 %v2235_v18, %v2563_v14  ;;  %v2566_v55 = vmax.f32 %v2489_v38, 0.0  ;;  %v2243_v38 = vmax.f32 %v2080_v37, 0.0  ;;  %v2244_v33 = vmax.f32 %v2169_v49, 0.0 }
 0x52c   : > { %v3838_v15 = vpack.i.bf16 %v2628_v53, %v2627_v10  ;;  %v2630_v28 = vmax.f32 %v2238_v51, %v2566_v55 }
 0x52d   : > { %v2399_v48 = vpop.f32.mrf.mxu3 }
 0x52e   : > { %v2400_v7 = vadd.f32 %v2399_v48, %v5601_v26  ;;  %3839 = vxpose.xlu0.b32.cont [7/16] %v3838_v15, 128  ;;  %v5714_v15 = vpop.f32.mrf.mxu1  ;;  %v5717_v40 = vpop.f32.mrf.mxu2 }
 0x52f   : > { %v2491_v9 = vpop.f32.mrf.mxu0 }
 0x530   : > { %v2565_v23 = vmax.f32 %v2400_v7, 0.0  ;;  %v2492_v34 = vadd.f32 %v2491_v9, %v5592_v52  ;;  %v2171_v7 = vadd.f32 %v5667_v0, %v5596_v61  ;;  %v2174_v0 = vadd.f32 %v5681_v43, %v5596_v61 }
 0x531   : > { %v2087_v43 = vadd.f32 %v5691_v32, %v5594_v4  ;;  %v2090_v32 = vadd.f32 %v5702_v24, %v5594_v4  ;;  %v2092_v24 = vadd.f32 %v5714_v15, %v5594_v4 }
 0x532   : > { %v2629_v2 = vmax.f32 %v2237_v42, %v2565_v23  ;;  %2441 = vmatmul.bf16.gmra.mxu3 %v5524_v29  ;;  %2530 = vmatmul.bf16.gmra.mxu0 %v5524_v29  ;;  %v2568_v41 = vmax.f32 %v2492_v34, 0.0  ;;  %v2246_v34 = vmax.f32 %v2171_v7, 0.0 }
 0x534   : > { %v3840_v57 = vpack.i.bf16 %v2630_v28, %v2629_v2  ;;  %v2632_v1 = vmax.f32 %v2240_v39, %v2568_v41  ;;  %v2245_v2 = vmax.f32 %v2082_v21, 0.0 }
 0x535   : > { %v2402_v19 = vpop.f32.mrf.mxu3 }
 0x536   : > { %v2403_v56 = vadd.f32 %v2402_v19, %v5601_v26  ;;  %3841 = vxpose.xlu0.b32.cont [8/16] %v3840_v57, 128  ;;  %v5731_v41 = vpop.f32.mrf.mxu1 }
 0x537   : > { %v2493_v54 = vpop.f32.mrf.mxu0  ;;  %v2095_v15 = vadd.f32 %v5731_v41, %v5594_v4 }
 0x538   : > { %v2567_v29 = vmax.f32 %v2403_v56, 0.0  ;;  %v2494_v3 = vadd.f32 %v2493_v54, %v5592_v52  ;;  %v5733_v54 = vpop.f32.mrf.mxu2 }
 0x53a   : > { %v2631_v8 = vmax.f32 %v2239_v13, %v2567_v29  ;;  %v2570_v30 = vmax.f32 %v2494_v3, 0.0  ;;  %v2248_v3 = vmax.f32 %v2174_v0, 0.0 }
 0x53c   : > { %v3842_v59 = vpack.i.bf16 %v2632_v1, %v2631_v8  ;;  %v2634_v36 = vmax.f32 %v2242_v6, %v2570_v30  ;;  %v2247_v8 = vmax.f32 %v2085_v45, 0.0 }
 0x53d   : > { %v2404_v35 = vpop.f32.mrf.mxu3 }
 0x53e   : > { %v2405_v50 = vadd.f32 %v2404_v35, %v5601_v26  ;;  %3843 = vxpose.xlu0.b32.cont [9/16] %v3842_v59, 128  ;;  %v2176_v59 = vadd.f32 %v5694_v20, %v5596_v61  ;;  %v2179_v20 = vadd.f32 %v5704_v31, %v5596_v61  ;;  %v2181_v31 = vadd.f32 %v5717_v40, %v5596_v61 }
 0x53f   : > { %v2496_v11 = vpop.f32.mrf.mxu0  ;;  %v2184_v40 = vadd.f32 %v5733_v54, %v5596_v61 }
 0x540   : > { %v2569_v62 = vmax.f32 %v2405_v50, 0.0  ;;  %v2497_v58 = vadd.f32 %v2496_v11, %v5592_v52  ;;  %v2096_v50 = vpop.f32.mrf.mxu1  ;;  %v2185_v6 = vpop.f32.mrf.mxu2 }
 0x541   : > { %v2186_v41 = vadd.f32 %v2185_v6, %v5596_v61 }
 0x542   : > { %v2633_v44 = vmax.f32 %v2241_v63, %v2569_v62  ;;  %2446 = vmatmul.bf16.gmra.mxu3 %v5556_v22  ;;  %2535 = vmatmul.bf16.gmra.mxu0 %v5556_v22  ;;  %v2572_v14 = vmax.f32 %v2497_v58, 0.0 }
 0x544   : > { %v3844_v18 = vpack.i.bf16 %v2634_v36, %v2633_v44  ;;  %v2636_v48 = vmax.f32 %v2244_v33, %v2572_v14  ;;  %v2249_v36 = vmax.f32 %v2087_v43, 0.0  ;;  %v2250_v44 = vmax.f32 %v2176_v59, 0.0 }
 0x545   : > { %v2407_v27 = vpop.f32.mrf.mxu3  ;;  %v2251_v33 = vmax.f32 %v2090_v32, 0.0  ;;  %v2097_v43 = vadd.f32 %v2096_v50, %v5594_v4 }
 0x546   : > { %v2408_v53 = vadd.f32 %v2407_v27, %v5601_v26  ;;  %3845 = vxpose.xlu0.b32.cont [10/16] %v3844_v18, 128 }
 0x547   : > { %v2498_v10 = vpop.f32.mrf.mxu0 }
 0x548   : > { %v2571_v25 = vmax.f32 %v2408_v53, 0.0  ;;  %v2499_v55 = vadd.f32 %v2498_v10, %v5592_v52 }
 0x54a   : > { %v2635_v22 = vmax.f32 %v2243_v38, %v2571_v25  ;;  %v2574_v51 = vmax.f32 %v2499_v55, 0.0  ;;  %v2252_v25 = vmax.f32 %v2179_v20, 0.0  ;;  %v2188_v55 = vpop.f32.mrf.mxu2 }
 0x54b   : > { %v2189_v6 = vadd.f32 %v2188_v55, %v5596_v61 }
 0x54c   : > { %v3846_v9 = vpack.i.bf16 %v2636_v48, %v2635_v22  ;;  %v2638_v60 = vmax.f32 %v2246_v34, %v2574_v51  ;;  %v2099_v48 = vpop.f32.mrf.mxu1  ;;  %v2254_v34 = vmax.f32 %v2181_v31, 0.0 }
 0x54d   : > { %v2409_v42 = vpop.f32.mrf.mxu3  ;;  %v2100_v50 = vadd.f32 %v2099_v48, %v5594_v4 }
 0x54e   : > { %v2410_v23 = vadd.f32 %v2409_v42, %v5601_v26  ;;  %3847 = vxpose.xlu0.b32.cont [11/16] %v3846_v9, 128 }
 0x54f   : > { %v2501_v28 = vpop.f32.mrf.mxu0 }
 0x550   : > { %v2573_v16 = vmax.f32 %v2410_v23, 0.0  ;;  %v2502_v19 = vadd.f32 %v2501_v28, %v5592_v52 }
 0x552   : > { %v2637_v57 = vmax.f32 %v2245_v2, %v2573_v16  ;;  %2451 = vmatmul.bf16.gmra.mxu3 %v5574_v12  ;;  %2540 = vmatmul.bf16.gmra.mxu0 %v5574_v12  ;;  %v2576_v39 = vmax.f32 %v2502_v19, 0.0  ;;  %v2253_v2 = vmax.f32 %v2092_v24, 0.0  ;;  %v2190_v0 = vpop.f32.mrf.mxu2 }
 0x553   : > { %v2191_v55 = vadd.f32 %v2190_v0, %v5596_v61 }
 0x554   : > { %v3848_v56 = vpack.i.bf16 %v2638_v60, %v2637_v57  ;;  %v2640_v46 = vmax.f32 %v2248_v3, %v2576_v39  ;;  %v2101_v60 = vpop.f32.mrf.mxu1  ;;  %v2256_v3 = vmax.f32 %v2184_v40, 0.0 }
 0x555   : > { %v2412_v13 = vpop.f32.mrf.mxu3  ;;  %v2102_v48 = vadd.f32 %v2101_v60, %v5594_v4 }
 0x556   : > { %v2413_v29 = vadd.f32 %v2412_v13, %v5601_v26  ;;  %3849 = vxpose.xlu0.b32.cont [12/16] %v3848_v56, 128 }
 0x557   : > { %v2503_v1 = vpop.f32.mrf.mxu0 }
 0x558   : > { %v2575_v12 = vmax.f32 %v2413_v29, 0.0  ;;  %v2504_v17 = vadd.f32 %v2503_v1, %v5592_v52 }
 0x55a   : > { %v2639_v47 = vmax.f32 %v2247_v8, %v2575_v12  ;;  %v2578_v11 = vmax.f32 %v2504_v17, 0.0  ;;  %v2255_v8 = vmax.f32 %v2095_v15, 0.0 }
 0x55c   : > { %v3850_v35 = vpack.i.bf16 %v2640_v46, %v2639_v47  ;;  %v2642_v37 = vmax.f32 %v2250_v44, %v2578_v11  ;;  %v2104_v59 = vpop.f32.mrf.mxu1  ;;  %v2258_v44 = vmax.f32 %v2186_v41, 0.0 }
 0x55d   : > { %v2414_v30 = vpop.f32.mrf.mxu3  ;;  %v2105_v60 = vadd.f32 %v2104_v59, %v5594_v4 }
 0x55e   : > { %v2415_v63 = vadd.f32 %v2414_v30, %v5601_v26  ;;  %3851 = vxpose.xlu0.b32.cont [13/16] %v3850_v35, 128  ;;  %v2193_v35 = vpop.f32.mrf.mxu2 }
 0x55f   : > { %v2506_v62 = vpop.f32.mrf.mxu0  ;;  %v2194_v0 = vadd.f32 %v2193_v35, %v5596_v61 }
 0x560   : > { %v2577_v58 = vmax.f32 %v2415_v63, 0.0  ;;  %v2507_v18 = vadd.f32 %v2506_v62, %v5592_v52 }
 0x562   : > { %v2641_v49 = vmax.f32 %v2249_v36, %v2577_v58  ;;  %2456 = vmatmul.bf16.gmra.mxu3 %v5607_v5  ;;  %2545 = vmatmul.bf16.gmra.mxu0 %v5607_v5  ;;  %v2580_v53 = vmax.f32 %v2507_v18, 0.0  ;;  %v2257_v36 = vmax.f32 %v2097_v43, 0.0 }
 0x564   : > { %v3852_v27 = vpack.i.bf16 %v2642_v37, %v2641_v49  ;;  %v2644_v21 = vmax.f32 %v2252_v25, %v2580_v53  ;;  %v2260_v25 = vmax.f32 %v2189_v6, 0.0 }
 0x565   : > { %v2417_v14 = vpop.f32.mrf.mxu3 }
 0x566   : > { %v2418_v10 = vadd.f32 %v2417_v14, %v5601_v26  ;;  %3853 = vxpose.xlu0.b32.cont [14/16] %v3852_v27, 128  ;;  %v2106_v27 = vpop.f32.mrf.mxu1 }
 0x567   : > { %v2508_v38 = vpop.f32.mrf.mxu0  ;;  %v2107_v43 = vadd.f32 %v2106_v27, %v5594_v4 }
 0x568   : > { %v2579_v22 = vmax.f32 %v2418_v10, 0.0  ;;  %v2509_v7 = vadd.f32 %v2508_v38, %v5592_v52  ;;  %v2195_v10 = vpop.f32.mrf.mxu2 }
 0x569   : > { %v2196_v41 = vadd.f32 %v2195_v10, %v5596_v61 }
 0x56a   : > { %v2643_v5 = vmax.f32 %v2251_v33, %v2579_v22  ;;  %v2582_v51 = vmax.f32 %v2509_v7, 0.0  ;;  %v2259_v33 = vmax.f32 %v2100_v50, 0.0 }
 0x56c   : > { %v3854_v9 = vpack.i.bf16 %v2644_v21, %v2643_v5  ;;  %v2646_v57 = vmax.f32 %v2254_v34, %v2582_v51 }
 0x56d   : > { %v2419_v42 = vpop.f32.mrf.mxu3 }
 0x56e   : > { %v2420_v23 = vadd.f32 %v2419_v42, %v5601_v26  ;;  %3855 = vxpose.xlu0.b32.cont [15/16] %v3854_v9, 128 }
 0x56f   : > { %v2511_v28 = vpop.f32.mrf.mxu0 }
 0x570   : > { %v2581_v16 = vmax.f32 %v2420_v23, 0.0  ;;  %v2512_v45 = vadd.f32 %v2511_v28, %v5592_v52  ;;  %v2261_v23 = vmax.f32 %v2102_v48, 0.0  ;;  %v2262_v28 = vmax.f32 %v2191_v55, 0.0 }
 0x572   : > { %v2645_v19 = vmax.f32 %v2253_v2, %v2581_v16  ;;  %v2584_v39 = vmax.f32 %v2512_v45, 0.0  ;;  %v2109_v2 = vpop.f32.mrf.mxu1  ;;  %v2198_v16 = vpop.f32.mrf.mxu2 }
 0x574   : > { %v3856_v56 = vpack.i.bf16 %v2646_v57, %v2645_v19  ;;  %v2648_v46 = vmax.f32 %v2256_v3, %v2584_v39 }
 0x575   : > { %v2422_v13 = vpop.f32.mrf.mxu3 }
 0x576   : > { %v2423_v29 = vadd.f32 %v2422_v13, %v5601_v26  ;;  %3857 = vxpose.xlu0.b32.end [16/16] %v3856_v56, 128 }
 0x577   : > { %v2513_v1 = vpop.f32.mrf.mxu0 }
 0x578   : > { %v2583_v12 = vmax.f32 %v2423_v29, 0.0  ;;  %v2514_v17 = vadd.f32 %v2513_v1, %v5592_v52  ;;  %v2263_v29 = vmax.f32 %v2105_v60, 0.0  ;;  %v2264_v1 = vmax.f32 %v2194_v0, 0.0 }
 0x57a   : > { %v2647_v47 = vmax.f32 %v2255_v8, %v2583_v12  ;;  %v2586_v11 = vmax.f32 %v2514_v17, 0.0  ;;  %v2111_v3 = vpop.f32.mrf.mxu1  ;;  %v2200_v17 = vpop.f32.mrf.mxu2 }
 0x57c   : > { %v3938_v54 = vpack.i.bf16 %v2648_v46, %v2647_v47  ;;  %v2650_v37 = vmax.f32 %v2258_v44, %v2586_v11 }
 0x57d   : > { %v2424_v30 = vpop.f32.mrf.mxu3 }
 0x57e   : > { %v2425_v63 = vadd.f32 %v2424_v30, %v5601_v26  ;;  %3939 = vxpose.xlu1.b32.start [1/16] %v3938_v54, 128 }
 0x57f   : > { %v2516_v62 = vpop.f32.mrf.mxu0 }
 0x580   : > { %v2585_v58 = vmax.f32 %v2425_v63, 0.0  ;;  %v2517_v18 = vadd.f32 %v2516_v62, %v5592_v52  ;;  %v2265_v63 = vmax.f32 %v2107_v43, 0.0  ;;  %v2266_v62 = vmax.f32 %v2196_v41, 0.0 }
 0x582   : > { %v2649_v49 = vmax.f32 %v2257_v36, %v2585_v58  ;;  %v2588_v14 = vmax.f32 %v2517_v18, 0.0  ;;  %v2199_v18 = vadd.f32 %v2198_v16, %v5596_v61  ;;  %v2114_v50 = vpop.f32.mrf.mxu1 }
 0x584   : > { %v3940_v32 = vpack.i.bf16 %v2650_v37, %v2649_v49  ;;  %v2652_v21 = vmax.f32 %v2260_v25, %v2588_v14  ;;  %v2110_v49 = vadd.f32 %v2109_v2, %v5594_v4 }
 0x585   : > { %v2427_v20 = vpop.f32.mrf.mxu3 }
 0x586   : > { %v2428_v53 = vadd.f32 %v2427_v20, %v5601_v26  ;;  %3941 = vxpose.xlu1.b32.cont [2/16] %v3940_v32, 128  ;;  %v2203_v32 = vpop.f32.mrf.mxu2  ;;  %v2267_v10 = vmax.f32 %v2110_v49, 0.0 }
 0x587   : > { %v2518_v38 = vpop.f32.mrf.mxu0 }
 0x588   : > { %v2587_v22 = vmax.f32 %v2428_v53, 0.0  ;;  %v2519_v7 = vadd.f32 %v2518_v38, %v5592_v52  ;;  %v2268_v38 = vmax.f32 %v2199_v18, 0.0 }
 0x58a   : > { %v2651_v5 = vmax.f32 %v2259_v33, %v2587_v22  ;;  %v2590_v9 = vmax.f32 %v2519_v7, 0.0  ;;  %v2201_v7 = vadd.f32 %v2200_v17, %v5596_v61 }
 0x58c   : > { %v3942_v24 = vpack.i.bf16 %v2652_v21, %v2651_v5  ;;  %v2654_v57 = vmax.f32 %v2262_v28, %v2590_v9  ;;  %v2112_v5 = vadd.f32 %v2111_v3, %v5594_v4  ;;  %v2270_v28 = vmax.f32 %v2201_v7, 0.0 }
 0x58d   : > { %v2429_v31 = vpop.f32.mrf.mxu3 }
 0x58e   : > { %v2430_v42 = vadd.f32 %v2429_v31, %v5601_v26  ;;  %3943 = vxpose.xlu1.b32.cont [3/16] %v3942_v24, 128  ;;  %v2116_v24 = vpop.f32.mrf.mxu1 }
 0x58f   : > { %v2521_v51 = vpop.f32.mrf.mxu0 }
 0x590   : > { %v2589_v34 = vmax.f32 %v2430_v42, 0.0  ;;  %v2522_v45 = vadd.f32 %v2521_v51, %v5592_v52  ;;  %v2205_v42 = vpop.f32.mrf.mxu2 }
 0x591   : > { %v2206_v17 = vadd.f32 %v2205_v42, %v5596_v61 }
 0x592   : > { %v2653_v19 = vmax.f32 %v2261_v23, %v2589_v34  ;;  %v2592_v56 = vmax.f32 %v2522_v45, 0.0  ;;  %v2269_v23 = vmax.f32 %v2112_v5, 0.0  ;;  %v2204_v45 = vadd.f32 %v2203_v32, %v5596_v61 }
 0x594   : > { %v3944_v15 = vpack.i.bf16 %v2654_v57, %v2653_v19  ;;  %v2656_v12 = vmax.f32 %v2264_v1, %v2592_v56  ;;  %v2115_v19 = vadd.f32 %v2114_v50, %v5594_v4  ;;  %v2272_v1 = vmax.f32 %v2204_v45, 0.0 }
 0x595   : > { %v2432_v40 = vpop.f32.mrf.mxu3 }
 0x596   : > { %v2433_v13 = vadd.f32 %v2432_v40, %v5601_v26  ;;  %3945 = vxpose.xlu1.b32.cont [4/16] %v3944_v15, 128  ;;  %v2119_v15 = vpop.f32.mrf.mxu1 }
 0x597   : > { %v2523_v39 = vpop.f32.mrf.mxu0  ;;  %v2120_v49 = vadd.f32 %v2119_v15, %v5594_v4 }
 0x598   : > { %v2591_v8 = vmax.f32 %v2433_v13, 0.0  ;;  %v2524_v47 = vadd.f32 %v2523_v39, %v5592_v52  ;;  %v2208_v13 = vpop.f32.mrf.mxu2 }
 0x599   : > { %v2209_v18 = vadd.f32 %v2208_v13, %v5596_v61 }
 0x59a   : > { %v2655_v46 = vmax.f32 %v2263_v29, %v2591_v8  ;;  %v2594_v35 = vmax.f32 %v2524_v47, 0.0  ;;  %v2271_v29 = vmax.f32 %v2115_v19, 0.0  ;;  %v2117_v47 = vadd.f32 %v2116_v24, %v5594_v4 }
 0x59c   : > { %v3946_v59 = vpack.i.bf16 %v2656_v12, %v2655_v46  ;;  %v2658_v44 = vmax.f32 %v2266_v62, %v2594_v35 }
 0x59d   : > { %v2434_v54 = vpop.f32.mrf.mxu3 }
 0x59e   : > { %v2435_v30 = vadd.f32 %v2434_v54, %v5601_v26  ;;  %3947 = vxpose.xlu1.b32.cont [5/16] %v3946_v59, 128 }
 0x59f   : > { %v2526_v11 = vpop.f32.mrf.mxu0 }
 0x5a0   : > { %v2593_v36 = vmax.f32 %v2435_v30, 0.0  ;;  %v2527_v37 = vadd.f32 %v2526_v11, %v5592_v52  ;;  %v2273_v30 = vmax.f32 %v2117_v47, 0.0  ;;  %v2274_v11 = vmax.f32 %v2206_v17, 0.0 }
 0x5a2   : > { %v2657_v58 = vmax.f32 %v2265_v63, %v2593_v36  ;;  %v2596_v27 = vmax.f32 %v2527_v37, 0.0  ;;  %v2121_v63 = vpop.f32.mrf.mxu1  ;;  %v2210_v36 = vpop.f32.mrf.mxu2 }
 0x5a3   : > { %v2122_v5 = vadd.f32 %v2121_v63, %v5594_v4  ;;  %v2211_v7 = vadd.f32 %v2210_v36, %v5596_v61 }
 0x5a4   : > { %v3948_v6 = vpack.i.bf16 %v2658_v44, %v2657_v58  ;;  %v2660_v25 = vmax.f32 %v2268_v38, %v2596_v27 }
 0x5a5   : > { %v2437_v20 = vpop.f32.mrf.mxu3  ;;  %v2277_v42 = vmax.f32 %v2122_v5, 0.0 }
 0x5a6   : > { %v2438_v14 = vadd.f32 %v2437_v20, %v5601_v26  ;;  %3949 = vxpose.xlu1.b32.cont [6/16] %v3948_v6, 128 }
 0x5a7   : > { %v2528_v53 = vpop.f32.mrf.mxu0 }
 0x5a8   : > { %v2595_v33 = vmax.f32 %v2438_v14, 0.0  ;;  %v2529_v21 = vadd.f32 %v2528_v53, %v5592_v52  ;;  %v2275_v14 = vmax.f32 %v2120_v49, 0.0  ;;  %v2276_v53 = vmax.f32 %v2209_v18, 0.0 }
 0x5aa   : > { %v2659_v22 = vmax.f32 %v2267_v10, %v2595_v33  ;;  %v2598_v31 = vmax.f32 %v2529_v21, 0.0  ;;  %v2124_v38 = vpop.f32.mrf.mxu1  ;;  %v2213_v21 = vpop.f32.mrf.mxu2 }
 0x5ac   : > { %v3950_v48 = vpack.i.bf16 %v2660_v25, %v2659_v22  ;;  %v2662_v34 = vmax.f32 %v2270_v28, %v2598_v31 }
 0x5ad   : > { %v2439_v55 = vpop.f32.mrf.mxu3 }
 0x5ae   : > { %v2440_v9 = vadd.f32 %v2439_v55, %v5601_v26  ;;  %3951 = vxpose.xlu1.b32.cont [7/16] %v3950_v48, 128 }
 0x5af   : > { %v2531_v51 = vpop.f32.mrf.mxu0 }
 0x5b0   : > { %v2597_v2 = vmax.f32 %v2440_v9, 0.0  ;;  %v2532_v57 = vadd.f32 %v2531_v51, %v5592_v52  ;;  %v2278_v51 = vmax.f32 %v2211_v7, 0.0 }
 0x5b2   : > { %v2661_v16 = vmax.f32 %v2269_v23, %v2597_v2  ;;  %v2600_v40 = vmax.f32 %v2532_v57, 0.0  ;;  %v2214_v57 = vadd.f32 %v2213_v21, %v5596_v61  ;;  %v2126_v19 = vpop.f32.mrf.mxu1 }
 0x5b4   : > { %v3952_v60 = vpack.i.bf16 %v2662_v34, %v2661_v16  ;;  %v2664_v3 = vmax.f32 %v2272_v1, %v2600_v40  ;;  %v2125_v16 = vadd.f32 %v2124_v38, %v5594_v4 }
 0x5b5   : > { %v2442_v0 = vpop.f32.mrf.mxu3 }
 0x5b6   : > { %v2443_v56 = vadd.f32 %v2442_v0, %v5601_v26  ;;  %3953 = vxpose.xlu1.b32.cont [8/16] %v3952_v60, 128  ;;  %v2215_v60 = vpop.f32.mrf.mxu2  ;;  %v2279_v13 = vmax.f32 %v2125_v16, 0.0 }
 0x5b7   : > { %v2533_v39 = vpop.f32.mrf.mxu0 }
 0x5b8   : > { %v2599_v8 = vmax.f32 %v2443_v56, 0.0  ;;  %v2534_v46 = vadd.f32 %v2533_v39, %v5592_v52  ;;  %v2280_v39 = vmax.f32 %v2214_v57, 0.0 }
 0x5ba   : > { %v2663_v12 = vmax.f32 %v2271_v29, %v2599_v8  ;;  %v2602_v59 = vmax.f32 %v2534_v46, 0.0  ;;  %v2216_v46 = vadd.f32 %v2215_v60, %v5596_v61 }
 0x5bc   : > { %v3954_v43 = vpack.i.bf16 %v2664_v3, %v2663_v12  ;;  %v2666_v44 = vmax.f32 %v2274_v11, %v2602_v59  ;;  %v2127_v12 = vadd.f32 %v2126_v19, %v5594_v4  ;;  %v2282_v11 = vmax.f32 %v2216_v46, 0.0 }
 0x5bd   : > { %v2444_v41 = vpop.f32.mrf.mxu3 }
 0x5be   : > { %v2445_v54 = vadd.f32 %v2444_v41, %v5601_v26  ;;  %3955 = vxpose.xlu1.b32.cont [9/16] %v3954_v43, 128  ;;  %v2129_v43 = vpop.f32.mrf.mxu1 }
 0x5bf   : > { %v2536_v35 = vpop.f32.mrf.mxu0 }
 0x5c0   : > { %v2601_v62 = vmax.f32 %v2445_v54, 0.0  ;;  %v2537_v37 = vadd.f32 %v2536_v35, %v5592_v52  ;;  %v2218_v54 = vpop.f32.mrf.mxu2 }
 0x5c2   : > { %v2665_v58 = vmax.f32 %v2273_v30, %v2601_v62  ;;  %v2604_v32 = vmax.f32 %v2537_v37, 0.0  ;;  %v2281_v30 = vmax.f32 %v2127_v12, 0.0  ;;  %v2219_v37 = vadd.f32 %v2218_v54, %v5596_v61 }
 0x5c4   : > { %v3956_v50 = vpack.i.bf16 %v2666_v44, %v2665_v58  ;;  %v2668_v33 = vmax.f32 %v2276_v53, %v2604_v32  ;;  %v2130_v58 = vadd.f32 %v2129_v43, %v5594_v4 }
 0x5c5   : > { %v2447_v6 = vpop.f32.mrf.mxu3 }
 0x5c6   : > { %v2448_v20 = vadd.f32 %v2447_v6, %v5601_v26  ;;  %3957 = vxpose.xlu1.b32.cont [10/16] %v3956_v50, 128  ;;  %v2131_v53 = vpop.f32.mrf.mxu1 }
 0x5c7   : > { %v2538_v27 = vpop.f32.mrf.mxu0 }
 0x5c8   : > { %v2603_v10 = vmax.f32 %v2448_v20, 0.0  ;;  %v2539_v22 = vadd.f32 %v2538_v27, %v5592_v52  ;;  %v2283_v20 = vmax.f32 %v2130_v58, 0.0  ;;  %v2284_v27 = vmax.f32 %v2219_v37, 0.0 }
 0x5ca   : > { %v2667_v25 = vmax.f32 %v2275_v14, %v2603_v10  ;;  %v2606_v24 = vmax.f32 %v2539_v22, 0.0  ;;  %v2220_v10 = vpop.f32.mrf.mxu2  ;;  %v2132_v22 = vadd.f32 %v2131_v53, %v5594_v4 }
 0x5cb   : > { %v2221_v21 = vadd.f32 %v2220_v10, %v5596_v61 }
 0x5cc   : > { %v3958_v48 = vpack.i.bf16 %v2668_v33, %v2667_v25  ;;  %v2670_v28 = vmax.f32 %v2278_v51, %v2606_v24  ;;  %v2285_v24 = vmax.f32 %v2132_v22, 0.0 }
 0x5cd   : > { %v2449_v55 = vpop.f32.mrf.mxu3 }
 0x5ce   : > { %v2450_v31 = vadd.f32 %v2449_v55, %v5601_v26  ;;  %3959 = vxpose.xlu1.b32.cont [11/16] %v3958_v48, 128 }
 0x5cf   : > { %v2541_v9 = vpop.f32.mrf.mxu0 }
 0x5d0   : > { %v2605_v23 = vmax.f32 %v2450_v31, 0.0  ;;  %v2542_v34 = vadd.f32 %v2541_v9, %v5592_v52  ;;  %v2286_v31 = vmax.f32 %v2221_v21, 0.0 }
 0x5d2   : > { %v2669_v2 = vmax.f32 %v2277_v42, %v2605_v23  ;;  %v2608_v15 = vmax.f32 %v2542_v34, 0.0 }
 0x5d4   : > { %v3960_v45 = vpack.i.bf16 %v2670_v28, %v2669_v2  ;;  %v2672_v1 = vmax.f32 %v2280_v39, %v2608_v15  ;;  %v3858_v28 = vpop.trf.xlu0 }
 0x5d5   : > { %v2452_v0 = vpop.f32.mrf.mxu3  ;;  %v3862_v61 = vunpack.i.h.bf16 %v3858_v28  ;;  %v3859_v34 = vunpack.i.l.bf16 %v3858_v28 }
 0x5d6   : > { %v2453_v40 = vadd.f32 %v2452_v0, %v5601_v26  ;;  %3961 = vxpose.xlu1.b32.cont [12/16] %v3960_v45, 128 }
 0x5d7   : > { %v2543_v56 = vpop.f32.mrf.mxu0 }
 0x5d8   : > { %v2607_v29 = vmax.f32 %v2453_v40, 0.0  ;;  %v2544_v3 = vadd.f32 %v2543_v56, %v5592_v52 }
 0x5da   : > { %v2671_v8 = vmax.f32 %v2279_v13, %v2607_v29  ;;  %v2610_v41 = vmax.f32 %v2544_v3, 0.0 }
 0x5dc   : > { %v3962_v47 = vpack.i.bf16 %v2672_v1, %v2671_v8  ;;  %v2674_v62 = vmax.f32 %v2282_v11, %v2610_v41 }
 0x5dd   : > { %v2454_v17 = vpop.f32.mrf.mxu3 }
 0x5de   : > { %v2455_v59 = vadd.f32 %v2454_v17, %v5601_v26  ;;  %3963 = vxpose.xlu1.b32.cont [13/16] %v3962_v47, 128 }
 0x5df   : > { %v2546_v35 = vpop.f32.mrf.mxu0 }
 0x5e0   : > { %v2609_v63 = vmax.f32 %v2455_v59, 0.0  ;;  %v2547_v44 = vadd.f32 %v2546_v35, %v5592_v52 }
 0x5e2   : > { %v2673_v36 = vmax.f32 %v2281_v30, %v2609_v63  ;;  %v2612_v50 = vmax.f32 %v2547_v44, 0.0 }
 0x5e4   : > { %v3964_v49 = vpack.i.bf16 %v2674_v62, %v2673_v36  ;;  %v2676_v38 = vmax.f32 %v2284_v27, %v2612_v50 }
 0x5e5   : > { %v2457_v18 = vpop.f32.mrf.mxu3 }
 0x5e6   : > { %v2458_v6 = vadd.f32 %v2457_v18, %v5601_v26  ;;  %3965 = vxpose.xlu1.b32.cont [14/16] %v3964_v49, 128 }
 0x5e7   : > { %v2548_v32 = vpop.f32.mrf.mxu0 }
 0x5e8   : > { %v2611_v14 = vmax.f32 %v2458_v6, 0.0  ;;  %v2549_v25 = vadd.f32 %v2548_v32, %v5592_v52  ;;  %v3863_v52 = vpop.trf.xlu0 }
 0x5e9   : > { %v3867_v0 = vunpack.i.h.bf16 %v3863_v52  ;;  %v3864_v15 = vunpack.i.l.bf16 %v3863_v52 }
 0x5ea   : > { %v2675_v33 = vmax.f32 %v2283_v20, %v2611_v14  ;;  %v2614_v48 = vmax.f32 %v2549_v25, 0.0 }
 0x5ec   : > { %v3966_v5 = vpack.i.bf16 %v2676_v38, %v2675_v33  ;;  %v2678_v42 = vmax.f32 %v2286_v31, %v2614_v48 }
 0x5ed   : > { %v2459_v7 = vpop.f32.mrf.mxu3 }
 0x5ee   : > { %v2460_v55 = vadd.f32 %v2459_v7, %v5601_v26  ;;  %3967 = vxpose.xlu1.b32.cont [15/16] %v3966_v5, 128 }
 0x5f0   : > { %v2613_v9 = vmax.f32 %v2460_v55, 0.0  ;;  %v3868_v2 = vpop.trf.xlu0 }
 0x5f1   : > { %v3872_v8 = vunpack.i.h.bf16 %v3868_v2  ;;  %v3869_v3 = vunpack.i.l.bf16 %v3868_v2 }
 0x5f2   : > { %v2677_v51 = vmax.f32 %v2285_v24, %v2613_v9 }
 0x5f4   : > { %v3968_v23 = vpack.i.bf16 %v2678_v42, %v2677_v51 }
 0x5f6   : > { %3969 = vxpose.xlu1.b32.end [16/16] %v3968_v23, 128 }
 0x5f8   : > { %v3873_v4 = vpop.trf.xlu0 }
 0x5f9   : > { %v3877_v59 = vunpack.i.h.bf16 %v3873_v4  ;;  %v3874_v54 = vunpack.i.l.bf16 %v3873_v4 }
 0x600   : > { %v3878_v26 = vpop.trf.xlu0 }
 0x601   : > { %v3882_v44 = vunpack.i.h.bf16 %v3878_v26  ;;  %v3879_v58 = vunpack.i.l.bf16 %v3878_v26 }
 0x608   : > { %v3883_v39 = vpop.trf.xlu0 }
 0x609   : > { %v3887_v20 = vunpack.i.h.bf16 %v3883_v39  ;;  %v3884_v27 = vunpack.i.l.bf16 %v3883_v39 }
 0x610   : > { %v3888_v17 = vpop.trf.xlu0 }
 0x611   : > { %v3892_v22 = vunpack.i.h.bf16 %v3888_v17  ;;  %v3889_v21 = vunpack.i.l.bf16 %v3888_v17 }
 0x618   : > { %v3893_v63 = vpop.trf.xlu0 }
 0x619   : > { %v3897_v9 = vunpack.i.h.bf16 %v3893_v63  ;;  %v3894_v42 = vunpack.i.l.bf16 %v3893_v63 }
 0x620   : > { %v3898_v50 = vpop.trf.xlu0 }
 0x622   : > { %v3970_v16 = vpop.trf.xlu1 }
 0x623   : > { %v3974_v57 = vunpack.i.h.bf16 %v3970_v16  ;;  %v3971_v19 = vunpack.i.l.bf16 %v3970_v16 }
 0x625   : > { %v2823_v45 = vpack.c.bf16 %v3974_v57, %v3862_v61  ;;  %v2807_v60 = vpack.c.bf16 %v3971_v19, %v3859_v34  ;;  %v3902_v61 = vunpack.i.h.bf16 %v3898_v50  ;;  %v3899_v34 = vunpack.i.l.bf16 %v3898_v50 }
 0x627   : > { %2839 = vst [vmem:[%s5823_s14] sm:$0xff] %v2807_v60 }
 0x628   : > { %2855 = vst [vmem:[%s5823_s14 + $0x80] sm:$0xff] %v2823_v45  ;;  %v3903_v38 = vpop.trf.xlu0 }
 0x62a   : > { %v3975_v40 = vpop.trf.xlu1 }
 0x62b   : > { %v3979_v56 = vunpack.i.h.bf16 %v3975_v40  ;;  %v3976_v13 = vunpack.i.l.bf16 %v3975_v40 }
 0x62d   : > { %v2824_v29 = vpack.c.bf16 %v3979_v56, %v3867_v0  ;;  %v2808_v1 = vpack.c.bf16 %v3976_v13, %v3864_v15  ;;  %v3907_v0 = vunpack.i.h.bf16 %v3903_v38  ;;  %v3904_v15 = vunpack.i.l.bf16 %v3903_v38 }
 0x62f   : > { %2840 = vst [vmem:[%s5823_s14 + $0x8] sm:$0xff] %v2808_v1 }
 0x630   : > { %2856 = vst [vmem:[%s5823_s14 + $0x88] sm:$0xff] %v2824_v29  ;;  %v3908_v55 = vpop.trf.xlu0 }
 0x632   : > { %v3980_v12 = vpop.trf.xlu1 }
 0x633   : > { %v3984_v46 = vunpack.i.h.bf16 %v3980_v12  ;;  %v3981_v47 = vunpack.i.l.bf16 %v3980_v12 }
 0x635   : > { %v2825_v43 = vpack.c.bf16 %v3984_v46, %v3872_v8  ;;  %v2809_v41 = vpack.c.bf16 %v3981_v47, %v3869_v3  ;;  %v3912_v8 = vunpack.i.h.bf16 %v3908_v55  ;;  %v3909_v3 = vunpack.i.l.bf16 %v3908_v55 }
 0x637   : > { %2841 = vst [vmem:[%s5823_s14 + $0x10] sm:$0xff] %v2809_v41 }
 0x638   : > { %2857 = vst [vmem:[%s5823_s14 + $0x90] sm:$0xff] %v2825_v43  ;;  %v3913_v52 = vpop.trf.xlu0 }
 0x63a   : > { %v3985_v35 = vpop.trf.xlu1 }
 0x63b   : > { %v3989_v30 = vunpack.i.h.bf16 %v3985_v35  ;;  %v3986_v11 = vunpack.i.l.bf16 %v3985_v35 }
 0x63d   : > { %v2826_v62 = vpack.c.bf16 %v3989_v30, %v3877_v59  ;;  %v2810_v36 = vpack.c.bf16 %v3986_v11, %v3874_v54  ;;  %v3917_v59 = vunpack.i.h.bf16 %v3913_v52  ;;  %v3914_v54 = vunpack.i.l.bf16 %v3913_v52  ;;  %v2975_v52 = vld [vmem:[%s5823_s14 + $0x8] sm:$0xff] (%p4196_p5) }
 0x63e   : > { %2976 = vst [vmem:[%s5866_s21 + $0x10] sm:$0xff] (%p4196_p5), %v2975_v52 }
 0x63f   : > { %2842 = vst [vmem:[%s5823_s14 + $0x18] sm:$0xff] %v2810_v36 }
 0x640   : > { %2858 = vst [vmem:[%s5823_s14 + $0x98] sm:$0xff] %v2826_v62  ;;  %v3918_v26 = vpop.trf.xlu0 }
 0x642   : > { %v3990_v37 = vpop.trf.xlu1 }
 0x643   : > { %v3994_v49 = vunpack.i.h.bf16 %v3990_v37  ;;  %v3991_v18 = vunpack.i.l.bf16 %v3990_v37 }
 0x645   : > { %v2827_v6 = vpack.c.bf16 %v3994_v49, %v3882_v44  ;;  %v2811_v32 = vpack.c.bf16 %v3991_v18, %v3879_v58  ;;  %v3922_v44 = vunpack.i.h.bf16 %v3918_v26  ;;  %v3919_v58 = vunpack.i.l.bf16 %v3918_v26 }
 0x647   : > { %2843 = vst [vmem:[%s5823_s14 + $0x20] sm:$0xff] %v2811_v32 }
 0x648   : > { %2859 = vst [vmem:[%s5823_s14 + $0xa0] sm:$0xff] %v2827_v6  ;;  %v3923_v39 = vpop.trf.xlu0 }
 0x649   : > { %v3927_v32 = vunpack.i.h.bf16 %v3923_v39 }
 0x64a   : > { %v3995_v14 = vpop.trf.xlu1 }
 0x64b   : > { %v3999_v53 = vunpack.i.h.bf16 %v3995_v14  ;;  %v3996_v10 = vunpack.i.l.bf16 %v3995_v14 }
 0x64d   : > { %v2828_v33 = vpack.c.bf16 %v3999_v53, %v3887_v20  ;;  %v2812_v25 = vpack.c.bf16 %v3996_v10, %v3884_v27  ;;  %v3924_v20 = vunpack.i.l.bf16 %v3923_v39  ;;  %v3007_v39 = vld [vmem:[%s5823_s14 + $0x88] sm:$0xff] (%p4196_p5) }
 0x64e   : > { %3008 = vst [vmem:[%s5866_s21 + $0x110] sm:$0xff] (%p4196_p5), %v3007_v39 }
 0x64f   : > { %2844 = vst [vmem:[%s5823_s14 + $0x28] sm:$0xff] %v2812_v25 }
 0x650   : > { %2860 = vst [vmem:[%s5823_s14 + $0xa8] sm:$0xff] %v2828_v33  ;;  %v3928_v17 = vpop.trf.xlu0 }
 0x651   : > { %v3932_v33 = vunpack.i.h.bf16 %v3928_v17  ;;  %v3929_v25 = vunpack.i.l.bf16 %v3928_v17 }
 0x652   : > { %v4000_v5 = vpop.trf.xlu1 }
 0x653   : > { %v4004_v7 = vunpack.i.h.bf16 %v4000_v5  ;;  %v4001_v48 = vunpack.i.l.bf16 %v4000_v5 }
 0x655   : > { %v2829_v24 = vpack.c.bf16 %v4004_v7, %v3892_v22  ;;  %v2813_v31 = vpack.c.bf16 %v4001_v48, %v3889_v21 }
 0x657   : > { %2845 = vst [vmem:[%s5823_s14 + $0x30] sm:$0xff] %v2813_v31 }
 0x658   : > { %2861 = vst [vmem:[%s5823_s14 + $0xb0] sm:$0xff] %v2829_v24  ;;  %v3933_v63 = vpop.trf.xlu0 }
 0x659   : > { %v3937_v55 = vunpack.i.h.bf16 %v3933_v63  ;;  %v3934_v24 = vunpack.i.l.bf16 %v3933_v63 }
 0x65a   : > { %v4005_v51 = vpop.trf.xlu1 }
 0x65b   : > { %v4009_v23 = vunpack.i.h.bf16 %v4005_v51  ;;  %v4006_v28 = vunpack.i.l.bf16 %v4005_v51 }
 0x65d   : > { %v2830_v2 = vpack.c.bf16 %v4009_v23, %v3897_v9  ;;  %v2814_v4 = vpack.c.bf16 %v4006_v28, %v3894_v42  ;;  %v2973_v28 = vld [vmem:[%s5823_s14] sm:$0xff] (%p4196_p5) }
 0x65e   : > { %2974 = vst [vmem:[%s5866_s21] sm:$0xff] (%p4196_p5), %v2973_v28 }
 0x65f   : > { %2846 = vst [vmem:[%s5823_s14 + $0x38] sm:$0xff] %v2814_v4  ;;  %v2979_v4 = vld [vmem:[%s5823_s14 + $0x18] sm:$0xff] (%p4196_p5) }
 0x660   : > { %2862 = vst [vmem:[%s5823_s14 + $0xb8] sm:$0xff] %v2830_v2  ;;  %v2977_v2 = vld [vmem:[%s5823_s14 + $0x10] sm:$0xff] (%p4196_p5) }
 0x661   : > { %2978 = vst [vmem:[%s5866_s21 + $0x20] sm:$0xff] (%p4196_p5), %v2977_v2 }
 0x662   : > { %v4010_v16 = vpop.trf.xlu1  ;;  %2980 = vst [vmem:[%s5866_s21 + $0x30] sm:$0xff] (%p4196_p5), %v2979_v4 }
 0x663   : > { %v4014_v57 = vunpack.i.h.bf16 %v4010_v16  ;;  %v4011_v19 = vunpack.i.l.bf16 %v4010_v16  ;;  %v2985_v16 = vld [vmem:[%s5823_s14 + $0x30] sm:$0xff] (%p4196_p5) }
 0x664   : > { %2986 = vst [vmem:[%s5866_s21 + $0x60] sm:$0xff] (%p4196_p5), %v2985_v16 }
 0x665   : > { %v2831_v45 = vpack.c.bf16 %v4014_v57, %v3902_v61  ;;  %v2815_v60 = vpack.c.bf16 %v4011_v19, %v3899_v34  ;;  %v2981_v61 = vld [vmem:[%s5823_s14 + $0x20] sm:$0xff] (%p4196_p5)  ;;  %v2983_v34 = vld [vmem:[%s5823_s14 + $0x28] sm:$0xff] (%p4196_p5) }
 0x666   : > { %2982 = vst [vmem:[%s5866_s21 + $0x40] sm:$0xff] (%p4196_p5), %v2981_v61  ;;  %v2987_v57 = vld [vmem:[%s5823_s14 + $0x38] sm:$0xff] (%p4196_p5) }
 0x667   : > { %2847 = vst [vmem:[%s5823_s14 + $0x40] sm:$0xff] %v2815_v60 }
 0x668   : > { %2863 = vst [vmem:[%s5823_s14 + $0xc0] sm:$0xff] %v2831_v45 }
 0x669   : > { %2984 = vst [vmem:[%s5866_s21 + $0x50] sm:$0xff] (%p4196_p5), %v2983_v34 }
 0x66a   : > { %v4015_v40 = vpop.trf.xlu1  ;;  %2988 = vst [vmem:[%s5866_s21 + $0x70] sm:$0xff] (%p4196_p5), %v2987_v57 }
 0x66b   : > { %v4019_v56 = vunpack.i.h.bf16 %v4015_v40  ;;  %v4016_v13 = vunpack.i.l.bf16 %v4015_v40 }
 0x66d   : > { %v2832_v29 = vpack.c.bf16 %v4019_v56, %v3907_v0  ;;  %v2816_v1 = vpack.c.bf16 %v4016_v13, %v3904_v15  ;;  %v3005_v13 = vld [vmem:[%s5823_s14 + $0x80] sm:$0xff] (%p4196_p5) }
 0x66e   : > { %v2989_v19 = vld [vmem:[%s5823_s14 + $0x40] sm:$0xff] (%p4196_p5)  ;;  %3006 = vst [vmem:[%s5866_s21 + $0x100] sm:$0xff] (%p4196_p5), %v3005_v13 }
 0x66f   : > { %2848 = vst [vmem:[%s5823_s14 + $0x48] sm:$0xff] %v2816_v1  ;;  %v3011_v1 = vld [vmem:[%s5823_s14 + $0x98] sm:$0xff] (%p4196_p5) }
 0x670   : > { %2864 = vst [vmem:[%s5823_s14 + $0xc8] sm:$0xff] %v2832_v29  ;;  %v3009_v29 = vld [vmem:[%s5823_s14 + $0x90] sm:$0xff] (%p4196_p5) }
 0x671   : > { %2990 = vst [vmem:[%s5866_s21 + $0x80] sm:$0xff] (%p4196_p5), %v2989_v19 }
 0x672   : > { %v4020_v12 = vpop.trf.xlu1  ;;  %3010 = vst [vmem:[%s5866_s21 + $0x120] sm:$0xff] (%p4196_p5), %v3009_v29 }
 0x673   : > { %v4024_v46 = vunpack.i.h.bf16 %v4020_v12  ;;  %v4021_v47 = vunpack.i.l.bf16 %v4020_v12  ;;  %3012 = vst [vmem:[%s5866_s21 + $0x130] sm:$0xff] (%p4196_p5), %v3011_v1  ;;  %v3017_v12 = vld [vmem:[%s5823_s14 + $0xb0] sm:$0xff] (%p4196_p5) }
 0x674   : > { %3018 = vst [vmem:[%s5866_s21 + $0x160] sm:$0xff] (%p4196_p5), %v3017_v12 }
 0x675   : > { %v2833_v43 = vpack.c.bf16 %v4024_v46, %v3912_v8  ;;  %v2817_v41 = vpack.c.bf16 %v4021_v47, %v3909_v3  ;;  %v3013_v8 = vld [vmem:[%s5823_s14 + $0xa0] sm:$0xff] (%p4196_p5)  ;;  %v3015_v3 = vld [vmem:[%s5823_s14 + $0xa8] sm:$0xff] (%p4196_p5)  ;;  %v3019_v46 = vld [vmem:[%s5823_s14 + $0xb8] sm:$0xff] (%p4196_p5) }
 0x676   : > { %v2991_v26 = vld [vmem:[%s5823_s14 + $0x48] sm:$0xff] (%p4196_p5)  ;;  %3014 = vst [vmem:[%s5866_s21 + $0x140] sm:$0xff] (%p4196_p5), %v3013_v8  ;;  %v3021_v47 = vld [vmem:[%s5823_s14 + $0xc0] sm:$0xff] (%p4196_p5) }
 0x677   : > { %2849 = vst [vmem:[%s5823_s14 + $0x50] sm:$0xff] %v2817_v41  ;;  %v3023_v17 = vld [vmem:[%s5823_s14 + $0xc8] sm:$0xff] (%p4196_p5) }
 0x678   : > { %2865 = vst [vmem:[%s5823_s14 + $0xd0] sm:$0xff] %v2833_v43 }
 0x679   : > { %2992 = vst [vmem:[%s5866_s21 + $0x90] sm:$0xff] (%p4196_p5), %v2991_v26 }
 0x67a   : > { %v4025_v35 = vpop.trf.xlu1  ;;  %3016 = vst [vmem:[%s5866_s21 + $0x150] sm:$0xff] (%p4196_p5), %v3015_v3 }
 0x67b   : > { %v4029_v30 = vunpack.i.h.bf16 %v4025_v35  ;;  %v4026_v11 = vunpack.i.l.bf16 %v4025_v35  ;;  %3020 = vst [vmem:[%s5866_s21 + $0x170] sm:$0xff] (%p4196_p5), %v3019_v46 }
 0x67c   : > { %3022 = vst [vmem:[%s5866_s21 + $0x180] sm:$0xff] (%p4196_p5), %v3021_v47 }
 0x67d   : > { %v2834_v62 = vpack.c.bf16 %v4029_v30, %v3917_v59  ;;  %v2818_v36 = vpack.c.bf16 %v4026_v11, %v3914_v54  ;;  %3024 = vst [vmem:[%s5866_s21 + $0x190] sm:$0xff] (%p4196_p5), %v3023_v17 }
 0x67e   : > { %v2993_v45 = vld [vmem:[%s5823_s14 + $0x50] sm:$0xff] (%p4196_p5) }
 0x67f   : > { %2850 = vst [vmem:[%s5823_s14 + $0x58] sm:$0xff] %v2818_v36  ;;  %v3025_v43 = vld [vmem:[%s5823_s14 + $0xd0] sm:$0xff] (%p4196_p5) }
 0x680   : > { %2866 = vst [vmem:[%s5823_s14 + $0xd8] sm:$0xff] %v2834_v62 }
 0x681   : > { %2994 = vst [vmem:[%s5866_s21 + $0xa0] sm:$0xff] (%p4196_p5), %v2993_v45 }
 0x682   : > { %v4030_v37 = vpop.trf.xlu1  ;;  %3026 = vst [vmem:[%s5866_s21 + $0x1a0] sm:$0xff] (%p4196_p5), %v3025_v43 }
 0x683   : > { %v4034_v49 = vunpack.i.h.bf16 %v4030_v37  ;;  %v4031_v18 = vunpack.i.l.bf16 %v4030_v37 }
 0x685   : > { %v2835_v50 = vpack.c.bf16 %v4034_v49, %v3922_v44  ;;  %v2819_v6 = vpack.c.bf16 %v4031_v18, %v3919_v58 }
 0x686   : > { %v2995_v60 = vld [vmem:[%s5823_s14 + $0x58] sm:$0xff] (%p4196_p5) }
 0x687   : > { %2851 = vst [vmem:[%s5823_s14 + $0x60] sm:$0xff] %v2819_v6  ;;  %v3027_v41 = vld [vmem:[%s5823_s14 + $0xd8] sm:$0xff] (%p4196_p5) }
 0x688   : > { %2867 = vst [vmem:[%s5823_s14 + $0xe0] sm:$0xff] %v2835_v50 }
 0x689   : > { %2996 = vst [vmem:[%s5866_s21 + $0xb0] sm:$0xff] (%p4196_p5), %v2995_v60 }
 0x68a   : > { %v4035_v27 = vpop.trf.xlu1  ;;  %3028 = vst [vmem:[%s5866_s21 + $0x1b0] sm:$0xff] (%p4196_p5), %v3027_v41 }
 0x68b   : > { %v4039_v14 = vunpack.i.h.bf16 %v4035_v27  ;;  %v4036_v53 = vunpack.i.l.bf16 %v4035_v27 }
 0x68d   : > { %v2836_v10 = vpack.c.bf16 %v4039_v14, %v3927_v32  ;;  %v2820_v38 = vpack.c.bf16 %v4036_v53, %v3924_v20 }
 0x68e   : > { %v2997_v0 = vld [vmem:[%s5823_s14 + $0x60] sm:$0xff] (%p4196_p5) }
 0x68f   : > { %2852 = vst [vmem:[%s5823_s14 + $0x68] sm:$0xff] %v2820_v38  ;;  %v3029_v59 = vld [vmem:[%s5823_s14 + $0xe0] sm:$0xff] (%p4196_p5) }
 0x690   : > { %2868 = vst [vmem:[%s5823_s14 + $0xe8] sm:$0xff] %v2836_v10 }
 0x691   : > { %2998 = vst [vmem:[%s5866_s21 + $0xc0] sm:$0xff] (%p4196_p5), %v2997_v0 }
 0x692   : > { %v4040_v22 = vpop.trf.xlu1  ;;  %3030 = vst [vmem:[%s5866_s21 + $0x1c0] sm:$0xff] (%p4196_p5), %v3029_v59 }
 0x693   : > { %v4044_v21 = vunpack.i.h.bf16 %v4040_v22  ;;  %v4041_v5 = vunpack.i.l.bf16 %v4040_v22 }
 0x695   : > { %v2837_v7 = vpack.c.bf16 %v4044_v21, %v3932_v33  ;;  %v2821_v48 = vpack.c.bf16 %v4041_v5, %v3929_v25 }
 0x696   : > { %v2999_v15 = vld [vmem:[%s5823_s14 + $0x68] sm:$0xff] (%p4196_p5) }
 0x697   : > { %2853 = vst [vmem:[%s5823_s14 + $0x70] sm:$0xff] %v2821_v48  ;;  %v3031_v54 = vld [vmem:[%s5823_s14 + $0xe8] sm:$0xff] (%p4196_p5) }
 0x698   : > { %2869 = vst [vmem:[%s5823_s14 + $0xf0] sm:$0xff] %v2837_v7 }
 0x699   : > { %3000 = vst [vmem:[%s5866_s21 + $0xd0] sm:$0xff] (%p4196_p5), %v2999_v15 }
 0x69a   : > { %v4045_v31 = vpop.trf.xlu1  ;;  %3032 = vst [vmem:[%s5866_s21 + $0x1d0] sm:$0xff] (%p4196_p5), %v3031_v54 }
 0x69b   : > { %v4049_v9 = vunpack.i.h.bf16 %v4045_v31  ;;  %v4046_v42 = vunpack.i.l.bf16 %v4045_v31 }
 0x69c   : > { %2877 = sbr.rel (!%p4196_p5) target bundleno = 1705 (0x6a9), region = 52 }
 0x69d   : > { %v2838_v51 = vpack.c.bf16 %v4049_v9, %v3937_v55  ;;  %v2822_v23 = vpack.c.bf16 %v4046_v42, %v3934_v24 }
 0x69e   : > { %v3001_v40 = vld [vmem:[%s5823_s14 + $0x70] sm:$0xff] (%p4196_p5) }
 0x69f   : > { %2854 = vst [vmem:[%s5823_s14 + $0x78] sm:$0xff] %v2822_v23  ;;  %v3033_v35 = vld [vmem:[%s5823_s14 + $0xf0] sm:$0xff] (%p4196_p5) }
 0x6a0   : > { %2870 = vst [vmem:[%s5823_s14 + $0xf8] sm:$0xff] %v2838_v51 }
 0x6a1   : > { %3002 = vst [vmem:[%s5866_s21 + $0xe0] sm:$0xff] %v3001_v40 }
 0x6a2   : > { %3034 = vst [vmem:[%s5866_s21 + $0x1e0] sm:$0xff] %v3033_v35 }
 0x6a6   : > { %v3003_v56 = vld [vmem:[%s5823_s14 + $0x78] sm:$0xff] }
 0x6a7   : > { %3004 = vst [vmem:[%s5866_s21 + $0xf0] sm:$0xff] %v3003_v56  ;;  %v3035_v30 = vld [vmem:[%s5823_s14 + $0xf8] sm:$0xff] }
 0x6a8   : > { %3036 = vst [vmem:[%s5866_s21 + $0x1f0] sm:$0xff] %v3035_v30 }
 0x6a9 PF: > { %s17_s30 = sadd.s32 1, %s4107_s30   ;;  %s5960_s24 = smov %s4087_s25 }
 0x6aa   : > { %p14_p11 = scmp.ge.s32.totalorder %s17_s30, 6   ;;  %s5961_s25 = smov %s4207_s16 }
 0x6ab   : > { %s5962_s26 = smov %s4099_s28  ;;  %s5963_s27 = smov %s4103_s29 }
 0x6ac   : > { %s5964_s28 = smov %s5967_s8  ;;  %s5965_s29 = smov %s5971_s9 }
 0x6ad   :  { %16 = sbr.rel (!%p14_p11) target bundleno = 4 (0x4), region = 116 }

</bundles_post_ra>
